<compile_context>
chip_gen: v5e
topology: v5e:2x2
jax: 0.10.0
libtpu: 0.0.40
codegen_flags: <defaults>
</compile_context>

<pallas_src>
import functools
import math

import jax
import jax.numpy as jnp
from jax.experimental import pallas as pl
from jax.experimental.pallas import tpu as pltpu


# -----------------------------------------------------------------------------
# Tiling knobs
# -----------------------------------------------------------------------------
_GRIDLESS_MAX_ROWS = 256          # <= this many rows: single block, no grid
_MATMUL_TILE_M = 4096             # row-tile cap for the generic matmul kernel
_FC_TILE_M = 2048                 # row-tile cap for the fused FC tail
_CONV1_TILE_B = 32                # image-tile cap for the fused conv1 kernel
_VMEM_LIMIT = 32 * 1024 * 1024    # raise scoped VMEM (v5e default is 16 MiB)

_VMEM = pltpu.MemorySpace.VMEM


def _round_up(n, m):
    return (n + m - 1) // m * m


def _cdiv(a, b):
    return -(-a // b)


def _conv_out_hw(h, k, s):
    return (h - k) // s + 1


def _pick_tile_m(m, cap):
    """Row tile for an M-tiled grid; None => single gridless block."""
    if m <= _GRIDLESS_MAX_ROWS:
        return None
    # >= 2 blocks (v7x has 2 TensorCores), <= `cap` rows per block.
    return min(cap, _round_up(_cdiv(m, 2), 128))


# -----------------------------------------------------------------------------
# Pallas kernel: y = act(x @ w + b)   (bf16 MXU inputs, f32 accum/epilogue)
# -----------------------------------------------------------------------------
def _matmul_bias_kernel(x_ref, w_ref, b_ref, o_ref, *, relu):
    x = x_ref[...].astype(jnp.bfloat16)
    w = w_ref[...].astype(jnp.bfloat16)
    y = jnp.dot(x, w, preferred_element_type=jnp.float32)
    y = y + b_ref[...].astype(jnp.float32)
    if relu:
        y = jnp.maximum(y, 0.0)
    o_ref[...] = y.astype(o_ref.dtype)


def matmul_bias(x, w, b, *, relu=False, out_dtype=jnp.float32):
    """Fused x @ w + b (+ReLU).  Gridless for small M, M-tiled for large M."""
    M, K = x.shape
    K2, Nc = w.shape
    assert K == K2, (K, K2)
    kern = functools.partial(_matmul_bias_kernel, relu=relu)
    b2 = b.reshape(1, Nc)
    out_shape = jax.ShapeDtypeStruct((M, Nc), out_dtype)

    tile = _pick_tile_m(M, _MATMUL_TILE_M)
    if tile is None:
        # No grid: no pipelining machinery, no double buffering, one launch.
        return pl.pallas_call(
            kern,
            out_shape=out_shape,
            in_specs=[pl.BlockSpec(memory_space=_VMEM)] * 3,
            out_specs=pl.BlockSpec(memory_space=_VMEM),
        )(x, w, b2)

    # Large-M path: tile rows (K and Cout kept whole, weights resident across
    # the grid); "parallel" lets v7x shard the grid across both TensorCores.
    return pl.pallas_call(
        kern,
        out_shape=out_shape,
        grid=(pl.cdiv(M, tile),),
        in_specs=[
            pl.BlockSpec((tile, K), lambda i: (i, 0)),
            pl.BlockSpec((K, Nc), lambda i: (0, 0)),   # resident
            pl.BlockSpec((1, Nc), lambda i: (0, 0)),   # resident
        ],
        out_specs=pl.BlockSpec((tile, Nc), lambda i: (i, 0)),
        compiler_params=pltpu.CompilerParams(
            dimension_semantics=("parallel",),
            vmem_limit_bytes=_VMEM_LIMIT),
    )(x, w, b2)


# -----------------------------------------------------------------------------
# Pallas kernel: fused FC tail  q = relu(x @ w1 + b1) @ w2 + b2
# (w2/b2 are pre-padded to a multiple of 128 lanes; wrapper slices.)
# -----------------------------------------------------------------------------
def _fc_tail_kernel(x_ref, w1_ref, b1_ref, w2_ref, b2_ref, o_ref):
    h = jnp.dot(x_ref[...].astype(jnp.bfloat16), w1_ref[...],
                preferred_element_type=jnp.float32)
    h = jnp.maximum(h + b1_ref[...], 0.0)
    q = jnp.dot(h.astype(jnp.bfloat16), w2_ref[...],
                preferred_element_type=jnp.float32)
    o_ref[...] = q + b2_ref[...]


def fc_tail(flat, w1, b1, w2_pad, b2_pad, n_actions):
    N, K = flat.shape
    Hf = w1.shape[1]
    n_pad = w2_pad.shape[1]
    b1r = b1.reshape(1, Hf)
    b2r = b2_pad.reshape(1, n_pad)
    out_shape = jax.ShapeDtypeStruct((N, n_pad), jnp.float32)

    tile = _pick_tile_m(N, _FC_TILE_M)
    if tile is None:
        q = pl.pallas_call(
            _fc_tail_kernel,
            out_shape=out_shape,
            in_specs=[pl.BlockSpec(memory_space=_VMEM)] * 5,
            out_specs=pl.BlockSpec(memory_space=_VMEM),
        )(flat, w1, b1r, w2_pad, b2r)
    else:
        q = pl.pallas_call(
            _fc_tail_kernel,
            out_shape=out_shape,
            grid=(pl.cdiv(N, tile),),
            in_specs=[
                pl.BlockSpec((tile, K), lambda i: (i, 0)),
                pl.BlockSpec((K, Hf), lambda i: (0, 0)),      # resident
                pl.BlockSpec((1, Hf), lambda i: (0, 0)),      # resident
                pl.BlockSpec((Hf, n_pad), lambda i: (0, 0)),  # resident
                pl.BlockSpec((1, n_pad), lambda i: (0, 0)),   # resident
            ],
            out_specs=pl.BlockSpec((tile, n_pad), lambda i: (i, 0)),
            compiler_params=pltpu.CompilerParams(
                dimension_semantics=("parallel",),
                vmem_limit_bytes=_VMEM_LIMIT),
        )(flat, w1, b1r, w2_pad, b2r)
    return q[:, :n_actions]


# -----------------------------------------------------------------------------
# conv1: fused space-to-depth conv kernel (im2col done in VMEM, not HBM)
# -----------------------------------------------------------------------------
def _conv1_sd_kernel(x_ref, w_ref, b_ref, o_ref):
    # x_ref: (TB, Ho+1, Wo+1, 16*Cin) space-to-depth bf16 input window.
    # w_ref: (4, 16*Cin, Cout) bf16; index 2*dy+dx selects the (dy, dx) tap of
    #        the equivalent 2x2/stride-1 conv.
    # b_ref: (1, Cout) f32.   o_ref: (TB*Ho*Wo, Cout) bf16.
    tb, hq, wq, cin = x_ref.shape
    ho, wo = hq - 1, wq - 1
    cout = w_ref.shape[2]
    acc = jnp.zeros((tb * ho * wo, cout), jnp.float32)
    for dy in range(2):
        for dx in range(2):
            # Shifted window stays in VMEM: this *is* the im2col, in-kernel.
            p = x_ref[:, dy:dy + ho, dx:dx + wo, :].reshape(tb * ho * wo, cin)
            acc = acc + jnp.dot(p, w_ref[2 * dy + dx],
                                preferred_element_type=jnp.float32)
    y = jnp.maximum(acc + b_ref[...], 0.0)
    o_ref[...] = y.astype(o_ref.dtype)


def _conv1_pick_tb(n, ho, wo):
    rows = n * ho * wo
    if rows <= 1024 or n < 4:
        return None
    unit = 8 // math.gcd(ho * wo, 8)            # keep block rows % 8 == 0
    tb = min(_CONV1_TILE_B, max(1, 4096 // (ho * wo)), _cdiv(n, 2))
    tb = max(unit, (tb // unit) * unit)
    if tb >= n:
        return None
    return tb


def _conv1_sd_pallas(x_sd, w_sd, b1):
    n, hq, wq, cin = x_sd.shape
    ho, wo = hq - 1, wq - 1
    cout = w_sd.shape[2]
    b2 = b1.reshape(1, cout)
    out_shape = jax.ShapeDtypeStruct((n * ho * wo, cout), jnp.bfloat16)

    tb = _conv1_pick_tb(n, ho, wo)
    if tb is None:
        return pl.pallas_call(
            _conv1_sd_kernel,
            out_shape=out_shape,
            in_specs=[pl.BlockSpec(memory_space=_VMEM)] * 3,
            out_specs=pl.BlockSpec(memory_space=_VMEM),
        )(x_sd, w_sd, b2)

    return pl.pallas_call(
        _conv1_sd_kernel,
        out_shape=out_shape,
        grid=(pl.cdiv(n, tb),),
        in_specs=[
            pl.BlockSpec((tb, hq, wq, cin), lambda i: (i, 0, 0, 0)),
            pl.BlockSpec((4, cin, cout), lambda i: (0, 0, 0)),   # resident
            pl.BlockSpec((1, cout), lambda i: (0, 0)),           # resident
        ],
        out_specs=pl.BlockSpec((tb * ho * wo, cout), lambda i: (i, 0)),
        compiler_params=pltpu.CompilerParams(
            dimension_semantics=("parallel",),
            vmem_limit_bytes=_VMEM_LIMIT),
    )(x_sd, w_sd, b2)


@functools.lru_cache(maxsize=None)
def _conv1_fused_supported(n, hq, wq, cin, cout):
    """Compile/run the fused conv1 kernel once on zeros; cache the verdict."""
    try:
        x = jnp.zeros((n, hq, wq, cin), jnp.bfloat16)
        w = jnp.zeros((4, cin, cout), jnp.bfloat16)
        b = jnp.zeros((cout,), jnp.float32)
        jax.block_until_ready(_conv1_sd_pallas(x, w, b))
        return True
    except Exception:
        return False


def _conv1_sd_fallback(x_sd, w_sd, b1):
    # Fallback: materialize the (4-tap) patch matrix with XLA and reuse the
    # generic fused matmul kernel.  Only used if the fused conv1 kernel fails
    # to lower on the current Mosaic build.
    n, hq, wq, cin = x_sd.shape
    ho, wo = hq - 1, wq - 1
    cout = w_sd.shape[2]
    cols = [x_sd[:, dy:dy + ho, dx:dx + wo, :]
            for dy in range(2) for dx in range(2)]
    patches = jnp.concatenate(cols, axis=-1).reshape(n * ho * wo, 4 * cin)
    return matmul_bias(patches, w_sd.reshape(4 * cin, cout), b1,
                       relu=True, out_dtype=jnp.bfloat16)


def conv1_sd(x_sd, w_sd, b1):
    n, hq, wq, cin = x_sd.shape
    cout = w_sd.shape[2]
    if _conv1_fused_supported(n, hq, wq, cin, cout):
        return _conv1_sd_pallas(x_sd, w_sd, b1)
    return _conv1_sd_fallback(x_sd, w_sd, b1)


# -----------------------------------------------------------------------------
# conv2 / conv3 (valid padding) via NHWC im2col + fused Pallas matmul
# -----------------------------------------------------------------------------
def conv2d_relu_nhwc(x, w_k, b, k, stride):
    # x: (N, H, W, Cin) bf16; w_k: (k*k*Cin, Cout) bf16 in (KH, KW, Cin) order.
    # TODO(synk): conv2/conv3 patch extraction stays XLA-side (strided slices +
    # one concat); these activations are tiny so the HBM traffic is negligible,
    # but a fully fused conv2+conv3+FC-tail kernel (all weights resident in
    # VMEM) would remove two more launches on the small-batch inference path.
    N, H, W, C = x.shape
    Ho = _conv_out_hw(H, k, stride)
    Wo = _conv_out_hw(W, k, stride)
    cols = [x[:, i:i + stride * Ho:stride, j:j + stride * Wo:stride, :]
            for i in range(k) for j in range(k)]
    patches = jnp.concatenate(cols, axis=-1).reshape(N * Ho * Wo, k * k * C)
    y = matmul_bias(patches, w_k, b, relu=True, out_dtype=jnp.bfloat16)
    return y.reshape(N, Ho, Wo, -1)


# -----------------------------------------------------------------------------
# Parameters (PyTorch layout) + kernel-friendly preparation
# -----------------------------------------------------------------------------
def init_dqn_params(key, input_shape, n_actions):
    C, H, W = input_shape
    h1, w1 = _conv_out_hw(H, 8, 4), _conv_out_hw(W, 8, 4)
    h2, w2 = _conv_out_hw(h1, 4, 2), _conv_out_hw(w1, 4, 2)
    h3, w3 = _conv_out_hw(h2, 3, 1), _conv_out_hw(w2, 3, 1)
    conv_out_size = 64 * h3 * w3

    ks = jax.random.split(key, 10)

    def uinit(k, shape, fan_in):
        bound = fan_in ** -0.5
        return jax.random.uniform(k, shape, jnp.float32, -bound, bound)

    return {
        "w1": uinit(ks[0], (32, C, 8, 8), C * 8 * 8),
        "b1": uinit(ks[1], (32,), C * 8 * 8),
        "w2": uinit(ks[2], (64, 32, 4, 4), 32 * 4 * 4),
        "b2": uinit(ks[3], (64,), 32 * 4 * 4),
        "w3": uinit(ks[4], (64, 64, 3, 3), 64 * 3 * 3),
        "b3": uinit(ks[5], (64,), 64 * 3 * 3),
        "wf1": uinit(ks[6], (conv_out_size, 512), conv_out_size),
        "bf1": uinit(ks[7], (512,), conv_out_size),
        "wf2": uinit(ks[8], (512, n_actions), 512),
        "bf2": uinit(ks[9], (n_actions,), 512),
    }


def prepare_kernel_params(params, input_shape, n_actions):
    """One-time, zero-runtime-cost reshaping of PyTorch-layout params."""
    C, H, W = input_shape
    h1, w1_ = _conv_out_hw(H, 8, 4), _conv_out_hw(W, 8, 4)
    h2, w2_ = _conv_out_hw(h1, 4, 2), _conv_out_hw(w1_, 4, 2)
    h3, w3_ = _conv_out_hw(h2, 3, 1), _conv_out_hw(w2_, 3, 1)

    def conv_w(w):
        # (Cout, Cin, KH, KW) -> (KH*KW*Cin, Cout), matching the NHWC im2col
        # column order (KH, KW, Cin).
        cout = w.shape[0]
        return jnp.transpose(w, (2, 3, 1, 0)).reshape(-1, cout).astype(jnp.bfloat16)

    # conv1: fold the 1/255 input scale in, then regroup the 8x8/stride-4
    # kernel into the four 4x4 "space-to-depth" taps of a 2x2/stride-1 conv.
    w1 = params["w1"] * (1.0 / 255.0)              # (32, C, 8, 8)
    w1 = jnp.transpose(w1, (2, 3, 1, 0))           # (8, 8, C, 32)  [i, j, ci, co]
    w1 = w1.reshape(2, 4, 2, 4, C, 32)             # [a, di, b, dj, ci, co]
    w1 = jnp.transpose(w1, (0, 2, 1, 3, 4, 5))     # [a, b, di, dj, ci, co]
    w1_sd = w1.reshape(4, 16 * C, 32).astype(jnp.bfloat16)

    # Permute FC1 rows from PyTorch's NCHW flatten order to NHWC flatten order.
    wf1 = params["wf1"]
    fc1_out = wf1.shape[1]
    wf1_nhwc = (wf1.reshape(64, h3, w3_, fc1_out)
                   .transpose(1, 2, 0, 3)
                   .reshape(64 * h3 * w3_, fc1_out))

    # Pad FC2 to a lane-dense (multiple-of-128) output; sliced in the wrapper.
    n_pad = _round_up(n_actions, 128)
    wf2 = params["wf2"]
    wf2_pad = jnp.zeros((wf2.shape[0], n_pad), jnp.float32).at[:, :n_actions].set(wf2)
    bf2_pad = jnp.zeros((n_pad,), jnp.float32).at[:n_actions].set(params["bf2"])

    return {
        "w1": w1_sd,
        "b1": params["b1"].astype(jnp.float32),
        "w2": conv_w(params["w2"]),
        "b2": params["b2"].astype(jnp.float32),
        "w3": conv_w(params["w3"]),
        "b3": params["b3"].astype(jnp.float32),
        "wf1": wf1_nhwc.astype(jnp.bfloat16),
        "bf1": params["bf1"].astype(jnp.float32),
        "wf2": wf2_pad.astype(jnp.bfloat16),
        "bf2": bf2_pad,
    }


# -----------------------------------------------------------------------------
# Forward
# -----------------------------------------------------------------------------
def dqn_forward(kparams, x, *, n_actions):
    # x: (N, C, H, W) pixel values in [0, 255] (PyTorch NCHW interface).
    N, C, H, W = x.shape
    ho = _conv_out_hw(H, 8, 4)
    wo = _conv_out_hw(W, 8, 4)
    hu, wu = 4 * ho + 4, 4 * wo + 4     # rows/cols actually touched by conv1

    # Single input relayout (same byte count as the previous NCHW->NHWC
    # transpose): space-to-depth by conv1's stride, bf16.
    # (N, C, H, W) -> (N, Ho+1, Wo+1, 16*C); conv1 becomes a 2x2/stride-1 conv
    # handled entirely inside the Pallas kernel (im2col stays in VMEM).
    xs = x[:, :, :hu, :wu].astype(jnp.bfloat16)
    xs = xs.reshape(N, C, ho + 1, 4, wo + 1, 4)
    xs = jnp.transpose(xs, (0, 2, 4, 3, 5, 1)).reshape(N, ho + 1, wo + 1, 16 * C)

    a1 = conv1_sd(xs, kparams["w1"], kparams["b1"]).reshape(N, ho, wo, 32)
    a2 = conv2d_relu_nhwc(a1, kparams["w2"], kparams["b2"], k=4, stride=2)
    a3 = conv2d_relu_nhwc(a2, kparams["w3"], kparams["b3"], k=3, stride=1)
    flat = a3.reshape(N, -1)            # NHWC flatten (wf1 rows pre-permuted)
    return fc_tail(flat, kparams["wf1"], kparams["bf1"],
                   kparams["wf2"], kparams["bf2"], n_actions)


# -----------------------------------------------------------------------------
if __name__ == "__main__":
    input_shape = (4, 44, 44)   # (C, H, W) small Atari-like frame stack
    n_actions = 6
    batch = 2

    key = jax.random.PRNGKey(0)
    k_params, k_x = jax.random.split(key)

    params = init_dqn_params(k_params, input_shape, n_actions)
    kparams = prepare_kernel_params(params, input_shape, n_actions)
    x = jax.random.uniform(k_x, (batch,) + input_shape,
                           jnp.float32, 0.0, 255.0)

    # Warm the conv1 fused-kernel probe outside jit (one-time compile, or
    # silent fallback to the wrapper-side im2col path if lowering fails).
    C, H, W = input_shape
    ho, wo = _conv_out_hw(H, 8, 4), _conv_out_hw(W, 8, 4)
    _conv1_fused_supported(batch, ho + 1, wo + 1, 16 * C, 32)

    fwd = jax.jit(functools.partial(dqn_forward, n_actions=n_actions))
    q = fwd(kparams, x)
    jax.block_until_ready(q)

    assert q.shape == (batch, n_actions), q.shape
    assert q.dtype == jnp.float32
    assert bool(jnp.all(jnp.isfinite(q)))
    print("KERNEL_OK")
</pallas_src>

<mosaic_0001>
module attributes {stable_mosaic.version = 11 : i64} {
  func.func @_conv1_sd_kernel(%arg0: memref<2x11x11x64xbf16, #tpu.memory_space<vmem>>, %arg1: memref<4x64x32xbf16, #tpu.memory_space<vmem>>, %arg2: memref<1x32xf32, #tpu.memory_space<vmem>>, %arg3: memref<200x32xbf16, #tpu.memory_space<vmem>>) attributes {dimension_semantics = [], scalar_prefetch = 0 : i64, scratch_operands = 0 : i64, tpu.core_type = #tpu.core_type<tc>} {
    %cst = arith.constant 0.000000e+00 : f32
    %0 = vector.broadcast %cst : f32 to vector<200x32xf32>
    %c0 = arith.constant 0 : index
    %c0_0 = arith.constant 0 : index
    %c0_1 = arith.constant 0 : index
    %c0_2 = arith.constant 0 : index
    %1 = vector.load %arg0[%c0, %c0_0, %c0_1, %c0_2] : memref<2x11x11x64xbf16, #tpu.memory_space<vmem>>, vector<2x10x10x64xbf16>
    %2 = vector.shape_cast %1 : vector<2x10x10x64xbf16> to vector<200x64xbf16>
    %c0_3 = arith.constant 0 : index
    %c0_4 = arith.constant 0 : index
    %c0_5 = arith.constant 0 : index
    %3 = vector.load %arg1[%c0_3, %c0_4, %c0_5] : memref<4x64x32xbf16, #tpu.memory_space<vmem>>, vector<1x64x32xbf16>
    %4 = vector.shape_cast %3 : vector<1x64x32xbf16> to vector<64x32xbf16>
    %cst_6 = arith.constant dense<0.000000e+00> : vector<200x32xf32>
    %5 = tpu.matmul %2, %4, %cst_6 {dimension_numbers = #tpu.dot_dimension_numbers<[1], [0], [0], [1], [0, 0, 1, 1], [], []>} : vector<200x64xbf16>, vector<64x32xbf16>, vector<200x32xf32> -> vector<200x32xf32>
    %6 = arith.addf %0, %5 : vector<200x32xf32>
    %c0_7 = arith.constant 0 : index
    %c0_8 = arith.constant 0 : index
    %c1 = arith.constant 1 : index
    %c0_9 = arith.constant 0 : index
    %7 = vector.load %arg0[%c0_7, %c0_8, %c1, %c0_9] : memref<2x11x11x64xbf16, #tpu.memory_space<vmem>>, vector<2x10x10x64xbf16>
    %8 = vector.shape_cast %7 : vector<2x10x10x64xbf16> to vector<200x64xbf16>
    %c1_10 = arith.constant 1 : index
    %c0_11 = arith.constant 0 : index
    %c0_12 = arith.constant 0 : index
    %9 = vector.load %arg1[%c1_10, %c0_11, %c0_12] : memref<4x64x32xbf16, #tpu.memory_space<vmem>>, vector<1x64x32xbf16>
    %10 = vector.shape_cast %9 : vector<1x64x32xbf16> to vector<64x32xbf16>
    %cst_13 = arith.constant dense<0.000000e+00> : vector<200x32xf32>
    %11 = tpu.matmul %8, %10, %cst_13 {dimension_numbers = #tpu.dot_dimension_numbers<[1], [0], [0], [1], [0, 0, 1, 1], [], []>} : vector<200x64xbf16>, vector<64x32xbf16>, vector<200x32xf32> -> vector<200x32xf32>
    %12 = arith.addf %6, %11 : vector<200x32xf32>
    %c0_14 = arith.constant 0 : index
    %c1_15 = arith.constant 1 : index
    %c0_16 = arith.constant 0 : index
    %c0_17 = arith.constant 0 : index
    %13 = vector.load %arg0[%c0_14, %c1_15, %c0_16, %c0_17] : memref<2x11x11x64xbf16, #tpu.memory_space<vmem>>, vector<2x10x10x64xbf16>
    %14 = vector.shape_cast %13 : vector<2x10x10x64xbf16> to vector<200x64xbf16>
    %c2 = arith.constant 2 : index
    %c0_18 = arith.constant 0 : index
    %c0_19 = arith.constant 0 : index
    %15 = vector.load %arg1[%c2, %c0_18, %c0_19] : memref<4x64x32xbf16, #tpu.memory_space<vmem>>, vector<1x64x32xbf16>
    %16 = vector.shape_cast %15 : vector<1x64x32xbf16> to vector<64x32xbf16>
    %cst_20 = arith.constant dense<0.000000e+00> : vector<200x32xf32>
    %17 = tpu.matmul %14, %16, %cst_20 {dimension_numbers = #tpu.dot_dimension_numbers<[1], [0], [0], [1], [0, 0, 1, 1], [], []>} : vector<200x64xbf16>, vector<64x32xbf16>, vector<200x32xf32> -> vector<200x32xf32>
    %18 = arith.addf %12, %17 : vector<200x32xf32>
    %c0_21 = arith.constant 0 : index
    %c1_22 = arith.constant 1 : index
    %c1_23 = arith.constant 1 : index
    %c0_24 = arith.constant 0 : index
    %19 = vector.load %arg0[%c0_21, %c1_22, %c1_23, %c0_24] : memref<2x11x11x64xbf16, #tpu.memory_space<vmem>>, vector<2x10x10x64xbf16>
    %20 = vector.shape_cast %19 : vector<2x10x10x64xbf16> to vector<200x64xbf16>
    %c3 = arith.constant 3 : index
    %c0_25 = arith.constant 0 : index
    %c0_26 = arith.constant 0 : index
    %21 = vector.load %arg1[%c3, %c0_25, %c0_26] : memref<4x64x32xbf16, #tpu.memory_space<vmem>>, vector<1x64x32xbf16>
    %22 = vector.shape_cast %21 : vector<1x64x32xbf16> to vector<64x32xbf16>
    %cst_27 = arith.constant dense<0.000000e+00> : vector<200x32xf32>
    %23 = tpu.matmul %20, %22, %cst_27 {dimension_numbers = #tpu.dot_dimension_numbers<[1], [0], [0], [1], [0, 0, 1, 1], [], []>} : vector<200x64xbf16>, vector<64x32xbf16>, vector<200x32xf32> -> vector<200x32xf32>
    %24 = arith.addf %18, %23 : vector<200x32xf32>
    %c0_28 = arith.constant 0 : index
    %c0_29 = arith.constant 0 : index
    %25 = vector.load %arg2[%c0_28, %c0_29] : memref<1x32xf32, #tpu.memory_space<vmem>>, vector<1x32xf32>
    %26 = vector.broadcast %25 : vector<1x32xf32> to vector<200x32xf32>
    %27 = arith.addf %24, %26 : vector<200x32xf32>
    %cst_30 = arith.constant 0.000000e+00 : f32
    %28 = vector.broadcast %cst_30 : f32 to vector<200x32xf32>
    %29 = arith.maximumf %27, %28 : vector<200x32xf32>
    %30 = arith.truncf %29 : vector<200x32xf32> to vector<200x32xbf16>
    %c0_31 = arith.constant 0 : index
    %c0_32 = arith.constant 0 : index
    %31 = vector.load %arg3[%c0_31, %c0_32] : memref<200x32xbf16, #tpu.memory_space<vmem>>, vector<200x32xbf16>
    tpu.vector_store %arg3[%c0_31, %c0_32], %30 {strides = array<i32>} : memref<200x32xbf16, #tpu.memory_space<vmem>>, vector<200x32xbf16>,
    return
  }
}

module attributes {stable_mosaic.version = 11 : i64} {
  func.func @_matmul_bias_kernel(%arg0: memref<200x256xbf16, #tpu.memory_space<vmem>>, %arg1: memref<256x32xbf16, #tpu.memory_space<vmem>>, %arg2: memref<1x32xf32, #tpu.memory_space<vmem>>, %arg3: memref<200x32xbf16, #tpu.memory_space<vmem>>) attributes {dimension_semantics = [], scalar_prefetch = 0 : i64, scratch_operands = 0 : i64, tpu.core_type = #tpu.core_type<tc>} {
    %c0 = arith.constant 0 : index
    %c0_0 = arith.constant 0 : index
    %0 = vector.load %arg0[%c0, %c0_0] : memref<200x256xbf16, #tpu.memory_space<vmem>>, vector<200x256xbf16>
    %c0_1 = arith.constant 0 : index
    %c0_2 = arith.constant 0 : index
    %1 = vector.load %arg1[%c0_1, %c0_2] : memref<256x32xbf16, #tpu.memory_space<vmem>>, vector<256x32xbf16>
    %cst = arith.constant dense<0.000000e+00> : vector<200x32xf32>
    %2 = tpu.matmul %0, %1, %cst {dimension_numbers = #tpu.dot_dimension_numbers<[1], [0], [0], [1], [0, 0, 1, 1], [], []>} : vector<200x256xbf16>, vector<256x32xbf16>, vector<200x32xf32> -> vector<200x32xf32>
    %c0_3 = arith.constant 0 : index
    %c0_4 = arith.constant 0 : index
    %3 = vector.load %arg2[%c0_3, %c0_4] : memref<1x32xf32, #tpu.memory_space<vmem>>, vector<1x32xf32>
    %4 = vector.broadcast %3 : vector<1x32xf32> to vector<200x32xf32>
    %5 = arith.addf %2, %4 : vector<200x32xf32>
    %cst_5 = arith.constant 0.000000e+00 : f32
    %6 = vector.broadcast %cst_5 : f32 to vector<200x32xf32>
    %7 = arith.maximumf %5, %6 : vector<200x32xf32>
    %8 = arith.truncf %7 : vector<200x32xf32> to vector<200x32xbf16>
    %c0_6 = arith.constant 0 : index
    %c0_7 = arith.constant 0 : index
    %9 = vector.load %arg3[%c0_6, %c0_7] : memref<200x32xbf16, #tpu.memory_space<vmem>>, vector<200x32xbf16>
    tpu.vector_store %arg3[%c0_6, %c0_7], %8 {strides = array<i32>} : memref<200x32xbf16, #tpu.memory_space<vmem>>, vector<200x32xbf16>,
    return
  }
}

module attributes {stable_mosaic.version = 11 : i64} {
  func.func @_matmul_bias_kernel(%arg0: memref<32x512xbf16, #tpu.memory_space<vmem>>, %arg1: memref<512x64xbf16, #tpu.memory_space<vmem>>, %arg2: memref<1x64xf32, #tpu.memory_space<vmem>>, %arg3: memref<32x64xbf16, #tpu.memory_space<vmem>>) attributes {dimension_semantics = [], scalar_prefetch = 0 : i64, scratch_operands = 0 : i64, tpu.core_type = #tpu.core_type<tc>} {
    %c0 = arith.constant 0 : index
    %c0_0 = arith.constant 0 : index
    %0 = vector.load %arg0[%c0, %c0_0] : memref<32x512xbf16, #tpu.memory_space<vmem>>, vector<32x512xbf16>
    %c0_1 = arith.constant 0 : index
    %c0_2 = arith.constant 0 : index
    %1 = vector.load %arg1[%c0_1, %c0_2] : memref<512x64xbf16, #tpu.memory_space<vmem>>, vector<512x64xbf16>
    %cst = arith.constant dense<0.000000e+00> : vector<32x64xf32>
    %2 = tpu.matmul %0, %1, %cst {dimension_numbers = #tpu.dot_dimension_numbers<[1], [0], [0], [1], [0, 0, 1, 1], [], []>} : vector<32x512xbf16>, vector<512x64xbf16>, vector<32x64xf32> -> vector<32x64xf32>
    %c0_3 = arith.constant 0 : index
    %c0_4 = arith.constant 0 : index
    %3 = vector.load %arg2[%c0_3, %c0_4] : memref<1x64xf32, #tpu.memory_space<vmem>>, vector<1x64xf32>
    %4 = vector.broadcast %3 : vector<1x64xf32> to vector<32x64xf32>
    %5 = arith.addf %2, %4 : vector<32x64xf32>
    %cst_5 = arith.constant 0.000000e+00 : f32
    %6 = vector.broadcast %cst_5 : f32 to vector<32x64xf32>
    %7 = arith.maximumf %5, %6 : vector<32x64xf32>
    %8 = arith.truncf %7 : vector<32x64xf32> to vector<32x64xbf16>
    %c0_6 = arith.constant 0 : index
    %c0_7 = arith.constant 0 : index
    %9 = vector.load %arg3[%c0_6, %c0_7] : memref<32x64xbf16, #tpu.memory_space<vmem>>, vector<32x64xbf16>
    tpu.vector_store %arg3[%c0_6, %c0_7], %8 {strides = array<i32>} : memref<32x64xbf16, #tpu.memory_space<vmem>>, vector<32x64xbf16>,
    return
  }
}

module attributes {stable_mosaic.version = 11 : i64} {
  func.func @_matmul_bias_kernel(%arg0: memref<8x576xbf16, #tpu.memory_space<vmem>>, %arg1: memref<576x64xbf16, #tpu.memory_space<vmem>>, %arg2: memref<1x64xf32, #tpu.memory_space<vmem>>, %arg3: memref<8x64xbf16, #tpu.memory_space<vmem>>) attributes {dimension_semantics = [], scalar_prefetch = 0 : i64, scratch_operands = 0 : i64, tpu.core_type = #tpu.core_type<tc>} {
    %c0 = arith.constant 0 : index
    %c0_0 = arith.constant 0 : index
    %0 = vector.load %arg0[%c0, %c0_0] : memref<8x576xbf16, #tpu.memory_space<vmem>>, vector<8x576xbf16>
    %c0_1 = arith.constant 0 : index
    %c0_2 = arith.constant 0 : index
    %1 = vector.load %arg1[%c0_1, %c0_2] : memref<576x64xbf16, #tpu.memory_space<vmem>>, vector<576x64xbf16>
    %cst = arith.constant dense<0.000000e+00> : vector<8x64xf32>
    %2 = tpu.matmul %0, %1, %cst {dimension_numbers = #tpu.dot_dimension_numbers<[1], [0], [0], [1], [0, 0, 1, 1], [], []>} : vector<8x576xbf16>, vector<576x64xbf16>, vector<8x64xf32> -> vector<8x64xf32>
    %c0_3 = arith.constant 0 : index
    %c0_4 = arith.constant 0 : index
    %3 = vector.load %arg2[%c0_3, %c0_4] : memref<1x64xf32, #tpu.memory_space<vmem>>, vector<1x64xf32>
    %4 = vector.broadcast %3 : vector<1x64xf32> to vector<8x64xf32>
    %5 = arith.addf %2, %4 : vector<8x64xf32>
    %cst_5 = arith.constant 0.000000e+00 : f32
    %6 = vector.broadcast %cst_5 : f32 to vector<8x64xf32>
    %7 = arith.maximumf %5, %6 : vector<8x64xf32>
    %8 = arith.truncf %7 : vector<8x64xf32> to vector<8x64xbf16>
    %c0_6 = arith.constant 0 : index
    %c0_7 = arith.constant 0 : index
    %9 = vector.load %arg3[%c0_6, %c0_7] : memref<8x64xbf16, #tpu.memory_space<vmem>>, vector<8x64xbf16>
    tpu.vector_store %arg3[%c0_6, %c0_7], %8 {strides = array<i32>} : memref<8x64xbf16, #tpu.memory_space<vmem>>, vector<8x64xbf16>,
    return
  }
}

module attributes {stable_mosaic.version = 11 : i64} {
  func.func @_fc_tail_kernel(%arg0: memref<2x256xbf16, #tpu.memory_space<vmem>>, %arg1: memref<256x512xbf16, #tpu.memory_space<vmem>>, %arg2: memref<1x512xf32, #tpu.memory_space<vmem>>, %arg3: memref<512x128xbf16, #tpu.memory_space<vmem>>, %arg4: memref<1x128xf32, #tpu.memory_space<vmem>>, %arg5: memref<2x128xf32, #tpu.memory_space<vmem>>) attributes {dimension_semantics = [], scalar_prefetch = 0 : i64, scratch_operands = 0 : i64, tpu.core_type = #tpu.core_type<tc>} {
    %c0 = arith.constant 0 : index
    %c0_0 = arith.constant 0 : index
    %0 = vector.load %arg0[%c0, %c0_0] : memref<2x256xbf16, #tpu.memory_space<vmem>>, vector<2x256xbf16>
    %c0_1 = arith.constant 0 : index
    %c0_2 = arith.constant 0 : index
    %1 = vector.load %arg1[%c0_1, %c0_2] : memref<256x512xbf16, #tpu.memory_space<vmem>>, vector<256x512xbf16>
    %cst = arith.constant dense<0.000000e+00> : vector<2x512xf32>
    %2 = tpu.matmul %0, %1, %cst {dimension_numbers = #tpu.dot_dimension_numbers<[1], [0], [0], [1], [0, 0, 1, 1], [], []>} : vector<2x256xbf16>, vector<256x512xbf16>, vector<2x512xf32> -> vector<2x512xf32>
    %c0_3 = arith.constant 0 : index
    %c0_4 = arith.constant 0 : index
    %3 = vector.load %arg2[%c0_3, %c0_4] : memref<1x512xf32, #tpu.memory_space<vmem>>, vector<1x512xf32>
    %4 = vector.broadcast %3 : vector<1x512xf32> to vector<2x512xf32>
    %5 = arith.addf %2, %4 : vector<2x512xf32>
    %cst_5 = arith.constant 0.000000e+00 : f32
    %6 = vector.broadcast %cst_5 : f32 to vector<2x512xf32>
    %7 = arith.maximumf %5, %6 : vector<2x512xf32>
    %8 = arith.truncf %7 : vector<2x512xf32> to vector<2x512xbf16>
    %c0_6 = arith.constant 0 : index
    %c0_7 = arith.constant 0 : index
    %9 = vector.load %arg3[%c0_6, %c0_7] : memref<512x128xbf16, #tpu.memory_space<vmem>>, vector<512x128xbf16>
    %cst_8 = arith.constant dense<0.000000e+00> : vector<2x128xf32>
    %10 = tpu.matmul %8, %9, %cst_8 {dimension_numbers = #tpu.dot_dimension_numbers<[1], [0], [0], [1], [0, 0, 1, 1], [], []>} : vector<2x512xbf16>, vector<512x128xbf16>, vector<2x128xf32> -> vector<2x128xf32>
    %c0_9 = arith.constant 0 : index
    %c0_10 = arith.constant 0 : index
    %11 = vector.load %arg4[%c0_9, %c0_10] : memref<1x128xf32, #tpu.memory_space<vmem>>, vector<1x128xf32>
    %12 = vector.broadcast %11 : vector<1x128xf32> to vector<2x128xf32>
    %13 = arith.addf %10, %12 : vector<2x128xf32>
    %c0_11 = arith.constant 0 : index
    %c0_12 = arith.constant 0 : index
    %14 = vector.load %arg5[%c0_11, %c0_12] : memref<2x128xf32, #tpu.memory_space<vmem>>, vector<2x128xf32>
    tpu.vector_store %arg5[%c0_11, %c0_12], %13 {strides = array<i32>} : memref<2x128xf32, #tpu.memory_space<vmem>>, vector<2x128xf32>,
    return
  }
}

</mosaic_0001>

<bundles_post_ra>
// kernel: tpu_custom_call.1
= control target key start
LH: loop header
LB: loop body
LE: loop exit
PB: predicated region body
PF: predicated region fallthrough
CT: control target
= control target key end

     0   :  { %vm139_vm0 = vcmask 1041409   ;;  %vm143_vm1 = vcmask 1042434   ;;  %vm147_vm2 = vcmask 1043459   ;;  %vm135_vm3 = vcmask 1040384   ;;  %s6983_s1 = inlined_call_operand.vmem [shape: bf16[4,64,32], index: 1, kind: input, shape index: {}]   ;;  %s6984_s0 = inlined_call_operand.vmem [shape: bf16[2,11,11,64], index: 0, kind: input, shape index: {}]   ;;  %s6985_s2 = inlined_call_operand.vmem [shape: f32[1,32], index: 2, kind: input, shape index: {}]   ;;  %s6986_s3 = inlined_call_operand.vmem [shape: bf16[200,32], index: 3, kind: output, shape index: {}]  }
   0x1   :  { %v4953_v0 = vld [vmem:[%s6983_s1 + $0x58] sm:$0xff]  ;;  %v4952_v3 = vld [vmem:[%s6983_s1 + $0x50] sm:$0xff]  ;;  %v4951_v8 = vld [vmem:[%s6983_s1 + $0x48] sm:$0xff]  ;;  %vm627_vm4 = vsmask.f32 256 }
   0x2   :  { %v4949_v1 = vld [vmem:[%s6983_s1 + $0x38] sm:$0xff]  ;;  %2682 = vmatpush.bf16.msra.mxu2 %v4953_v0  ;;  %v4948_v4 = vld [vmem:[%s6983_s1 + $0x30] sm:$0xff]  ;;  %v4947_v9 = vld [vmem:[%s6983_s1 + $0x28] sm:$0xff]  ;;  %vm628_vm5 = vsmask.f32 1284 }
   0x3   :  { %v4945_v2 = vld [vmem:[%s6983_s1 + $0x18] sm:$0xff]  ;;  %1706 = vmatpush.bf16.msra.mxu0 %v4949_v1  ;;  %v4944_v6 = vld [vmem:[%s6983_s1 + $0x10] sm:$0xff]  ;;  %v4943_v10 = vld [vmem:[%s6983_s1 + $0x8] sm:$0xff]  ;;  %vm630_vm6 = vsmask.f32 2312 }
   0x4   :  { %v4957_v5 = vld [vmem:[%s6983_s1 + $0x78] sm:$0xff]  ;;  %1949 = vmatpush.bf16.msra.mxu1 %v4945_v2  ;;  %v4956_v7 = vld [vmem:[%s6983_s1 + $0x70] sm:$0xff]  ;;  %v4950_v11 = vld [vmem:[%s6983_s1 + $0x40] sm:$0xff]  ;;  %vm632_vm8 = vsmask.f32 3340 }
   0x5   :  { %4319 = vmatpush.bf16.msra.mxu3 %v4957_v5  ;;  %v15_v12 = vld [vmem:[%s6984_s0] sm:$0xf]  ;;  %v17_v13 = vld [vmem:[%s6984_s0 + $0x8] sm:$0xf]  ;;  %v447_v15 = vld [vmem:[%s6984_s0 + $0x4] sm:$0x3] }
   0x6   :  { %2683 = vmatpush.bf16.msra.mxu2 %v4952_v3  ;;  %v95_v14 = vrot.slane %v15_v12, 3  ;;  %v97_v16 = vrot.slane %v17_v13, 3  ;;  %v487_v18 = vrot.slane %v447_v15, 3  ;;  %vm629_vm7 = vmor %vm627_vm4, %vm628_vm5  ;;  %vm634_vm9 = vsmask.f32 4368 }
   0x7   :  { %1707 = vmatpush.bf16.msra.mxu0 %v4948_v4  ;;  %v19_v31 = vld [vmem:[%s6984_s0 + $0x10] sm:$0xf]  ;;  %vm631_vm10 = vmor %vm629_vm7, %vm630_vm6  ;;  %vm636_vm11 = vsmask.f32 5396  ;;  %vm638_vm13 = vsmask.f32 6424 }
   0x8   :  { %1950 = vmatpush.bf16.msra.mxu1 %v4944_v6  ;;  %v140_v17 = vsel %vm139_vm0, %v15_v12, %v95_v14  ;;  %v144_v19 = vsel %vm143_vm1, %v15_v12, %v95_v14  ;;  %v148_v20 = vsel %vm147_vm2, %v15_v12, %v95_v14  ;;  %v5028_v21 = vsel %vm135_vm3, %v15_v12, %v95_v14  ;;  %vm633_vm12 = vmor %vm631_vm10, %vm632_vm8  ;;  %v448_v37 = vld [vmem:[%s6984_s0 + $0xc] sm:$0x3]  ;;  %v449_v57 = vld [vmem:[%s6984_s0 + $0x14] sm:$0x3] }
   0x9   :  { %4320 = vmatpush.bf16.msra.mxu3 %v4956_v7  ;;  %v5030_v22 = vrot.slane %v140_v17, 1  ;;  %v157_v23 = vsel %vm139_vm0, %v17_v13, %v97_v16  ;;  %v5033_v24 = vrot.slane %v144_v19, 2  ;;  %v160_v25 = vsel %vm143_vm1, %v17_v13, %v97_v16  ;;  %vm635_vm15 = vmor %vm633_vm12, %vm634_vm9  ;;  %v21_v61 = vld [vmem:[%s6984_s0 + $0x18] sm:$0xf] }
   0xa   :  { %2684 = vmatpush.bf16.msra.mxu2 %v4951_v8  ;;  %v510_v26 = vsel %vm139_vm0, %v447_v15, %v487_v18  ;;  %v5037_v27 = vrot.slane %v148_v20, 3  ;;  %v5040_v28 = vsel %vm135_vm3, %v17_v13, %v97_v16  ;;  %v5042_v29 = vrot.slane %v157_v23, 1  ;;  %vm637_vm4 = vmor %vm635_vm15, %vm636_vm11 }
   0xb   :  { %1708 = vmatpush.bf16.msra.mxu0 %v4947_v9  ;;  %v163_v30 = vsel %vm147_vm2, %v17_v13, %v97_v16  ;;  %v5048_v32 = vrot.slane %v160_v25, 2  ;;  %v509_v33 = vsel %vm135_vm3, %v447_v15, %v487_v18  ;;  %v512_v34 = vrot.slane %v510_v26, 1  ;;  %vm639_vm5 = vmor %vm637_vm4, %vm638_vm13 }
   0xc   :  { %1951 = vmatpush.bf16.msra.mxu1 %v4943_v10  ;;  %vm640_vm14 = vsmask.f32 7452  ;;  %v642_v35 = vshrl.u32 %v5028_v21, 16  ;;  %v647_v36 = vshll.u32 %v5030_v22, 16  ;;  %v650_v38 = vshrl.u32 %v5030_v22, 16 }
   0xd   :  { %v655_v39 = vshll.u32 %v5033_v24, 16  ;;  %v658_v40 = vshrl.u32 %v5033_v24, 16  ;;  %v663_v41 = vshll.u32 %v5037_v27, 16  ;;  %v5060_v42 = vrot.slane %v163_v30, 3  ;;  %vm5065_vm6 = vmor %vm639_vm5, %vm640_vm14 }
   0xe   :  { %2685 = vmatpush.bf16.msra.mxu2 %v4950_v11  ;;  %v666_v43 = vshrl.u32 %v5037_v27, 16  ;;  %v670_v44 = vshll.u32 %v509_v33, 16  ;;  %v99_v45 = vrot.slane %v19_v31, 3  ;;  %v673_v46 = vshrl.u32 %v509_v33, 16 }
   0xf   :  { %v678_v47 = vshll.u32 %v512_v34, 16  ;;  %v488_v48 = vrot.slane %v448_v37, 3  ;;  %v681_v50 = vshrl.u32 %v5040_v28, 16  ;;  %v686_v51 = vshll.u32 %v5042_v29, 16 }
  0x10   :  { %v689_v52 = vshrl.u32 %v5042_v29, 16  ;;  %v649_v53 = vsel %vm5065_vm6, %v642_v35, %v647_v36  ;;  %v657_v54 = vsel %vm5065_vm6, %v650_v38, %v655_v39  ;;  %v665_v55 = vsel %vm5065_vm6, %v658_v40, %v663_v41  ;;  %v450_v35 = vld [vmem:[%s6984_s0 + $0x1c] sm:$0x3]  ;;  %v23_v39 = vld [vmem:[%s6984_s0 + $0x20] sm:$0xf] }
  0x11   :  { %v694_v56 = vshll.u32 %v5048_v32, 16  ;;  %v672_v58 = vsel %vm5065_vm6, %v666_v43, %v670_v44  ;;  %v697_v59 = vshrl.u32 %v5048_v32, 16  ;;  %v702_v60 = vshll.u32 %v5060_v42, 16  ;;  %1432 = vst [vmem:[#allocation1] ss:$9 sm:$0xff] %v649_v53 }
  0x12   :  { %v680_v62 = vsel %vm5065_vm6, %v673_v46, %v678_v47  ;;  %1435 = vst [vmem:[#allocation1 + $0x1] ss:$9 sm:$0xff] %v657_v54  ;;  %v516_v63 = vsel %vm139_vm0, %v448_v37, %v488_v48  ;;  %v688_v0 = vsel %vm5065_vm6, %v681_v50, %v686_v51  ;;  %v172_v1 = vsel %vm139_vm0, %v19_v31, %v99_v45 }
  0x13   :  { %1438 = vst [vmem:[#allocation1 + $0x2] ss:$9 sm:$0xff] %v665_v55  ;;  %v489_v2 = vrot.slane %v449_v57, 3  ;;  %v696_v3 = vsel %vm5065_vm6, %v689_v52, %v694_v56  ;;  %v101_v4 = vrot.slane %v21_v61, 3  ;;  %v175_v5 = vsel %vm143_vm1, %v19_v31, %v99_v45 }
  0x14   :  { %1441 = vst [vmem:[#allocation1 + $0x3] ss:$9 sm:$0xff] %v672_v58  ;;  %v704_v6 = vsel %vm5065_vm6, %v697_v59, %v702_v60  ;;  %v178_v7 = vsel %vm147_vm2, %v19_v31, %v99_v45  ;;  %v515_v8 = vsel %vm135_vm3, %v448_v37, %v488_v48  ;;  %v518_v9 = vrot.slane %v516_v63, 1 }
  0x15   :  { %1444 = vst [vmem:[#allocation1 + $0x4] ss:$9 sm:$0xff] %v680_v62  ;;  %v5102_v10 = vrot.slane %v172_v1, 1  ;;  %v5105_v11 = vsel %vm135_vm3, %v19_v31, %v99_v45  ;;  %v5107_v12 = vrot.slane %v175_v5, 2  ;;  %v522_v13 = vsel %vm139_vm0, %v449_v57, %v489_v2 }
  0x16   :  { %1447 = vst [vmem:[#allocation1 + $0x5] ss:$9 sm:$0xff] %v688_v0  ;;  %v5110_v14 = vrot.slane %v178_v7, 3  ;;  %v187_v15 = vsel %vm139_vm0, %v21_v61, %v101_v4  ;;  %v705_v16 = vshrl.u32 %v5060_v42, 16  ;;  %v709_v17 = vshll.u32 %v515_v8, 16 }
  0x17   :  { %1450 = vst [vmem:[#allocation1 + $0x6] ss:$9 sm:$0xff] %v696_v3  ;;  %v712_v18 = vshrl.u32 %v515_v8, 16  ;;  %v717_v19 = vshll.u32 %v518_v9, 16  ;;  %v521_v20 = vsel %vm135_vm3, %v449_v57, %v489_v2  ;;  %v524_v23 = vrot.slane %v522_v13, 1 }
  0x18   :  { %1453 = vst [vmem:[#allocation1 + $0x7] ss:$9 sm:$0xff] %v704_v6  ;;  %v720_v25 = vshrl.u32 %v5105_v11, 16  ;;  %v725_v26 = vshll.u32 %v5102_v10, 16  ;;  %v5117_v30 = vrot.slane %v187_v15, 1  ;;  %v728_v31 = vshrl.u32 %v5102_v10, 16 }
  0x19   :  { %v733_v33 = vshll.u32 %v5107_v12, 16  ;;  %v5122_v34 = vsel %vm135_vm3, %v21_v61, %v101_v4  ;;  %v711_v36 = vsel %vm5065_vm6, %v705_v16, %v709_v17  ;;  %v736_v37 = vshrl.u32 %v5107_v12, 16  ;;  %v451_v0 = vld [vmem:[%s6984_s0 + $0x24] sm:$0x3]  ;;  %v25_v17 = vld [vmem:[%s6984_s0 + $0x28] sm:$0xf] }
  0x1a   :  { %v741_v38 = vshll.u32 %v5110_v14, 16  ;;  %v719_v40 = vsel %vm5065_vm6, %v712_v18, %v717_v19  ;;  %v744_v41 = vshrl.u32 %v5110_v14, 16  ;;  %v748_v43 = vshll.u32 %v521_v20, 16 }
  0x1b   :  { %v727_v44 = vsel %vm5065_vm6, %v720_v25, %v725_v26  ;;  %v751_v45 = vshrl.u32 %v521_v20, 16  ;;  %v756_v46 = vshll.u32 %v524_v23, 16  ;;  %v490_v48 = vrot.slane %v450_v35, 3 }
  0x1c   :  { %v735_v50 = vsel %vm5065_vm6, %v728_v31, %v733_v33  ;;  %v759_v51 = vshrl.u32 %v5122_v34, 16  ;;  %v764_v52 = vshll.u32 %v5117_v30, 16  ;;  %v103_v53 = vrot.slane %v23_v39, 3 }
  0x1d   :  { %v190_v54 = vsel %vm143_vm1, %v21_v61, %v101_v4  ;;  %v743_v55 = vsel %vm5065_vm6, %v736_v37, %v741_v38  ;;  %v193_v56 = vsel %vm147_vm2, %v21_v61, %v101_v4  ;;  %v750_v57 = vsel %vm5065_vm6, %v744_v41, %v748_v43 }
  0x1e   :  { %v758_v58 = vsel %vm5065_vm6, %v751_v45, %v756_v46  ;;  %v5153_v59 = vrot.slane %v190_v54, 2  ;;  %v528_v60 = vsel %vm139_vm0, %v450_v35, %v490_v48  ;;  %v766_v62 = vsel %vm5065_vm6, %v759_v51, %v764_v52  ;;  %v27_v46 = vld [vmem:[%s6984_s0 + $0x30] sm:$0xf] }
  0x1f   :  { %v5139_v47 = vld [vmem:[#allocation1] sm:$0xff]  ;;  %v5158_v63 = vrot.slane %v193_v56, 3  ;;  %v202_v61 = vsel %vm139_vm0, %v23_v39, %v103_v53  ;;  %v205_v1 = vsel %vm143_vm1, %v23_v39, %v103_v53  ;;  %v208_v2 = vsel %vm147_vm2, %v23_v39, %v103_v53 }
  0x20   :  { %7029 = vst [vmem:[#allocation2_spill] sm:$0xff] %v5139_v47  ;;  %v527_v3 = vsel %vm135_vm3, %v450_v35, %v490_v48  ;;  %v530_v4 = vrot.slane %v528_v60, 1  ;;  %v5167_v5 = vrot.slane %v202_v61, 1  ;;  %v491_v6 = vrot.slane %v451_v0, 3 }
  0x21   :  { %1456 = vst [vmem:[#allocation1] ss:$9 sm:$0xff] %v711_v36  ;;  %v767_v7 = vshrl.u32 %v5117_v30, 16  ;;  %v772_v8 = vshll.u32 %v5153_v59, 16  ;;  %v5172_v9 = vsel %vm135_vm3, %v23_v39, %v103_v53  ;;  %v5174_v13 = vrot.slane %v205_v1, 2 }
  0x22   :  { %1458 = vst [vmem:[#allocation1 + $0x1] ss:$9 sm:$0xff] %v719_v40  ;;  %v775_v15 = vshrl.u32 %v5153_v59, 16  ;;  %v780_v16 = vshll.u32 %v5158_v63, 16  ;;  %v5181_v18 = vrot.slane %v208_v2, 3  ;;  %v783_v19 = vshrl.u32 %v5158_v63, 16 }
  0x23   :  { %1460 = vst [vmem:[#allocation1 + $0x2] ss:$9 sm:$0xff] %v727_v44  ;;  %v787_v20 = vshll.u32 %v527_v3, 16  ;;  %v790_v23 = vshrl.u32 %v527_v3, 16  ;;  %v795_v25 = vshll.u32 %v530_v4, 16  ;;  %v533_v26 = vsel %vm135_vm3, %v451_v0, %v491_v6 }
  0x24   :  { %1462 = vst [vmem:[#allocation1 + $0x3] ss:$9 sm:$0xff] %v735_v50  ;;  %v774_v31 = vsel %vm5065_vm6, %v767_v7, %v772_v8  ;;  %v798_v33 = vshrl.u32 %v5172_v9, 16  ;;  %v803_v35 = vshll.u32 %v5167_v5, 16  ;;  %v105_v36 = vrot.slane %v25_v17, 3 }
  0x25   :  { %1464 = vst [vmem:[#allocation1 + $0x4] ss:$9 sm:$0xff] %v743_v55  ;;  %v782_v37 = vsel %vm5065_vm6, %v775_v15, %v780_v16  ;;  %v806_v38 = vshrl.u32 %v5167_v5, 16  ;;  %v811_v39 = vshll.u32 %v5174_v13, 16  ;;  %v452_v40 = vld [vmem:[%s6984_s0 + $0x2c] sm:$0x3]  ;;  %v789_v41 = vsel %vm5065_vm6, %v783_v19, %v787_v20 }
  0x26   :  { %1466 = vst [vmem:[#allocation1 + $0x5] ss:$9 sm:$0xff] %v750_v57  ;;  %v814_v43 = vshrl.u32 %v5174_v13, 16  ;;  %v819_v44 = vshll.u32 %v5181_v18, 16  ;;  %v797_v48 = vsel %vm5065_vm6, %v790_v23, %v795_v25  ;;  %v822_v50 = vshrl.u32 %v5181_v18, 16 }
  0x27   :  { %1468 = vst [vmem:[#allocation1 + $0x6] ss:$9 sm:$0xff] %v758_v58  ;;  %v826_v51 = vshll.u32 %v533_v26, 16  ;;  %v534_v52 = vsel %vm139_vm0, %v451_v0, %v491_v6  ;;  %v805_v53 = vsel %vm5065_vm6, %v798_v33, %v803_v35  ;;  %v217_v54 = vsel %vm139_vm0, %v25_v17, %v105_v36 }
  0x28   :  { %1470 = vst [vmem:[#allocation1 + $0x7] ss:$9 sm:$0xff] %v766_v62  ;;  %v492_v55 = vrot.slane %v452_v40, 3  ;;  %v813_v56 = vsel %vm5065_vm6, %v806_v38, %v811_v39  ;;  %v107_v57 = vrot.slane %v27_v46, 3  ;;  %v220_v58 = vsel %vm143_vm1, %v25_v17, %v105_v36  ;;  %v29_v39 = vld [vmem:[%s6984_s0 + $0x38] sm:$0xf] }
  0x29   :  { %v821_v60 = vsel %vm5065_vm6, %v814_v43, %v819_v44  ;;  %v223_v62 = vsel %vm147_vm2, %v25_v17, %v105_v36  ;;  %v536_v61 = vrot.slane %v534_v52, 1  ;;  %v828_v0 = vsel %vm5065_vm6, %v822_v50, %v826_v51 }
  0x2a   :  { %v5220_v1 = vrot.slane %v217_v54, 1  ;;  %v5223_v2 = vsel %vm135_vm3, %v25_v17, %v105_v36  ;;  %v5225_v3 = vrot.slane %v220_v58, 2  ;;  %v540_v4 = vsel %vm139_vm0, %v452_v40, %v492_v55 }
  0x2b   :  { %v5228_v6 = vrot.slane %v223_v62, 3  ;;  %v232_v7 = vsel %vm139_vm0, %v27_v46, %v107_v57  ;;  %v235_v8 = vsel %vm143_vm1, %v27_v46, %v107_v57  ;;  %v829_v15 = vshrl.u32 %v533_v26, 16  ;;  %v453_v26 = vld [vmem:[%s6984_s0 + $0x34] sm:$0x3] }
  0x2c   :  { %v834_v16 = vshll.u32 %v536_v61, 16  ;;  %v539_v19 = vsel %vm135_vm3, %v452_v40, %v492_v55  ;;  %v542_v20 = vrot.slane %v540_v4, 1  ;;  %v837_v17 = vshrl.u32 %v5223_v2, 16 }
  0x2d   :  { %v842_v23 = vshll.u32 %v5220_v1, 16  ;;  %v5235_v25 = vrot.slane %v232_v7, 1  ;;  %v850_v33 = vshll.u32 %v5225_v3, 16  ;;  %v5240_v35 = vsel %vm135_vm3, %v27_v46, %v107_v57 }
  0x2e   :  { %v5242_v36 = vrot.slane %v235_v8, 2  ;;  %v858_v38 = vshll.u32 %v5228_v6, 16  ;;  %v836_v40 = vsel %vm5065_vm6, %v829_v15, %v834_v16  ;;  %v865_v43 = vshll.u32 %v539_v19, 16 }
  0x2f   :  { %v5200_v45 = vld [vmem:[#allocation1] sm:$0xff]  ;;  %v844_v44 = vsel %vm5065_vm6, %v837_v17, %v842_v23  ;;  %v873_v50 = vshll.u32 %v542_v20, 16  ;;  %v493_v51 = vrot.slane %v453_v26, 3  ;;  %v881_v54 = vshll.u32 %v5235_v25, 16 }
  0x30   :  { %7030 = vst [vmem:[#allocation3_spill] sm:$0xff] %v5200_v45  ;;  %v889_v62 = vshll.u32 %v5242_v36, 16  ;;  %v238_v61 = vsel %vm147_vm2, %v27_v46, %v107_v57  ;;  %vm1675_vm7 = vcmask 523264   ;;  %vm4492_vm8 = vcmask 257024  }
  0x31   :  { %1473 = vst [vmem:[#allocation1] ss:$9 sm:$0xff] %v774_v31  ;;  %v845_v31 = vshrl.u32 %v5220_v1, 16  ;;  %v546_v8 = vsel %vm139_vm0, %v453_v26, %v493_v51  ;;  %v5278_v16 = vrot.slane %v238_v61, 3  ;;  %v545_v23 = vsel %vm135_vm3, %v453_v26, %v493_v51  ;;  %v31_v26 = vld [vmem:[%s6984_s0 + $0x40] sm:$0xf] }
  0x32   :  { %1475 = vst [vmem:[#allocation1 + $0x1] ss:$9 sm:$0xff] %v782_v37  ;;  %v853_v37 = vshrl.u32 %v5225_v3, 16 }
  0x33   :  { %1477 = vst [vmem:[#allocation1 + $0x2] ss:$9 sm:$0xff] %v789_v41  ;;  %v861_v41 = vshrl.u32 %v5228_v6, 16  ;;  %v852_v52 = vsel %vm5065_vm6, %v845_v31, %v850_v33  ;;  %v548_v31 = vrot.slane %v546_v8, 1 }
  0x34   :  { %1479 = vst [vmem:[#allocation1 + $0x3] ss:$9 sm:$0xff] %v797_v48  ;;  %v868_v48 = vshrl.u32 %v539_v19, 16  ;;  %v860_v58 = vsel %vm5065_vm6, %v853_v37, %v858_v38 }
  0x35   :  { %1481 = vst [vmem:[#allocation1 + $0x4] ss:$9 sm:$0xff] %v805_v53  ;;  %v876_v53 = vshrl.u32 %v5240_v35, 16  ;;  %v867_v4 = vsel %vm5065_vm6, %v861_v41, %v865_v43  ;;  %v892_v41 = vshrl.u32 %v5242_v36, 16  ;;  %v897_v43 = vshll.u32 %v5278_v16, 16 }
  0x36   :  { %1483 = vst [vmem:[#allocation1 + $0x5] ss:$9 sm:$0xff] %v813_v56  ;;  %v109_v56 = vrot.slane %v29_v39, 3  ;;  %v875_v7 = vsel %vm5065_vm6, %v868_v48, %v873_v50  ;;  %v904_v48 = vshll.u32 %v545_v23, 16  ;;  %v907_v50 = vshrl.u32 %v545_v23, 16 }
  0x37   :  { %1485 = vst [vmem:[#allocation1 + $0x6] ss:$9 sm:$0xff] %v821_v60  ;;  %v884_v60 = vshrl.u32 %v5235_v25, 16  ;;  %v883_v15 = vsel %vm5065_vm6, %v876_v53, %v881_v54  ;;  %v912_v51 = vshll.u32 %v548_v31, 16 }
  0x38   :  { %1487 = vst [vmem:[#allocation1 + $0x7] ss:$9 sm:$0xff] %v828_v0  ;;  %v454_v0 = vld [vmem:[%s6984_s0 + $0x3c] sm:$0x3]  ;;  %v247_v46 = vsel %vm139_vm0, %v29_v39, %v109_v56  ;;  %v250_v20 = vsel %vm143_vm1, %v29_v39, %v109_v56  ;;  %v253_v17 = vsel %vm147_vm2, %v29_v39, %v109_v56  ;;  %v5287_v33 = vsel %vm135_vm3, %v29_v39, %v109_v56 }
  0x39   :  { %v494_v57 = vrot.slane %v454_v0, 3  ;;  %v891_v19 = vsel %vm5065_vm6, %v884_v60, %v889_v62  ;;  %v5289_v37 = vrot.slane %v247_v46, 1  ;;  %v5291_v38 = vrot.slane %v250_v20, 2 }
  0x3a   :  { %v900_v39 = vshrl.u32 %v5278_v16, 16  ;;  %v915_v54 = vshrl.u32 %v5287_v33, 16  ;;  %v899_v60 = vsel %vm5065_vm6, %v892_v41, %v897_v43  ;;  %v914_v46 = vsel %vm5065_vm6, %v907_v50, %v912_v51 }
  0x3b   :  { %v920_v56 = vshll.u32 %v5289_v37, 16  ;;  %v923_v62 = vshrl.u32 %v5289_v37, 16  ;;  %v928_v61 = vshll.u32 %v5291_v38, 16 }
  0x3d   :  { %v930_v43 = vsel %vm5065_vm6, %v923_v62, %v928_v61 }
  0x3f   :  { %v5261_v55 = vld [vmem:[#allocation1] sm:$0xff] }
  0x40   :  { %7031 = vst [vmem:[#allocation4_spill] sm:$0xff] %v5261_v55 }
  0x41   :  { %1490 = vst [vmem:[#allocation1] ss:$9 sm:$0xff] %v836_v40  ;;  %v552_v40 = vsel %vm139_vm0, %v454_v0, %v494_v57 }
  0x42   :  { %1492 = vst [vmem:[#allocation1 + $0x1] ss:$9 sm:$0xff] %v844_v44  ;;  %v5299_v44 = vrot.slane %v253_v17, 3  ;;  %v554_v53 = vrot.slane %v552_v40, 1  ;;  %v922_v17 = vsel %vm5065_vm6, %v915_v54, %v920_v56 }
  0x43   :  { %1494 = vst [vmem:[#allocation1 + $0x2] ss:$9 sm:$0xff] %v852_v52  ;;  %v551_v52 = vsel %vm135_vm3, %v454_v0, %v494_v57  ;;  %v906_v0 = vsel %vm5065_vm6, %v900_v39, %v904_v48 }
  0x44   :  { %1496 = vst [vmem:[#allocation1 + $0x3] ss:$9 sm:$0xff] %v860_v58  ;;  %v111_v58 = vrot.slane %v31_v26, 3  ;;  %v936_v8 = vshll.u32 %v5299_v44, 16  ;;  %v939_v57 = vshrl.u32 %v5299_v44, 16  ;;  %v946_v23 = vshrl.u32 %v551_v52, 16 }
  0x45   :  { %1498 = vst [vmem:[#allocation1 + $0x4] ss:$9 sm:$0xff] %v867_v4  ;;  %v455_v4 = vld [vmem:[%s6984_s0 + $0x44] sm:$0x3]  ;;  %v951_v31 = vshll.u32 %v554_v53, 16 }
  0x46   :  { %1500 = vst [vmem:[#allocation1 + $0x5] ss:$9 sm:$0xff] %v875_v7  ;;  %v931_v7 = vshrl.u32 %v5291_v38, 16  ;;  %v262_v40 = vsel %vm139_vm0, %v31_v26, %v111_v58  ;;  %v495_v41 = vrot.slane %v455_v4, 3  ;;  %v265_v48 = vsel %vm143_vm1, %v31_v26, %v111_v58 }
  0x47   :  { %1502 = vst [vmem:[#allocation1 + $0x6] ss:$9 sm:$0xff] %v883_v15  ;;  %v33_v15 = vld [vmem:[%s6984_s0 + $0x48] sm:$0xf]  ;;  %v268_v51 = vsel %vm147_vm2, %v31_v26, %v111_v58  ;;  %v5335_v53 = vrot.slane %v262_v40, 1  ;;  %v953_v54 = vsel %vm5065_vm6, %v946_v23, %v951_v31  ;;  %v5340_v56 = vsel %vm135_vm3, %v31_v26, %v111_v58 }
  0x48   :  { %1504 = vst [vmem:[#allocation1 + $0x7] ss:$9 sm:$0xff] %v891_v19  ;;  %v943_v19 = vshll.u32 %v551_v52, 16  ;;  %v113_v39 = vrot.slane %v33_v15, 3  ;;  %v938_v50 = vsel %vm5065_vm6, %v931_v7, %v936_v8  ;;  %v558_v62 = vsel %vm139_vm0, %v455_v4, %v495_v41 }
  0x49   :  { %7033 = vst [vmem:[#allocation6_spill] sm:$0xff] %v5335_v53  ;;  %v5345_v61 = vrot.slane %v268_v51, 3  ;;  %v954_v26 = vshrl.u32 %v5340_v56, 16  ;;  %v959_v58 = vshll.u32 %v5335_v53, 16 }
  0x4a   :  { %v945_v52 = vsel %vm5065_vm6, %v939_v57, %v943_v19  ;;  %v280_v7 = vsel %vm143_vm1, %v33_v15, %v113_v39  ;;  %v283_v8 = vsel %vm147_vm2, %v33_v15, %v113_v39  ;;  %v560_v57 = vrot.slane %v558_v62, 1 }
  0x4b   :  { %7035 = vst [vmem:[#allocation8_spill] sm:$0xff] %v5345_v61  ;;  %v5358_v31 = vsel %vm135_vm3, %v33_v15, %v113_v39  ;;  %v5360_v40 = vrot.slane %v280_v7, 2  ;;  %v978_v51 = vshrl.u32 %v5345_v61, 16 }
  0x4c   :  { %7037 = vst [vmem:[#allocation10_spill] sm:$0xff] %v5358_v31  ;;  %v993_v7 = vshrl.u32 %v5358_v31, 16 }
  0x4d   :  { %7038 = vst [vmem:[#allocation11_spill] sm:$0xff] %v5360_v40  ;;  %v1006_v47 = vshll.u32 %v5360_v40, 16 }
  0x4f   :  { %v5322_v20 = vld [vmem:[#allocation1] sm:$0xff] }
  0x50   :  { %7032 = vst [vmem:[#allocation5_spill] sm:$0xff] %v5322_v20 }
  0x51   :  { %1507 = vst [vmem:[#allocation1] ss:$9 sm:$0xff] %v899_v60  ;;  %v5342_v60 = vrot.slane %v265_v48, 2  ;;  %v35_v48 = vld [vmem:[%s6984_s0 + $0x58] sm:$0xf] }
  0x52   :  { %1509 = vst [vmem:[#allocation1 + $0x1] ss:$9 sm:$0xff] %v906_v0  ;;  %v277_v0 = vsel %vm139_vm0, %v33_v15, %v113_v39  ;;  %v961_v39 = vsel %vm5065_vm6, %v954_v26, %v959_v58  ;;  %v115_v55 = vrot.slane %v35_v48, 3  ;;  %v1009_v26 = vshrl.u32 %v5360_v40, 16 }
  0x53   :  { %1511 = vst [vmem:[#allocation1 + $0x2] ss:$9 sm:$0xff] %v914_v46  ;;  %v557_v46 = vsel %vm135_vm3, %v455_v4, %v495_v41  ;;  %v5353_v19 = vrot.slane %v277_v0, 1  ;;  %v967_v23 = vshll.u32 %v5342_v60, 16  ;;  %v456_v4 = vld [vmem:[%s6984_s0 + $0x4c] sm:$0x3] }
  0x54   :  { %1513 = vst [vmem:[#allocation1 + $0x3] ss:$9 sm:$0xff] %v922_v17  ;;  %v962_v17 = vshrl.u32 %v5335_v53, 16  ;;  %v970_v41 = vshrl.u32 %v5342_v60, 16  ;;  %v982_v15 = vshll.u32 %v557_v46, 16  ;;  %v496_v62 = vrot.slane %v456_v4, 3 }
  0x55   :  { %1515 = vst [vmem:[#allocation1 + $0x4] ss:$9 sm:$0xff] %v930_v43  ;;  %v975_v43 = vshll.u32 %v5345_v61, 16  ;;  %v998_v20 = vshll.u32 %v5353_v19, 16  ;;  %v1001_v45 = vshrl.u32 %v5353_v19, 16  ;;  %v295_v40 = vsel %vm143_vm1, %v35_v48, %v115_v55 }
  0x56   :  { %7034 = vst [vmem:[#allocation7_spill] sm:$0xff] %v5342_v60  ;;  %v969_v0 = vsel %vm5065_vm6, %v962_v17, %v967_v23  ;;  %v37_v17 = vld [vmem:[%s6984_s0 + $0x60] sm:$0xf] }
  0x57   :  { %1517 = vst [vmem:[#allocation1 + $0x5] ss:$9 sm:$0xff] %v938_v50  ;;  %v5370_v50 = vrot.slane %v283_v8, 3  ;;  %v977_v8 = vsel %vm5065_vm6, %v970_v41, %v975_v43  ;;  %v564_v41 = vsel %vm139_vm0, %v456_v4, %v496_v62  ;;  %v1000_v43 = vsel %vm5065_vm6, %v993_v7, %v998_v20 }
  0x58   :  { %1519 = vst [vmem:[#allocation1 + $0x6] ss:$9 sm:$0xff] %v945_v52  ;;  %v985_v52 = vshrl.u32 %v557_v46, 16  ;;  %v457_v46 = vld [vmem:[%s6984_s0 + $0x5c] sm:$0x3]  ;;  %v566_v20 = vrot.slane %v564_v41, 1 }
  0x59   :  { %1521 = vst [vmem:[#allocation1 + $0x7] ss:$9 sm:$0xff] %v953_v54  ;;  %v990_v54 = vshll.u32 %v560_v57, 16  ;;  %v984_v57 = vsel %vm5065_vm6, %v978_v51, %v982_v15  ;;  %v1014_v58 = vshll.u32 %v5370_v50, 16  ;;  %v292_v51 = vsel %vm139_vm0, %v35_v48, %v115_v55 }
  0x5a   :  { %7036 = vst [vmem:[#allocation9_spill] sm:$0xff] %v5353_v19  ;;  %v497_v15 = vrot.slane %v457_v46, 3  ;;  %v5408_v7 = vrot.slane %v292_v51, 1 }
  0x5b   :  { %7039 = vst [vmem:[#allocation12_spill] sm:$0xff] %v5370_v50  ;;  %v992_v23 = vsel %vm5065_vm6, %v985_v52, %v990_v54  ;;  %v1016_v52 = vsel %vm5065_vm6, %v1009_v26, %v1014_v58  ;;  %v298_v54 = vsel %vm147_vm2, %v35_v48, %v115_v55  ;;  %v1017_v58 = vshrl.u32 %v5370_v50, 16 }
  0x5c   :  { %7041 = vst [vmem:[#allocation14_spill] sm:$0xff] %v5408_v7  ;;  %v569_v41 = vsel %vm135_vm3, %v457_v46, %v497_v15  ;;  %v1040_v51 = vshrl.u32 %v5408_v7, 16 }
  0x5d   :  { %v1063_v50 = vshrl.u32 %v569_v41, 16 }
  0x60   :  { %v5383_v61 = vld [vmem:[#allocation1] sm:$0xff] }
  0x61   :  { %7040 = vst [vmem:[#allocation13_spill] sm:$0xff] %v5383_v61  ;;  %v117_v61 = vrot.slane %v37_v17, 3 }
  0x62   :  { %1524 = vst [vmem:[#allocation1] ss:$9 sm:$0xff] %v961_v39  ;;  %v1008_v39 = vsel %vm5065_vm6, %v1001_v45, %v1006_v47  ;;  %v5413_v47 = vrot.slane %v295_v40, 2  ;;  %v570_v45 = vsel %vm139_vm0, %v457_v46, %v497_v15  ;;  %v1037_v40 = vshll.u32 %v5408_v7, 16 }
  0x63   :  { %1526 = vst [vmem:[#allocation1 + $0x1] ss:$9 sm:$0xff] %v969_v0  ;;  %v563_v0 = vsel %vm135_vm3, %v456_v4, %v496_v62  ;;  %v307_v26 = vsel %vm139_vm0, %v37_v17, %v117_v61  ;;  %v1060_v7 = vshll.u32 %v569_v41, 16  ;;  %v313_v41 = vsel %vm147_vm2, %v37_v17, %v117_v61 }
  0x64   :  { %1528 = vst [vmem:[#allocation1 + $0x2] ss:$9 sm:$0xff] %v977_v8  ;;  %v5411_v8 = vsel %vm135_vm3, %v35_v48, %v115_v55  ;;  %v1021_v4 = vshll.u32 %v563_v0, 16  ;;  %v1024_v62 = vshrl.u32 %v563_v0, 16  ;;  %v5423_v48 = vrot.slane %v307_v26, 1 }
  0x65   :  { %1530 = vst [vmem:[#allocation1 + $0x3] ss:$9 sm:$0xff] %v984_v57  ;;  %v5416_v57 = vrot.slane %v298_v54, 3  ;;  %v1032_v55 = vshrl.u32 %v5411_v8, 16  ;;  %v458_v54 = vld [vmem:[%s6984_s0 + $0x64] sm:$0x3] }
  0x66   :  { %1532 = vst [vmem:[#allocation1 + $0x4] ss:$9 sm:$0xff] %v992_v23  ;;  %v1029_v23 = vshll.u32 %v566_v20, 16  ;;  %v1023_v46 = vsel %vm5065_vm6, %v1017_v58, %v1021_v4  ;;  %v1048_v15 = vshrl.u32 %v5413_v47, 16  ;;  %v39_v20 = vld [vmem:[%s6984_s0 + $0x68] sm:$0xf] }
  0x67   :  { %1534 = vst [vmem:[#allocation1 + $0x5] ss:$9 sm:$0xff] %v1000_v43  ;;  %v572_v43 = vrot.slane %v570_v45, 1  ;;  %v1053_v0 = vshll.u32 %v5416_v57, 16  ;;  %v1056_v26 = vshrl.u32 %v5416_v57, 16  ;;  %v498_v4 = vrot.slane %v458_v54, 3 }
  0x68   :  { %1536 = vst [vmem:[#allocation1 + $0x6] ss:$9 sm:$0xff] %v1008_v39  ;;  %v1045_v39 = vshll.u32 %v5413_v47, 16  ;;  %v1031_v45 = vsel %vm5065_vm6, %v1024_v62, %v1029_v23  ;;  %v1076_v60 = vshll.u32 %v5423_v48, 16  ;;  %v119_v62 = vrot.slane %v39_v20, 3 }
  0x69   :  { %7042 = vst [vmem:[#allocation15_spill] sm:$0xff] %v5411_v8  ;;  %v1039_v8 = vsel %vm5065_vm6, %v1032_v55, %v1037_v40  ;;  %v1068_v19 = vshll.u32 %v572_v43, 16  ;;  %v310_v23 = vsel %vm143_vm1, %v37_v17, %v117_v61  ;;  %v1062_v43 = vsel %vm5065_vm6, %v1056_v26, %v1060_v7 }
  0x6a   :  { %7043 = vst [vmem:[#allocation16_spill] sm:$0xff] %v5413_v47  ;;  %v1047_v47 = vsel %vm5065_vm6, %v1040_v51, %v1045_v39  ;;  %v5459_v40 = vrot.slane %v310_v23, 2  ;;  %v576_v51 = vsel %vm139_vm0, %v458_v54, %v498_v4  ;;  %v575_v7 = vsel %vm135_vm3, %v458_v54, %v498_v4  ;;  %v41_v54 = vld [vmem:[%s6984_s0 + $0x70] sm:$0xf] }
  0x6b   :  { %1538 = vst [vmem:[#allocation1 + $0x7] ss:$9 sm:$0xff] %v1016_v52  ;;  %v5428_v52 = vsel %vm135_vm3, %v37_v17, %v117_v61  ;;  %v1070_v55 = vsel %vm5065_vm6, %v1063_v50, %v1068_v19  ;;  %v322_v61 = vsel %vm139_vm0, %v39_v20, %v119_v62  ;;  %v459_v17 = vld [vmem:[%s6984_s0 + $0x6c] sm:$0x3]  ;;  %v325_v19 = vsel %vm143_vm1, %v39_v20, %v119_v62 }
  0x6c   :  { %7044 = vst [vmem:[#allocation17_spill] sm:$0xff] %v5416_v57  ;;  %v1071_v31 = vshrl.u32 %v5428_v52, 16  ;;  %v1055_v57 = vsel %vm5065_vm6, %v1048_v15, %v1053_v0  ;;  %v328_v50 = vsel %vm147_vm2, %v39_v20, %v119_v62  ;;  %v5478_v15 = vsel %vm135_vm3, %v39_v20, %v119_v62 }
  0x6d   :  { %7045 = vst [vmem:[#allocation18_spill] sm:$0xff] %v5423_v48  ;;  %v5480_v0 = vrot.slane %v325_v19, 2  ;;  %v5487_v4 = vrot.slane %v328_v50, 3 }
  0x6e   :  { %7046 = vst [vmem:[#allocation19_spill] sm:$0xff] %v5428_v52  ;;  %v1078_v39 = vsel %vm5065_vm6, %v1071_v31, %v1076_v60  ;;  %v5473_v60 = vrot.slane %v322_v61, 1  ;;  %v499_v31 = vrot.slane %v459_v17, 3  ;;  %v121_v61 = vrot.slane %v41_v54, 3 }
  0x6f   :  { %7048 = vst [vmem:[#allocation21_spill] sm:$0xff] %v5459_v40 }
  0x70   :  { %7050 = vst [vmem:[#allocation23_spill] sm:$0xff] %v5473_v60  ;;  %v581_v20 = vsel %vm135_vm3, %v459_v17, %v499_v31  ;;  %v1118_v50 = vshrl.u32 %v5473_v60, 16 }
  0x71   :  { %7051 = vst [vmem:[#allocation24_spill] sm:$0xff] %v5478_v15 }
  0x72   :  { %v5445_v58 = vld [vmem:[#allocation1] sm:$0xff]  ;;  %7052 = vst [vmem:[#allocation25_spill] sm:$0xff] %v5480_v0 }
  0x73   :  { %7047 = vst [vmem:[#allocation20_spill] sm:$0xff] %v5445_v58  ;;  %v1123_v58 = vshll.u32 %v5480_v0, 16 }
  0x74   :  { %1541 = vst [vmem:[#allocation1] ss:$9 sm:$0xff] %v1023_v46  ;;  %v5464_v46 = vrot.slane %v313_v41, 3  ;;  %v1099_v41 = vshll.u32 %v575_v7, 16 }
  0x75   :  { %1543 = vst [vmem:[#allocation1 + $0x1] ss:$9 sm:$0xff] %v1031_v45  ;;  %v1087_v45 = vshrl.u32 %v5459_v40, 16 }
  0x76   :  { %1545 = vst [vmem:[#allocation1 + $0x2] ss:$9 sm:$0xff] %v1039_v8  ;;  %v578_v8 = vrot.slane %v576_v51, 1  ;;  %v1092_v26 = vshll.u32 %v5464_v46, 16  ;;  %v1095_v23 = vshrl.u32 %v5464_v46, 16  ;;  %v1110_v51 = vshrl.u32 %v5478_v15, 16 }
  0x77   :  { %1547 = vst [vmem:[#allocation1 + $0x3] ss:$9 sm:$0xff] %v1047_v47  ;;  %v1079_v47 = vshrl.u32 %v5423_v48, 16 }
  0x78   :  { %1549 = vst [vmem:[#allocation1 + $0x4] ss:$9 sm:$0xff] %v1055_v57  ;;  %v1084_v57 = vshll.u32 %v5459_v40, 16  ;;  %v1094_v19 = vsel %vm5065_vm6, %v1087_v45, %v1092_v26  ;;  %v43_v45 = vld [vmem:[%s6984_s0 + $0x78] sm:$0xf]  ;;  %v582_v40 = vsel %vm139_vm0, %v459_v17, %v499_v31  ;;  %v343_v17 = vsel %vm147_vm2, %v41_v54, %v121_v61 }
  0x79   :  { %7049 = vst [vmem:[#allocation22_spill] sm:$0xff] %v5464_v46  ;;  %v1138_v46 = vshll.u32 %v581_v20, 16  ;;  %v123_v48 = vrot.slane %v43_v45, 3  ;;  %v584_v31 = vrot.slane %v582_v40, 1 }
  0x7a   :  { %1551 = vst [vmem:[#allocation1 + $0x5] ss:$9 sm:$0xff] %v1062_v43  ;;  %v1102_v43 = vshrl.u32 %v575_v7, 16  ;;  %v1086_v62 = vsel %vm5065_vm6, %v1079_v47, %v1084_v57  ;;  %v460_v7 = vld [vmem:[%s6984_s0 + $0x74] sm:$0x3]  ;;  %v1126_v47 = vshrl.u32 %v5480_v0, 16  ;;  %v1125_v0 = vsel %vm5065_vm6, %v1118_v50, %v1123_v58 }
  0x7b   :  { %1553 = vst [vmem:[#allocation1 + $0x6] ss:$9 sm:$0xff] %v1070_v55  ;;  %v1107_v55 = vshll.u32 %v578_v8, 16  ;;  %v1101_v8 = vsel %vm5065_vm6, %v1095_v23, %v1099_v41  ;;  %v1131_v57 = vshll.u32 %v5487_v4, 16  ;;  %v337_v41 = vsel %vm139_vm0, %v41_v54, %v121_v61 }
  0x7c   :  { %1555 = vst [vmem:[#allocation1 + $0x7] ss:$9 sm:$0xff] %v1078_v39  ;;  %v1115_v39 = vshll.u32 %v5473_v60, 16  ;;  %v1134_v60 = vshrl.u32 %v5487_v4, 16  ;;  %v5529_v58 = vsel %vm135_vm3, %v41_v54, %v121_v61  ;;  %v5534_v50 = vrot.slane %v343_v17, 3 }
  0x7d   :  { %7053 = vst [vmem:[#allocation26_spill] sm:$0xff] %v5487_v4  ;;  %v1109_v26 = vsel %vm5065_vm6, %v1102_v43, %v1107_v55  ;;  %v340_v43 = vsel %vm143_vm1, %v41_v54, %v121_v61  ;;  %v1133_v55 = vsel %vm5065_vm6, %v1126_v47, %v1131_v57  ;;  %v355_v40 = vsel %vm143_vm1, %v43_v45, %v123_v48 }
  0x7e   :  { %v1117_v23 = vsel %vm5065_vm6, %v1110_v51, %v1115_v39  ;;  %v5526_v51 = vrot.slane %v337_v41, 1  ;;  %7056 = vst [vmem:[#allocation29_spill] sm:$0xff] %v5529_v58  ;;  %v5531_v39 = vrot.slane %v340_v43, 2  ;;  %v1149_v54 = vshrl.u32 %v5529_v58, 16 }
  0x7f   :  { %v5546_v41 = vsel %vm135_vm3, %v43_v45, %v123_v48  ;;  %v5548_v43 = vrot.slane %v355_v40, 2 }
  0x80   :  { %7055 = vst [vmem:[#allocation28_spill] sm:$0xff] %v5526_v51  ;;  %v1154_v61 = vshll.u32 %v5526_v51, 16  ;;  %v1188_v58 = vshrl.u32 %v5546_v41, 16 }
  0x81   :  { %7057 = vst [vmem:[#allocation30_spill] sm:$0xff] %v5531_v39 }
  0x82   :  { %7059 = vst [vmem:[#allocation32_spill] sm:$0xff] %v5548_v43 }
  0x83   :  { %v5506_v15 = vld [vmem:[#allocation1] sm:$0xff] }
  0x84   :  { %7054 = vst [vmem:[#allocation27_spill] sm:$0xff] %v5506_v15  ;;  %v500_v15 = vrot.slane %v460_v7, 3 }
  0x85   :  { %1558 = vst [vmem:[#allocation1] ss:$9 sm:$0xff] %v1086_v62  ;;  %v1140_v62 = vsel %vm5065_vm6, %v1134_v60, %v1138_v46  ;;  %v1141_v46 = vshrl.u32 %v581_v20, 16  ;;  %v1146_v60 = vshll.u32 %v584_v31, 16  ;;  %v1165_v20 = vshrl.u32 %v5531_v39, 16 }
  0x86   :  { %1560 = vst [vmem:[#allocation1 + $0x1] ss:$9 sm:$0xff] %v1094_v19  ;;  %v588_v19 = vsel %vm139_vm0, %v460_v7, %v500_v15  ;;  %v587_v47 = vsel %vm135_vm3, %v460_v7, %v500_v15  ;;  %v461_v15 = vld [vmem:[%s6984_s0 + $0x7c] sm:$0x3]  ;;  %v1170_v7 = vshll.u32 %v5534_v50, 16  ;;  %v1173_v31 = vshrl.u32 %v5534_v50, 16 }
  0x87   :  { %1562 = vst [vmem:[#allocation1 + $0x2] ss:$9 sm:$0xff] %v1101_v8  ;;  %v352_v8 = vsel %vm139_vm0, %v43_v45, %v123_v48  ;;  %v1148_v17 = vsel %vm5065_vm6, %v1141_v46, %v1146_v60 }
  0x88   :  { %1564 = vst [vmem:[#allocation1 + $0x3] ss:$9 sm:$0xff] %v1109_v26  ;;  %v5541_v57 = vrot.slane %v352_v8, 1  ;;  %v1157_v26 = vshrl.u32 %v5526_v51, 16  ;;  %v1180_v8 = vshrl.u32 %v587_v47, 16  ;;  %v501_v51 = vrot.slane %v461_v15, 3 }
  0x89   :  { %1566 = vst [vmem:[#allocation1 + $0x4] ss:$9 sm:$0xff] %v1117_v23  ;;  %v1162_v23 = vshll.u32 %v5531_v39, 16  ;;  %v1172_v46 = vsel %vm5065_vm6, %v1165_v20, %v1170_v7 }
  0x8a   :  { %1568 = vst [vmem:[#allocation1 + $0x5] ss:$9 sm:$0xff] %v1125_v0  ;;  %v590_v0 = vrot.slane %v588_v19, 1  ;;  %v1156_v19 = vsel %vm5065_vm6, %v1149_v54, %v1154_v61  ;;  %v1193_v4 = vshll.u32 %v5541_v57, 16  ;;  %v1196_v60 = vshrl.u32 %v5541_v57, 16 }
  0x8b   :  { %1570 = vst [vmem:[#allocation1 + $0x6] ss:$9 sm:$0xff] %v1133_v55  ;;  %v45_v55 = vld [vmem:[%s6984_s0 + $0x80] sm:$0xf]  ;;  %v1164_v39 = vsel %vm5065_vm6, %v1157_v26, %v1162_v23  ;;  %v1201_v54 = vshll.u32 %v5548_v43, 16  ;;  %v594_v23 = vsel %vm139_vm0, %v461_v15, %v501_v51 }
  0x8c   :  { %1572 = vst [vmem:[#allocation1 + $0x7] ss:$9 sm:$0xff] %v1140_v62  ;;  %v1177_v62 = vshll.u32 %v587_v47, 16  ;;  %v1185_v40 = vshll.u32 %v590_v0, 16  ;;  %v125_v53 = vrot.slane %v45_v55, 3  ;;  %v358_v47 = vsel %vm147_vm2, %v43_v45, %v123_v48 }
  0x8d   :  { %7058 = vst [vmem:[#allocation31_spill] sm:$0xff] %v5541_v57  ;;  %v462_v0 = vld [vmem:[%s6984_s0 + $0x84] sm:$0x3]  ;;  %v1195_v20 = vsel %vm5065_vm6, %v1188_v58, %v1193_v4  ;;  %v5584_v7 = vrot.slane %v358_v47, 3 }
  0x8e   :  { %v1179_v61 = vsel %vm5065_vm6, %v1173_v31, %v1177_v62  ;;  %v1187_v26 = vsel %vm5065_vm6, %v1180_v8, %v1185_v40  ;;  %v367_v48 = vsel %vm139_vm0, %v45_v55, %v125_v53  ;;  %v502_v45 = vrot.slane %v462_v0, 3 }
  0x8f   :  { %7061 = vst [vmem:[#allocation34_spill] sm:$0xff] %v5584_v7  ;;  %v370_v31 = vsel %vm143_vm1, %v45_v55, %v125_v53  ;;  %v593_v62 = vsel %vm135_vm3, %v461_v15, %v501_v51  ;;  %v5593_v4 = vsel %vm135_vm3, %v45_v55, %v125_v53  ;;  %v5595_v58 = vrot.slane %v367_v48, 1  ;;  %v47_v51 = vld [vmem:[%s6984_s0 + $0x88] sm:$0xf] }
  0x90   :  { %7062 = vst [vmem:[#allocation35_spill] sm:$0xff] %v5593_v4  ;;  %v5597_v8 = vrot.slane %v370_v31, 2  ;;  %v600_v40 = vsel %vm139_vm0, %v462_v0, %v502_v45  ;;  %v127_v48 = vrot.slane %v47_v51, 3 }
  0x91   :  { %7063 = vst [vmem:[#allocation36_spill] sm:$0xff] %v5595_v58  ;;  %v1235_v31 = vshrl.u32 %v5595_v58, 16 }
  0x92   :  { %7064 = vst [vmem:[#allocation37_spill] sm:$0xff] %v5597_v8 }
  0x93   :  { %v5567_v52 = vld [vmem:[#allocation1] sm:$0xff] }
  0x94   :  { %7060 = vst [vmem:[#allocation33_spill] sm:$0xff] %v5567_v52 }
  0x95   :  { %1575 = vst [vmem:[#allocation1] ss:$9 sm:$0xff] %v1148_v17  ;;  %v1203_v17 = vsel %vm5065_vm6, %v1196_v60, %v1201_v54  ;;  %v1209_v60 = vshll.u32 %v5584_v7, 16  ;;  %v1219_v54 = vshrl.u32 %v593_v62, 16 }
  0x96   :  { %1577 = vst [vmem:[#allocation1 + $0x1] ss:$9 sm:$0xff] %v1156_v19  ;;  %v596_v19 = vrot.slane %v594_v23, 1  ;;  %v1227_v23 = vshrl.u32 %v5593_v4, 16 }
  0x97   :  { %1579 = vst [vmem:[#allocation1 + $0x2] ss:$9 sm:$0xff] %v1164_v39  ;;  %v373_v39 = vsel %vm147_vm2, %v45_v55, %v125_v53  ;;  %v1212_v53 = vshrl.u32 %v5584_v7, 16  ;;  %v1216_v55 = vshll.u32 %v593_v62, 16  ;;  %v463_v62 = vld [vmem:[%s6984_s0 + $0x8c] sm:$0x3] }
  0x98   :  { %1581 = vst [vmem:[#allocation1 + $0x3] ss:$9 sm:$0xff] %v1172_v46  ;;  %v1204_v46 = vshrl.u32 %v5548_v43, 16  ;;  %v5605_v15 = vrot.slane %v373_v39, 3  ;;  %v1224_v47 = vshll.u32 %v596_v19, 16  ;;  %v1240_v39 = vshll.u32 %v5597_v8, 16 }
  0x99   :  { %1583 = vst [vmem:[#allocation1 + $0x4] ss:$9 sm:$0xff] %v1179_v61  ;;  %v599_v61 = vsel %vm135_vm3, %v462_v0, %v502_v45  ;;  %v1218_v0 = vsel %vm5065_vm6, %v1212_v53, %v1216_v55  ;;  %v1243_v45 = vshrl.u32 %v5597_v8, 16  ;;  %v382_v8 = vsel %vm139_vm0, %v47_v51, %v127_v48 }
  0x9a   :  { %1585 = vst [vmem:[#allocation1 + $0x5] ss:$9 sm:$0xff] %v1187_v26  ;;  %v602_v26 = vrot.slane %v600_v40, 1  ;;  %v1248_v19 = vshll.u32 %v5605_v15, 16  ;;  %v49_v40 = vld [vmem:[%s6984_s0 + $0x90] sm:$0xf]  ;;  %v1242_v43 = vsel %vm5065_vm6, %v1235_v31, %v1240_v39 }
  0x9b   :  { %1587 = vst [vmem:[#allocation1 + $0x6] ss:$9 sm:$0xff] %v1195_v20  ;;  %v1232_v20 = vshll.u32 %v5595_v58, 16  ;;  %v1255_v52 = vshll.u32 %v599_v61, 16  ;;  %v1258_v53 = vshrl.u32 %v599_v61, 16  ;;  %v503_v7 = vrot.slane %v463_v62, 3 }
  0x9c   :  { %1589 = vst [vmem:[#allocation1 + $0x7] ss:$9 sm:$0xff] %v1203_v17  ;;  %v1211_v17 = vsel %vm5065_vm6, %v1204_v46, %v1209_v60  ;;  %v1226_v46 = vsel %vm5065_vm6, %v1219_v54, %v1224_v47  ;;  %v1251_v60 = vshrl.u32 %v5605_v15, 16  ;;  %v1263_v55 = vshll.u32 %v602_v26, 16 }
  0x9d   :  { %7065 = vst [vmem:[#allocation38_spill] sm:$0xff] %v5605_v15  ;;  %v1234_v4 = vsel %vm5065_vm6, %v1227_v23, %v1232_v20  ;;  %v129_v57 = vrot.slane %v49_v40, 3  ;;  %v385_v54 = vsel %vm143_vm1, %v47_v51, %v127_v48  ;;  %v1250_v47 = vsel %vm5065_vm6, %v1243_v45, %v1248_v19 }
  0x9e   :  { %v1257_v61 = vsel %vm5065_vm6, %v1251_v60, %v1255_v52  ;;  %v5641_v26 = vrot.slane %v382_v8, 1  ;;  %v1265_v23 = vsel %vm5065_vm6, %v1258_v53, %v1263_v55  ;;  %v5646_v20 = vsel %vm135_vm3, %v47_v51, %v127_v48  ;;  %v51_v55 = vld [vmem:[%s6984_s0 + $0x98] sm:$0xf] }
  0x9f   :  { %7068 = vst [vmem:[#allocation41_spill] sm:$0xff] %v5646_v20  ;;  %v606_v31 = vsel %vm139_vm0, %v463_v62, %v503_v7  ;;  %v400_v52 = vsel %vm143_vm1, %v49_v40, %v129_v57 }
  0xa0   :  { %7067 = vst [vmem:[#allocation40_spill] sm:$0xff] %v5641_v26  ;;  %v608_v8 = vrot.slane %v606_v31, 1  ;;  %v5666_v60 = vrot.slane %v400_v52, 2 }
  0xa2   :  { %7073 = vst [vmem:[#allocation46_spill] sm:$0xff] %v5666_v60 }
  0xa3   :  { %v5628_v58 = vld [vmem:[#allocation1] sm:$0xff] }
  0xa4   :  { %7066 = vst [vmem:[#allocation39_spill] sm:$0xff] %v5628_v58  ;;  %v388_v58 = vsel %vm147_vm2, %v47_v51, %v127_v48  ;;  %v1266_v51 = vshrl.u32 %v5646_v20, 16  ;;  %v1271_v48 = vshll.u32 %v5641_v26, 16  ;;  %v1318_v20 = vshll.u32 %v5666_v60, 16 }
  0xa5   :  { %1592 = vst [vmem:[#allocation1] ss:$9 sm:$0xff] %v1211_v17  ;;  %v5648_v17 = vrot.slane %v385_v54, 2  ;;  %v5651_v39 = vrot.slane %v388_v58, 3  ;;  %v1274_v58 = vshrl.u32 %v5641_v26, 16  ;;  %v131_v26 = vrot.slane %v51_v55, 3 }
  0xa6   :  { %1594 = vst [vmem:[#allocation1 + $0x1] ss:$9 sm:$0xff] %v1218_v0  ;;  %v397_v0 = vsel %vm139_vm0, %v49_v40, %v129_v57 }
  0xa7   :  { %1596 = vst [vmem:[#allocation1 + $0x2] ss:$9 sm:$0xff] %v1226_v46  ;;  %v5659_v45 = vrot.slane %v397_v0, 1  ;;  %v1279_v19 = vshll.u32 %v5648_v17, 16  ;;  %v5664_v46 = vsel %vm135_vm3, %v49_v40, %v129_v57  ;;  %v1287_v53 = vshll.u32 %v5651_v39, 16 }
  0xa8   :  { %1598 = vst [vmem:[#allocation1 + $0x3] ss:$9 sm:$0xff] %v1234_v4  ;;  %v403_v4 = vsel %vm147_vm2, %v49_v40, %v129_v57  ;;  %v1273_v40 = vsel %vm5065_vm6, %v1266_v51, %v1271_v48  ;;  %v1305_v52 = vshrl.u32 %v5664_v46, 16  ;;  %v1321_v51 = vshrl.u32 %v5666_v60, 16 }
  0xa9   :  { %1600 = vst [vmem:[#allocation1 + $0x4] ss:$9 sm:$0xff] %v1242_v43  ;;  %v605_v43 = vsel %vm135_vm3, %v463_v62, %v503_v7  ;;  %v464_v7 = vld [vmem:[%s6984_s0 + $0x94] sm:$0x3]  ;;  %v1282_v62 = vshrl.u32 %v5648_v17, 16  ;;  %v5676_v54 = vrot.slane %v403_v4, 3  ;;  %v1281_v0 = vsel %vm5065_vm6, %v1274_v58, %v1279_v19 }
  0xaa   :  { %7069 = vst [vmem:[#allocation42_spill] sm:$0xff] %v5648_v17  ;;  %v1294_v57 = vshll.u32 %v605_v43, 16  ;;  %v504_v31 = vrot.slane %v464_v7, 3  ;;  %v1310_v17 = vshll.u32 %v5659_v45, 16  ;;  %v53_v58 = vld [vmem:[%s6984_s0 + $0xa0] sm:$0xf]  ;;  %v415_v60 = vsel %vm143_vm1, %v51_v55, %v131_v26 }
  0xab   :  { %1602 = vst [vmem:[#allocation1 + $0x5] ss:$9 sm:$0xff] %v1250_v47  ;;  %v1290_v47 = vshrl.u32 %v5651_v39, 16  ;;  %v1289_v4 = vsel %vm5065_vm6, %v1282_v62, %v1287_v53  ;;  %v1326_v48 = vshll.u32 %v5676_v54, 16 }
  0xac   :  { %7070 = vst [vmem:[#allocation43_spill] sm:$0xff] %v5651_v39  ;;  %v1313_v39 = vshrl.u32 %v5659_v45, 16  ;;  %v612_v62 = vsel %vm139_vm0, %v464_v7, %v504_v31  ;;  %v1312_v53 = vsel %vm5065_vm6, %v1305_v52, %v1310_v17 }
  0xad   :  { %1604 = vst [vmem:[#allocation1 + $0x6] ss:$9 sm:$0xff] %v1257_v61  ;;  %v1297_v61 = vshrl.u32 %v605_v43, 16  ;;  %v465_v43 = vld [vmem:[%s6984_s0 + $0x9c] sm:$0x3]  ;;  %v614_v17 = vrot.slane %v612_v62, 1 }
  0xae   :  { %1606 = vst [vmem:[#allocation1 + $0x7] ss:$9 sm:$0xff] %v1265_v23  ;;  %v1302_v23 = vshll.u32 %v608_v8, 16  ;;  %v1296_v8 = vsel %vm5065_vm6, %v1290_v47, %v1294_v57  ;;  %v412_v47 = vsel %vm139_vm0, %v51_v55, %v131_v26  ;;  %v505_v57 = vrot.slane %v465_v43, 3 }
  0xaf   :  { %7071 = vst [vmem:[#allocation44_spill] sm:$0xff] %v5659_v45  ;;  %v5714_v52 = vrot.slane %v412_v47, 1 }
  0xb0   :  { %7072 = vst [vmem:[#allocation45_spill] sm:$0xff] %v5664_v46  ;;  %v1304_v19 = vsel %vm5065_vm6, %v1297_v61, %v1302_v23  ;;  %v1328_v61 = vsel %vm5065_vm6, %v1321_v51, %v1326_v48  ;;  %v418_v23 = vsel %vm147_vm2, %v51_v55, %v131_v26  ;;  %v1329_v48 = vshrl.u32 %v5676_v54, 16 }
  0xb1   :  { %7074 = vst [vmem:[#allocation47_spill] sm:$0xff] %v5676_v54  ;;  %v617_v62 = vsel %vm135_vm3, %v465_v43, %v505_v57  ;;  %v1352_v47 = vshrl.u32 %v5714_v52, 16 }
  0xb2   :  { %7076 = vst [vmem:[#allocation49_spill] sm:$0xff] %v5714_v52 }
  0xb5   :  { %v5689_v15 = vld [vmem:[#allocation1] sm:$0xff] }
  0xb6   :  { %7075 = vst [vmem:[#allocation48_spill] sm:$0xff] %v5689_v15  ;;  %v133_v15 = vrot.slane %v53_v58, 3 }
  0xb7   :  { %1609 = vst [vmem:[#allocation1] ss:$9 sm:$0xff] %v1273_v40  ;;  %v1320_v40 = vsel %vm5065_vm6, %v1313_v39, %v1318_v20  ;;  %v5719_v20 = vrot.slane %v415_v60, 2  ;;  %v618_v39 = vsel %vm139_vm0, %v465_v43, %v505_v57  ;;  %v1349_v60 = vshll.u32 %v5714_v52, 16 }
  0xb8   :  { %1611 = vst [vmem:[#allocation1 + $0x1] ss:$9 sm:$0xff] %v1281_v0  ;;  %v611_v0 = vsel %vm135_vm3, %v464_v7, %v504_v31  ;;  %v427_v51 = vsel %vm139_vm0, %v53_v58, %v133_v15 }
  0xb9   :  { %1613 = vst [vmem:[#allocation1 + $0x2] ss:$9 sm:$0xff] %v1289_v4  ;;  %v5717_v4 = vsel %vm135_vm3, %v51_v55, %v131_v26  ;;  %v1333_v7 = vshll.u32 %v611_v0, 16  ;;  %v1336_v31 = vshrl.u32 %v611_v0, 16  ;;  %v5729_v55 = vrot.slane %v427_v51, 1 }
  0xba   :  { %1615 = vst [vmem:[#allocation1 + $0x3] ss:$9 sm:$0xff] %v1296_v8  ;;  %v5722_v8 = vrot.slane %v418_v23, 3  ;;  %v1344_v26 = vshrl.u32 %v5717_v4, 16  ;;  %v466_v23 = vld [vmem:[%s6984_s0 + $0xa4] sm:$0x3] }
  0xbb   :  { %1617 = vst [vmem:[#allocation1 + $0x4] ss:$9 sm:$0xff] %v1304_v19  ;;  %v1341_v19 = vshll.u32 %v614_v17, 16  ;;  %v1335_v43 = vsel %vm5065_vm6, %v1329_v48, %v1333_v7  ;;  %v1360_v57 = vshrl.u32 %v5719_v20, 16  ;;  %v1372_v51 = vshll.u32 %v617_v62, 16 }
  0xbc   :  { %1619 = vst [vmem:[#allocation1 + $0x5] ss:$9 sm:$0xff] %v1312_v53  ;;  %v620_v53 = vrot.slane %v618_v39, 1  ;;  %v1365_v0 = vshll.u32 %v5722_v8, 16  ;;  %v1368_v39 = vshrl.u32 %v5722_v8, 16  ;;  %v1351_v52 = vsel %vm5065_vm6, %v1344_v26, %v1349_v60 }
  0xbd   :  { %1621 = vst [vmem:[#allocation1 + $0x6] ss:$9 sm:$0xff] %v1320_v40  ;;  %v1357_v40 = vshll.u32 %v5719_v20, 16  ;;  %v1343_v17 = vsel %vm5065_vm6, %v1336_v31, %v1341_v19  ;;  %v506_v46 = vrot.slane %v466_v23, 3  ;;  %v430_v31 = vsel %vm143_vm1, %v53_v58, %v133_v15 }
  0xbe   :  { %7077 = vst [vmem:[#allocation50_spill] sm:$0xff] %v5717_v4  ;;  %v1375_v4 = vshrl.u32 %v617_v62, 16  ;;  %v1380_v54 = vshll.u32 %v620_v53, 16  ;;  %v1367_v19 = vsel %vm5065_vm6, %v1360_v57, %v1365_v0  ;;  %v433_v62 = vsel %vm147_vm2, %v53_v58, %v133_v15 }
  0xbf   :  { %7078 = vst [vmem:[#allocation51_spill] sm:$0xff] %v5719_v20  ;;  %v1359_v48 = vsel %vm5065_vm6, %v1352_v47, %v1357_v40  ;;  %v1388_v20 = vshll.u32 %v5729_v55, 16  ;;  %v1374_v53 = vsel %vm5065_vm6, %v1368_v39, %v1372_v51  ;;  %v5762_v60 = vrot.slane %v430_v31, 2  ;;  %v16_v31 = vld [vmem:[%s6984_s0 + $0x4] sm:$0x1] }
  0xc0   :  { %1623 = vst [vmem:[#allocation1 + $0x7] ss:$9 sm:$0xff] %v1328_v61  ;;  %v5734_v61 = vsel %vm135_vm3, %v53_v58, %v133_v15  ;;  %v1382_v26 = vsel %vm5065_vm6, %v1375_v4, %v1380_v54  ;;  %v624_v47 = vsel %vm139_vm0, %v466_v23, %v506_v46  ;;  %v623_v15 = vsel %vm135_vm3, %v466_v23, %v506_v46 }
  0xc1   :  { %v1383_v7 = vshrl.u32 %v5734_v61, 16  ;;  %v626_v58 = vrot.slane %v624_v47, 1  ;;  %v1396_v54 = vshll.u32 %v5762_v60, 16  ;;  %v1399_v4 = vshrl.u32 %v5762_v60, 16 }
  0xc3   :  { %v1390_v40 = vsel %vm5065_vm6, %v1383_v7, %v1388_v20  ;;  %v1411_v20 = vshll.u32 %v623_v15, 16  ;;  %v1419_v39 = vshll.u32 %v626_v58, 16  ;;  %v36_v58 = vld [vmem:[%s6984_s0 + $0x5c] sm:$0x1] }
  0xc7   :  { %v5748_v45 = vld [vmem:[#allocation1] sm:$0xff] }
  0xc8   :  { %1626 = vst [vmem:[#allocation1] ss:$9 sm:$0xff] %v1335_v43  ;;  %v5767_v43 = vrot.slane %v433_v62, 3 }
  0xc9   :  { %1628 = vst [vmem:[#allocation1 + $0x1] ss:$9 sm:$0xff] %v1343_v17  ;;  %v1414_v17 = vshrl.u32 %v623_v15, 16  ;;  %v7084_v15 = vld [vmem:[#allocation11_spill] sm:$0xff] }
  0xca   :  { %1630 = vst [vmem:[#allocation1 + $0x2] ss:$9 sm:$0xff] %v1351_v52  ;;  %v1391_v52 = vshrl.u32 %v5729_v55, 16  ;;  %v1404_v57 = vshll.u32 %v5767_v43, 16  ;;  %v1407_v0 = vshrl.u32 %v5767_v43, 16 }
  0xcb   :  { %1632 = vst [vmem:[#allocation1 + $0x3] ss:$9 sm:$0xff] %v1359_v48  ;;  %v1421_v7 = vsel %vm5065_vm6, %v1414_v17, %v1419_v39  ;;  %v7087_v17 = vld [vmem:[#allocation14_spill] sm:$0xff]  ;;  %v7088_v39 = vld [vmem:[#allocation16_spill] sm:$0xff] }
  0xcc   :  { %1634 = vst [vmem:[#allocation1 + $0x4] ss:$9 sm:$0xff] %v1367_v19  ;;  %v1398_v51 = vsel %vm5065_vm6, %v1391_v52, %v1396_v54  ;;  %v1406_v46 = vsel %vm5065_vm6, %v1399_v4, %v1404_v57  ;;  %v1413_v23 = vsel %vm5065_vm6, %v1407_v0, %v1411_v20  ;;  %v96_v19 = vrot.slane %v16_v31, 3  ;;  %v7085_v57 = vld [vmem:[#allocation12_spill] sm:$0xff]  ;;  %v7086_v0 = vld [vmem:[#allocation15_spill] sm:$0xff] }
  0xcd   :  { %1636 = vst [vmem:[#allocation1 + $0x5] ss:$9 sm:$0xff] %v1374_v53  ;;  %v116_v54 = vrot.slane %v36_v58, 3 }
  0xce   :  { %1638 = vst [vmem:[#allocation1 + $0x6] ss:$9 sm:$0xff] %v1382_v26  ;;  %v153_v53 = vsel %vm135_vm3, %v16_v31, %v96_v19  ;;  %v18_v26 = vld [vmem:[%s6984_s0 + $0xc] sm:$0x1] }
  0xcf   :  { %1640 = vst [vmem:[#allocation1 + $0x7] ss:$9 sm:$0xff] %v1390_v40  ;;  %v7083_v40 = vld [vmem:[#allocation9_spill] sm:$0xff]  ;;  %v303_v20 = vsel %vm135_vm3, %v36_v58, %v116_v54  ;;  %v7110_v54 = vld [vmem:[#allocation42_spill] sm:$0xff] }
  0xd6   :  { %v5781_v48 = vld [vmem:[#allocation1] sm:$0xff] }
  0xd7   :  { %1643 = vst [vmem:[#allocation1] ss:$9 sm:$0xff] %v1398_v51  ;;  %v7089_v51 = vld [vmem:[#allocation17_spill] sm:$0xff] }
  0xd8   :  { %1645 = vst [vmem:[#allocation1 + $0x1] ss:$9 sm:$0xff] %v1406_v46  ;;  %v7090_v46 = vld [vmem:[#allocation19_spill] sm:$0xff] }
  0xd9   :  { %1647 = vst [vmem:[#allocation1 + $0x2] ss:$9 sm:$0xff] %v1413_v23  ;;  %v38_v23 = vld [vmem:[%s6984_s0 + $0x64] sm:$0x1] }
  0xda   :  { %1649 = vst [vmem:[#allocation1 + $0x3] ss:$9 sm:$0xff] %v1421_v7  ;;  %v118_v7 = vrot.slane %v38_v23, 3 }
  0xdc   :  { %v318_v19 = vsel %vm135_vm3, %v38_v23, %v118_v7 }
  0xe1   :  { %v5788_v62 = vld [vmem:[#allocation1] sm:$0xff] }
  0xe2   :  { %1775 = vst [vmem:[#allocation1] ss:$9 sm:$0xff] %v5028_v21  ;;  %v98_v21 = vrot.slane %v18_v26, 3 }
  0xe3   :  { %1777 = vst [vmem:[#allocation1 + $0x1] ss:$9 sm:$0xff] %v5030_v22  ;;  %v20_v22 = vld [vmem:[%s6984_s0 + $0x14] sm:$0x1] }
  0xe4   :  { %1779 = vst [vmem:[#allocation1 + $0x2] ss:$9 sm:$0xff] %v5033_v24  ;;  %v168_v24 = vsel %vm135_vm3, %v18_v26, %v98_v21  ;;  %v100_v47 = vrot.slane %v20_v22, 3  ;;  %v7092_v26 = vld [vmem:[#allocation21_spill] sm:$0xff]  ;;  %v7093_v21 = vld [vmem:[#allocation22_spill] sm:$0xff] }
  0xe5   :  { %1781 = vst [vmem:[#allocation1 + $0x3] ss:$9 sm:$0xff] %v5037_v27 }
  0xe6   :  { %1783 = vst [vmem:[#allocation1 + $0x4] ss:$9 sm:$0xff] %v153_v53  ;;  %v7091_v53 = vld [vmem:[#allocation18_spill] sm:$0xff] }
  0xe7   :  { %1785 = vst [vmem:[#allocation1 + $0x5] ss:$9 sm:$0xff] %v5040_v28  ;;  %v183_v28 = vsel %vm135_vm3, %v20_v22, %v100_v47  ;;  %v7094_v22 = vld [vmem:[#allocation24_spill] sm:$0xff]  ;;  %v7095_v47 = vld [vmem:[#allocation23_spill] sm:$0xff] }
  0xe8   :  { %1787 = vst [vmem:[#allocation1 + $0x6] ss:$9 sm:$0xff] %v5042_v29  ;;  %v22_v29 = vld [vmem:[%s6984_s0 + $0x1c] sm:$0x1] }
  0xe9   :  { %1789 = vst [vmem:[#allocation1 + $0x7] ss:$9 sm:$0xff] %v5048_v32  ;;  %v102_v32 = vrot.slane %v22_v29, 3 }
  0xf0   :  { %v5805_v27 = vld [vmem:[#allocation1] sm:$0xff] }
  0xf1   :  { %1791 = vst [vmem:[#allocation1] ss:$9 sm:$0xff] %v5060_v42 }
  0xf2   :  { %1792 = vst [vmem:[#allocation1 + $0x1] ss:$9 sm:$0xff] %v168_v24  ;;  %v40_v24 = vld [vmem:[%s6984_s0 + $0x6c] sm:$0x1] }
  0xf3   :  { %1793 = vst [vmem:[#allocation1 + $0x2] ss:$9 sm:$0xff] %v5105_v11  ;;  %v198_v11 = vsel %vm135_vm3, %v22_v29, %v102_v32  ;;  %v7097_v29 = vld [vmem:[#allocation26_spill] sm:$0xff]  ;;  %v120_v32 = vrot.slane %v40_v24, 3 }
  0xf4   :  { %1794 = vst [vmem:[#allocation1 + $0x3] ss:$9 sm:$0xff] %v5102_v10  ;;  %v24_v10 = vld [vmem:[%s6984_s0 + $0x24] sm:$0x1] }
  0xf5   :  { %1795 = vst [vmem:[#allocation1 + $0x4] ss:$9 sm:$0xff] %v5107_v12  ;;  %v104_v12 = vrot.slane %v24_v10, 3 }
  0xf6   :  { %1796 = vst [vmem:[#allocation1 + $0x5] ss:$9 sm:$0xff] %v5110_v14  ;;  %v26_v14 = vld [vmem:[%s6984_s0 + $0x2c] sm:$0x1] }
  0xf7   :  { %1797 = vst [vmem:[#allocation1 + $0x6] ss:$9 sm:$0xff] %v183_v28  ;;  %v7096_v28 = vld [vmem:[#allocation25_spill] sm:$0xff] }
  0xf8   :  { %1798 = vst [vmem:[#allocation1 + $0x7] ss:$9 sm:$0xff] %v5122_v34  ;;  %v106_v34 = vrot.slane %v26_v14, 3 }
  0xff   :  { %v5817_v42 = vld [vmem:[#allocation1] sm:$0xff] }
 0x100   :  { %1800 = vst [vmem:[#allocation1] ss:$9 sm:$0xff] %v5117_v30  ;;  %v213_v30 = vsel %vm135_vm3, %v24_v10, %v104_v12  ;;  %v333_v10 = vsel %vm135_vm3, %v40_v24, %v120_v32  ;;  %v7118_v24 = vld [vmem:[#allocation51_spill] sm:$0xff]  ;;  %v4955_v32 = vld [vmem:[%s6983_s1 + $0x68] sm:$0xff] }
 0x101   :  { %1801 = vst [vmem:[#allocation1 + $0x1] ss:$9 sm:$0xff] %v5153_v59  ;;  %4321 = vmatpush.bf16.msra.mxu3 %v4955_v32 }
 0x102   :  { %1802 = vst [vmem:[#allocation1 + $0x2] ss:$9 sm:$0xff] %v5158_v63  ;;  %v228_v63 = vsel %vm135_vm3, %v26_v14, %v106_v34 }
 0x103   :  { %1803 = vst [vmem:[#allocation1 + $0x3] ss:$9 sm:$0xff] %v198_v11  ;;  %v42_v11 = vld [vmem:[%s6984_s0 + $0x74] sm:$0x1] }
 0x104   :  { %1804 = vst [vmem:[#allocation1 + $0x4] ss:$9 sm:$0xff] %v5172_v9  ;;  %v122_v12 = vrot.slane %v42_v11, 3 }
 0x105   :  { %1805 = vst [vmem:[#allocation1 + $0x5] ss:$9 sm:$0xff] %v5167_v5  ;;  %v28_v5 = vld [vmem:[%s6984_s0 + $0x34] sm:$0x1] }
 0x106   :  { %1806 = vst [vmem:[#allocation1 + $0x6] ss:$9 sm:$0xff] %v5174_v13  ;;  %v108_v9 = vrot.slane %v28_v5, 3  ;;  %v30_v13 = vld [vmem:[%s6984_s0 + $0x3c] sm:$0x1]  ;;  %v348_v34 = vsel %vm135_vm3, %v42_v11, %v122_v12  ;;  %v7119_v12 = vld [vmem:[#allocation2_spill] sm:$0xff] }
 0x107   :  { %1807 = vst [vmem:[#allocation1 + $0x7] ss:$9 sm:$0xff] %v5181_v18  ;;  %v4688_v11 = vld [vmem:[%s6984_s0 + $0x8] sm:$0xf] }
 0x108   :  { %v243_v18 = vsel %vm135_vm3, %v28_v5, %v108_v9  ;;  %v7100_v5 = vld [vmem:[#allocation30_spill] sm:$0xff]  ;;  %v44_v9 = vld [vmem:[%s6984_s0 + $0x7c] sm:$0x1] }
 0x10e   :  { %v5834_v59 = vld [vmem:[#allocation1] sm:$0xff] }
 0x10f   :  { %1809 = vst [vmem:[#allocation1] ss:$9 sm:$0xff] %v213_v30  ;;  %v7098_v30 = vld [vmem:[#allocation29_spill] sm:$0xff] }
 0x110   :  { %1810 = vst [vmem:[#allocation1 + $0x1] ss:$9 sm:$0xff] %v5223_v2  ;;  %v110_v2 = vrot.slane %v30_v13, 3 }
 0x111   :  { %1811 = vst [vmem:[#allocation1 + $0x2] ss:$9 sm:$0xff] %v5220_v1 }
 0x112   :  { %1812 = vst [vmem:[#allocation1 + $0x3] ss:$9 sm:$0xff] %v5225_v3  ;;  %v258_v3 = vsel %vm135_vm3, %v30_v13, %v110_v2  ;;  %v7101_v13 = vld [vmem:[#allocation31_spill] sm:$0xff]  ;;  %v46_v2 = vld [vmem:[%s6984_s0 + $0x84] sm:$0x1] }
 0x113   :  { %1813 = vst [vmem:[#allocation1 + $0x4] ss:$9 sm:$0xff] %v5228_v6  ;;  %v32_v6 = vld [vmem:[%s6984_s0 + $0x44] sm:$0x1] }
 0x114   :  { %1814 = vst [vmem:[#allocation1 + $0x5] ss:$9 sm:$0xff] %v228_v63  ;;  %v7099_v63 = vld [vmem:[#allocation28_spill] sm:$0xff] }
 0x115   :  { %1815 = vst [vmem:[#allocation1 + $0x6] ss:$9 sm:$0xff] %v5240_v35 }
 0x116   :  { %1816 = vst [vmem:[#allocation1 + $0x7] ss:$9 sm:$0xff] %v5235_v25  ;;  %v112_v25 = vrot.slane %v32_v6, 3 }
 0x11d   :  { %v5850_v1 = vld [vmem:[#allocation1] sm:$0xff] }
 0x11e   :  { %1818 = vst [vmem:[#allocation1] ss:$9 sm:$0xff] %v5242_v36  ;;  %v273_v36 = vsel %vm135_vm3, %v32_v6, %v112_v25  ;;  %v126_v25 = vrot.slane %v46_v2, 3 }
 0x11f   :  { %1819 = vst [vmem:[#allocation1 + $0x1] ss:$9 sm:$0xff] %v5278_v16  ;;  %v7079_v16 = vld [vmem:[#allocation6_spill] sm:$0xff] }
 0x120   :  { %1820 = vst [vmem:[#allocation1 + $0x2] ss:$9 sm:$0xff] %v243_v18  ;;  %v124_v18 = vrot.slane %v44_v9, 3 }
 0x121   :  { %1821 = vst [vmem:[#allocation1 + $0x3] ss:$9 sm:$0xff] %v5287_v33  ;;  %v7080_v33 = vld [vmem:[#allocation7_spill] sm:$0xff] }
 0x122   :  { %1822 = vst [vmem:[#allocation1 + $0x4] ss:$9 sm:$0xff] %v5289_v37  ;;  %v7081_v37 = vld [vmem:[#allocation8_spill] sm:$0xff] }
 0x123   :  { %1823 = vst [vmem:[#allocation1 + $0x5] ss:$9 sm:$0xff] %v5291_v38  ;;  %v7082_v38 = vld [vmem:[#allocation10_spill] sm:$0xff] }
 0x124   :  { %1824 = vst [vmem:[#allocation1 + $0x6] ss:$9 sm:$0xff] %v5299_v44  ;;  %v34_v44 = vld [vmem:[%s6984_s0 + $0x4c] sm:$0x1] }
 0x125   :  { %1825 = vst [vmem:[#allocation1 + $0x7] ss:$9 sm:$0xff] %v258_v3  ;;  %v363_v3 = vsel %vm135_vm3, %v44_v9, %v124_v18 }
 0x12c   :  { %v5862_v35 = vld [vmem:[#allocation1] sm:$0xff] }
 0x12d   :  { %1827 = vst [vmem:[#allocation1] ss:$9 sm:$0xff] %v5340_v56  ;;  %v114_v56 = vrot.slane %v34_v44, 3 }
 0x12e   :  { %1828 = vst [vmem:[#allocation1 + $0x1] ss:$9 sm:$0xff] %v7079_v16  ;;  %v378_v16 = vsel %vm135_vm3, %v46_v2, %v126_v25 }
 0x12f   :  { %1829 = vst [vmem:[#allocation1 + $0x2] ss:$9 sm:$0xff] %v7080_v33  ;;  %v288_v52 = vsel %vm135_vm3, %v34_v44, %v114_v56  ;;  %v7105_v33 = vld [vmem:[#allocation36_spill] sm:$0xff]  ;;  %v48_v44 = vld [vmem:[%s6984_s0 + $0x8c] sm:$0x1]  ;;  %v7108_v56 = vld [vmem:[#allocation41_spill] sm:$0xff] }
 0x130   :  { %1830 = vst [vmem:[#allocation1 + $0x3] ss:$9 sm:$0xff] %v7081_v37  ;;  %v7106_v37 = vld [vmem:[#allocation37_spill] sm:$0xff] }
 0x131   :  { %1831 = vst [vmem:[#allocation1 + $0x4] ss:$9 sm:$0xff] %v273_v36  ;;  %v7103_v36 = vld [vmem:[#allocation34_spill] sm:$0xff] }
 0x132   :  { %1832 = vst [vmem:[#allocation1 + $0x5] ss:$9 sm:$0xff] %v7082_v38  ;;  %v7107_v38 = vld [vmem:[#allocation38_spill] sm:$0xff] }
 0x133   :  { %1833 = vst [vmem:[#allocation1 + $0x6] ss:$9 sm:$0xff] %v7083_v40  ;;  %v128_v40 = vrot.slane %v48_v44, 3 }
 0x134   :  { %1834 = vst [vmem:[#allocation1 + $0x7] ss:$9 sm:$0xff] %v7084_v15 }
 0x135   :  { %v393_v58 = vsel %vm135_vm3, %v48_v44, %v128_v40  ;;  %v7120_v44 = vld [vmem:[#allocation3_spill] sm:$0xff] }
 0x136   :  { %v4691_v40 = vld [vmem:[%s6984_s0 + $0x14] sm:$0x1] }
 0x13b   :  { %v5879_v4 = vld [vmem:[#allocation1] sm:$0xff] }
 0x13c   :  { %1836 = vst [vmem:[#allocation1] ss:$9 sm:$0xff] %v7085_v57  ;;  %v7111_v57 = vld [vmem:[#allocation43_spill] sm:$0xff] }
 0x13d   :  { %1837 = vst [vmem:[#allocation1 + $0x1] ss:$9 sm:$0xff] %v288_v52  ;;  %v7109_v52 = vld [vmem:[#allocation40_spill] sm:$0xff] }
 0x13e   :  { %1838 = vst [vmem:[#allocation1 + $0x2] ss:$9 sm:$0xff] %v7086_v0  ;;  %v7112_v0 = vld [vmem:[#allocation45_spill] sm:$0xff] }
 0x13f   :  { %1839 = vst [vmem:[#allocation1 + $0x3] ss:$9 sm:$0xff] %v7087_v17  ;;  %v7113_v17 = vld [vmem:[#allocation44_spill] sm:$0xff] }
 0x140   :  { %1840 = vst [vmem:[#allocation1 + $0x4] ss:$9 sm:$0xff] %v7088_v39  ;;  %v7114_v39 = vld [vmem:[#allocation46_spill] sm:$0xff] }
 0x141   :  { %1841 = vst [vmem:[#allocation1 + $0x5] ss:$9 sm:$0xff] %v7089_v51 }
 0x142   :  { %1842 = vst [vmem:[#allocation1 + $0x6] ss:$9 sm:$0xff] %v303_v20  ;;  %v50_v20 = vld [vmem:[%s6984_s0 + $0x94] sm:$0x1] }
 0x143   :  { %1843 = vst [vmem:[#allocation1 + $0x7] ss:$9 sm:$0xff] %v7090_v46  ;;  %v130_v51 = vrot.slane %v50_v20, 3  ;;  %v52_v46 = vld [vmem:[%s6984_s0 + $0x9c] sm:$0x1] }
 0x144   :  { %v132_v7 = vrot.slane %v52_v46, 3 }
 0x145   :  { %v408_v23 = vsel %vm135_vm3, %v50_v20, %v130_v51 }
 0x14a   :  { %v5891_v31 = vld [vmem:[#allocation1] sm:$0xff] }
 0x14b   :  { %1845 = vst [vmem:[#allocation1] ss:$9 sm:$0xff] %v7091_v53  ;;  %v7115_v53 = vld [vmem:[#allocation47_spill] sm:$0xff] }
 0x14c   :  { %1846 = vst [vmem:[#allocation1 + $0x1] ss:$9 sm:$0xff] %v7092_v26  ;;  %v7116_v26 = vld [vmem:[#allocation50_spill] sm:$0xff] }
 0x14d   :  { %1847 = vst [vmem:[#allocation1 + $0x2] ss:$9 sm:$0xff] %v7093_v21  ;;  %v423_v21 = vsel %vm135_vm3, %v52_v46, %v132_v7 }
 0x14e   :  { %1848 = vst [vmem:[#allocation1 + $0x3] ss:$9 sm:$0xff] %v318_v19 }
 0x14f   :  { %1849 = vst [vmem:[#allocation1 + $0x4] ss:$9 sm:$0xff] %v7094_v22  ;;  %v7117_v22 = vld [vmem:[#allocation49_spill] sm:$0xff] }
 0x150   :  { %1850 = vst [vmem:[#allocation1 + $0x5] ss:$9 sm:$0xff] %v7095_v47  ;;  %v54_v47 = vld [vmem:[%s6984_s0 + $0xa4] sm:$0x1] }
 0x151   :  { %1851 = vst [vmem:[#allocation1 + $0x6] ss:$9 sm:$0xff] %v7096_v28  ;;  %v4946_v28 = vld [vmem:[%s6983_s1 + $0x20] sm:$0xff] }
 0x152   :  { %1852 = vst [vmem:[#allocation1 + $0x7] ss:$9 sm:$0xff] %v7097_v29  ;;  %v4942_v29 = vld [vmem:[%s6983_s1] sm:$0xff]  ;;  %1709 = vmatpush.bf16.msra.mxu0 %v4946_v28  ;;  %v4696_v28 = vld [vmem:[%s6984_s0 + $0x28] sm:$0xf] }
 0x153   :  { %1952 = vmatpush.bf16.msra.mxu1 %v4942_v29  ;;  %v4695_v29 = vld [vmem:[%s6984_s0 + $0x24] sm:$0x1] }
 0x155   :  { %4646 = vmatmul.msk.bf16.vlgmr.msra.gmra.mxu0 %vm1675_vm7, %v7119_v12  ;;  %v2106_v12 = vrot.slane %v4695_v29, 3 }
 0x156   :  { %4675 = vmatmul.msk.bf16.vlgmr.msra.gmra.mxu1 %vm1675_vm7, %v5805_v27 }
 0x159   :  { %v5908_v14 = vld [vmem:[#allocation1] sm:$0xff] }
 0x15a   :  { %1854 = vst [vmem:[#allocation1] ss:$9 sm:$0xff] %v333_v10 }
 0x15b   :  { %1855 = vst [vmem:[#allocation1 + $0x1] ss:$9 sm:$0xff] %v7098_v30 }
 0x15c   :  { %1856 = vst [vmem:[#allocation1 + $0x2] ss:$9 sm:$0xff] %v7099_v63  ;;  %v4690_v63 = vld [vmem:[%s6984_s0 + $0x10] sm:$0xf] }
 0x15d   :  { %1857 = vst [vmem:[#allocation1 + $0x3] ss:$9 sm:$0xff] %v7100_v5  ;;  %v4689_v5 = vld [vmem:[%s6984_s0 + $0xc] sm:$0x1]  ;;  %v2101_v9 = vrot.slane %v4690_v63, 3 }
 0x15e   :  { %1858 = vst [vmem:[#allocation1 + $0x4] ss:$9 sm:$0xff] %v5534_v50  ;;  %v7102_v50 = vld [vmem:[#allocation32_spill] sm:$0xff] }
 0x15f   :  { %1859 = vst [vmem:[#allocation1 + $0x5] ss:$9 sm:$0xff] %v348_v34  ;;  %v2099_v34 = vrot.slane %v4688_v11, 3 }
 0x160   :  { %1860 = vst [vmem:[#allocation1 + $0x6] ss:$9 sm:$0xff] %v5546_v41  ;;  %v7104_v41 = vld [vmem:[#allocation35_spill] sm:$0xff] }
 0x161   :  { %1861 = vst [vmem:[#allocation1 + $0x7] ss:$9 sm:$0xff] %v7101_v13  ;;  %v2142_v27 = vsel %vm139_vm0, %v4688_v11, %v2099_v34  ;;  %v2100_v13 = vrot.slane %v4689_v5, 3  ;;  %v2141_v18 = vsel %vm135_vm3, %v4688_v11, %v2099_v34 }
 0x165   :  { %4647 = vmatmul.msk.bf16.gmra.mxu0 %vm1675_vm7, %v7120_v44 }
 0x166   :  { %4676 = vmatmul.msk.bf16.gmra.mxu1 %vm1675_vm7, %v5817_v42  ;;  %v4694_v42 = vld [vmem:[%s6984_s0 + $0x20] sm:$0xf] }
 0x168   :  { %v5924_v6 = vld [vmem:[#allocation1] sm:$0xff] }
 0x169   :  { %1863 = vst [vmem:[#allocation1] ss:$9 sm:$0xff] %v7102_v50  ;;  %v2157_v50 = vsel %vm139_vm0, %v4690_v63, %v2101_v9 }
 0x16a   :  { %1864 = vst [vmem:[#allocation1 + $0x1] ss:$9 sm:$0xff] %v7103_v36  ;;  %v2160_v36 = vsel %vm143_vm1, %v4690_v63, %v2101_v9 }
 0x16b   :  { %1865 = vst [vmem:[#allocation1 + $0x2] ss:$9 sm:$0xff] %v363_v3 }
 0x16c   :  { %1866 = vst [vmem:[#allocation1 + $0x3] ss:$9 sm:$0xff] %v7104_v41  ;;  %v2153_v41 = vsel %vm135_vm3, %v4689_v5, %v2100_v13 }
 0x16d   :  { %1867 = vst [vmem:[#allocation1 + $0x4] ss:$9 sm:$0xff] %v7105_v33  ;;  %v2159_v33 = vrot.slane %v2157_v50, 1 }
 0x16e   :  { %1868 = vst [vmem:[#allocation1 + $0x5] ss:$9 sm:$0xff] %v7106_v37  ;;  %v2162_v37 = vrot.slane %v2160_v36, 2  ;;  %v7122_v36 = vld [vmem:[#allocation5_spill] sm:$0xff] }
 0x16f   :  { %1869 = vst [vmem:[#allocation1 + $0x6] ss:$9 sm:$0xff] %v7107_v38  ;;  %v4692_v38 = vld [vmem:[%s6984_s0 + $0x18] sm:$0xf] }
 0x170   :  { %1870 = vst [vmem:[#allocation1 + $0x7] ss:$9 sm:$0xff] %v378_v16  ;;  %v2156_v16 = vsel %vm135_vm3, %v4690_v63, %v2101_v9 }
 0x176   :  { %4677 = vmatmul.msk.bf16.gmra.mxu1 %vm1675_vm7, %v5834_v59 }
 0x177   :  { %v5936_v15 = vld [vmem:[#allocation1] sm:$0xff] }
 0x178   :  { %1872 = vst [vmem:[#allocation1] ss:$9 sm:$0xff] %v7108_v56  ;;  %v2103_v56 = vrot.slane %v4692_v38, 3 }
 0x179   :  { %1873 = vst [vmem:[#allocation1 + $0x1] ss:$9 sm:$0xff] %v7109_v52  ;;  %v2102_v52 = vrot.slane %v4691_v40, 3 }
 0x17a   :  { %1874 = vst [vmem:[#allocation1 + $0x2] ss:$9 sm:$0xff] %v7110_v54  ;;  %v4693_v54 = vld [vmem:[%s6984_s0 + $0x1c] sm:$0x1]  ;;  %v2175_v20 = vsel %vm143_vm1, %v4692_v38, %v2103_v56 }
 0x17b   :  { %1875 = vst [vmem:[#allocation1 + $0x3] ss:$9 sm:$0xff] %v7111_v57  ;;  %v2104_v46 = vrot.slane %v4693_v54, 3 }
 0x17c   :  { %1876 = vst [vmem:[#allocation1 + $0x4] ss:$9 sm:$0xff] %v393_v58  ;;  %v2163_v58 = vsel %vm147_vm2, %v4690_v63, %v2101_v9  ;;  %v2198_v9 = vsel %vm135_vm3, %v4695_v29, %v2106_v12 }
 0x17d   :  { %1877 = vst [vmem:[#allocation1 + $0x5] ss:$9 sm:$0xff] %v7112_v0  ;;  %v2165_v57 = vrot.slane %v2163_v58, 3  ;;  %v2172_v0 = vsel %vm139_vm0, %v4692_v38, %v2103_v56 }
 0x17e   :  { %1878 = vst [vmem:[#allocation1 + $0x6] ss:$9 sm:$0xff] %v7113_v17  ;;  %v2168_v17 = vsel %vm135_vm3, %v4691_v40, %v2102_v52  ;;  %v2174_v7 = vrot.slane %v2172_v0, 1 }
 0x17f   :  { %1879 = vst [vmem:[#allocation1 + $0x7] ss:$9 sm:$0xff] %v7114_v39  ;;  %v2178_v39 = vsel %vm147_vm2, %v4692_v38, %v2103_v56 }
 0x186   :  { %v5953_v19 = vld [vmem:[#allocation1] sm:$0xff]  ;;  %4678 = vmatmul.msk.bf16.gmra.mxu1 %vm1675_vm7, %v5850_v1 }
 0x187   :  { %1881 = vst [vmem:[#allocation1] ss:$9 sm:$0xff] %v7115_v53  ;;  %v2105_v53 = vrot.slane %v4694_v42, 3 }
 0x188   :  { %1882 = vst [vmem:[#allocation1 + $0x1] ss:$9 sm:$0xff] %v408_v23  ;;  %v2171_v23 = vsel %vm135_vm3, %v4692_v38, %v2103_v56 }
 0x189   :  { %1883 = vst [vmem:[#allocation1 + $0x2] ss:$9 sm:$0xff] %v7116_v26  ;;  %v2177_v26 = vrot.slane %v2175_v20, 2  ;;  %v2187_v32 = vsel %vm139_vm0, %v4694_v42, %v2105_v53 }
 0x18a   :  { %1884 = vst [vmem:[#allocation1 + $0x3] ss:$9 sm:$0xff] %v7117_v22  ;;  %v2183_v22 = vsel %vm135_vm3, %v4693_v54, %v2104_v46  ;;  %v4701_v46 = vld [vmem:[%s6984_s0 + $0x3c] sm:$0x1] }
 0x18b   :  { %1885 = vst [vmem:[#allocation1 + $0x4] ss:$9 sm:$0xff] %v7118_v24  ;;  %v2186_v24 = vsel %vm135_vm3, %v4694_v42, %v2105_v53 }
 0x18c   :  { %1886 = vst [vmem:[#allocation1 + $0x5] ss:$9 sm:$0xff] %v5722_v8  ;;  %v134_v8 = vrot.slane %v54_v47, 3 }
 0x18d   :  { %1887 = vst [vmem:[#allocation1 + $0x6] ss:$9 sm:$0xff] %v423_v21  ;;  %v2180_v21 = vrot.slane %v2178_v39, 3 }
 0x18e   :  { %1888 = vst [vmem:[#allocation1 + $0x7] ss:$9 sm:$0xff] %v5734_v61  ;;  %v4954_v61 = vld [vmem:[%s6983_s1 + $0x60] sm:$0xff]  ;;  %v438_v30 = vsel %vm135_vm3, %v54_v47, %v134_v8  ;;  %v7121_v47 = vld [vmem:[#allocation4_spill] sm:$0xff]  ;;  %v2107_v8 = vrot.slane %v4696_v28, 3 }
 0x18f   :  { %4322 = vmatpush.bf16.msra.mxu3 %v4954_v61  ;;  %4648 = vmatmul.msk.bf16.gmra.mxu0 %vm1675_vm7, %v7121_v47  ;;  %v2190_v61 = vsel %vm143_vm1, %v4694_v42, %v2105_v53 }
 0x190   :  { %v2202_v5 = vsel %vm139_vm0, %v4696_v28, %v2107_v8  ;;  %v2205_v59 = vsel %vm143_vm1, %v4696_v28, %v2107_v8 }
 0x191   :  { %v2204_v13 = vrot.slane %v2202_v5, 1 }
 0x195   :  { %v5980_v10 = vld [vmem:[#allocation1] sm:$0xff] }
 0x196   :  { %1890 = vst [vmem:[#allocation1] ss:$9 sm:$0xff] %v5729_v55  ;;  %v2145_v55 = vsel %vm143_vm1, %v4688_v11, %v2099_v34  ;;  %4679 = vmatmul.msk.bf16.gmra.mxu1 %vm1675_vm7, %v5862_v35 }
 0x197   :  { %1891 = vst [vmem:[#allocation1 + $0x1] ss:$9 sm:$0xff] %v5762_v60  ;;  %v2148_v60 = vsel %vm147_vm2, %v4688_v11, %v2099_v34  ;;  %v2147_v2 = vrot.slane %v2145_v55, 2  ;;  %v2193_v11 = vsel %vm147_vm2, %v4694_v42, %v2105_v53  ;;  %v2192_v34 = vrot.slane %v2190_v61, 2 }
 0x198   :  { %1892 = vst [vmem:[#allocation1 + $0x2] ss:$9 sm:$0xff] %v5767_v43  ;;  %v2144_v43 = vrot.slane %v2142_v27, 1  ;;  %v2150_v25 = vrot.slane %v2148_v60, 3  ;;  %v2195_v63 = vrot.slane %v2193_v11, 3  ;;  %v2208_v55 = vsel %vm147_vm2, %v4696_v28, %v2107_v8 }
 0x199   :  { %1893 = vst [vmem:[#allocation1 + $0x3] ss:$9 sm:$0xff] %v438_v30  ;;  %v2189_v30 = vrot.slane %v2187_v32, 1  ;;  %v2201_v60 = vsel %vm135_vm3, %v4696_v28, %v2107_v8 }
 0x19f   :  { %4649 = vmatmul.msk.bf16.gmra.mxu0 %vm1675_vm7, %v7122_v36 }
 0x1a0   :  { %v6000_v3 = vld [vmem:[#allocation1] sm:$0xff] }
 0x1a1   :  { %2448 = vst [vmem:[#allocation1] ss:$9 sm:$0xff] %v2141_v18  ;;  %v2207_v18 = vrot.slane %v2205_v59, 2 }
 0x1a2   :  { %2451 = vst [vmem:[#allocation1 + $0x1] ss:$9 sm:$0xff] %v2144_v43  ;;  %v4698_v43 = vld [vmem:[%s6984_s0 + $0x30] sm:$0xf] }
 0x1a3   :  { %2454 = vst [vmem:[#allocation1 + $0x2] ss:$9 sm:$0xff] %v2147_v2  ;;  %v2210_v2 = vrot.slane %v2208_v55, 3  ;;  %v2109_v50 = vrot.slane %v4698_v43, 3  ;;  %v4705_v55 = vld [vmem:[%s6984_s0 + $0x4c] sm:$0x1] }
 0x1a4   :  { %2457 = vst [vmem:[#allocation1 + $0x3] ss:$9 sm:$0xff] %v2150_v25  ;;  %v4697_v25 = vld [vmem:[%s6984_s0 + $0x2c] sm:$0x1] }
 0x1a5   :  { %2459 = vst [vmem:[#allocation1 + $0x4] ss:$9 sm:$0xff] %v2153_v41  ;;  %v4700_v41 = vld [vmem:[%s6984_s0 + $0x38] sm:$0xf]  ;;  %v2220_v44 = vsel %vm143_vm1, %v4698_v43, %v2109_v50  ;;  %v2223_v56 = vsel %vm147_vm2, %v4698_v43, %v2109_v50  ;;  %v2216_v1 = vsel %vm135_vm3, %v4698_v43, %v2109_v50 }
 0x1a6   :  { %2461 = vst [vmem:[#allocation1 + $0x5] ss:$9 sm:$0xff] %v2156_v16  ;;  %v2108_v16 = vrot.slane %v4697_v25, 3  ;;  %v2111_v38 = vrot.slane %v4700_v41, 3  ;;  %v2222_v54 = vrot.slane %v2220_v44, 2  ;;  %v2225_v0 = vrot.slane %v2223_v56, 3  ;;  %4680 = vmatmul.msk.bf16.gmra.mxu1 %vm1675_vm7, %v5879_v4 }
 0x1a7   :  { %2464 = vst [vmem:[#allocation1 + $0x6] ss:$9 sm:$0xff] %v2159_v33  ;;  %v4699_v33 = vld [vmem:[%s6984_s0 + $0x34] sm:$0x1]  ;;  %v4708_v56 = vld [vmem:[%s6984_s0 + $0x60] sm:$0xf] }
 0x1a8   :  { %2467 = vst [vmem:[#allocation1 + $0x7] ss:$9 sm:$0xff] %v2162_v37  ;;  %v2217_v37 = vsel %vm139_vm0, %v4698_v43, %v2109_v50  ;;  %v2213_v40 = vsel %vm135_vm3, %v4697_v25, %v2108_v16  ;;  %v2110_v58 = vrot.slane %v4699_v33, 3  ;;  %v2232_v42 = vsel %vm139_vm0, %v4700_v41, %v2111_v38 }
 0x1a9   :  { %v2219_v52 = vrot.slane %v2217_v37, 1  ;;  %v2234_v39 = vrot.slane %v2232_v42, 1  ;;  %v2235_v53 = vsel %vm143_vm1, %v4700_v41, %v2111_v38 }
 0x1aa   :  { %v2228_v20 = vsel %vm135_vm3, %v4699_v33, %v2110_v58  ;;  %v4707_v58 = vld [vmem:[%s6984_s0 + $0x54] sm:$0x1] }
 0x1af   :  { %v2468_v51 = vld [vmem:[#allocation1] sm:$0xff] }
 0x1b0   :  { %4752 = vmatmul.msk.bf16.vlgmr.msra.gmra.mxu2 %vm1675_vm7, %v2468_v51  ;;  %2470 = vst [vmem:[#allocation1] ss:$9 sm:$0xff] %v2165_v57  ;;  %v4702_v51 = vld [vmem:[%s6984_s0 + $0x40] sm:$0xf] }
 0x1b1   :  { %2471 = vst [vmem:[#allocation1 + $0x1] ss:$9 sm:$0xff] %v2168_v17  ;;  %v2231_v17 = vsel %vm135_vm3, %v4700_v41, %v2111_v38 }
 0x1b2   :  { %2472 = vst [vmem:[#allocation1 + $0x2] ss:$9 sm:$0xff] %v2171_v23  ;;  %v7123_v23 = vld [vmem:[#allocation13_spill] sm:$0xff] }
 0x1b3   :  { %2474 = vst [vmem:[#allocation1 + $0x3] ss:$9 sm:$0xff] %v2174_v7  ;;  %4650 = vmatmul.msk.bf16.gmra.mxu0 %vm1675_vm7, %v7123_v23  ;;  %v2113_v7 = vrot.slane %v4702_v51, 3 }
 0x1b4   :  { %2476 = vst [vmem:[#allocation1 + $0x4] ss:$9 sm:$0xff] %v2177_v26  ;;  %v2238_v26 = vsel %vm147_vm2, %v4700_v41, %v2111_v38 }
 0x1b5   :  { %2478 = vst [vmem:[#allocation1 + $0x5] ss:$9 sm:$0xff] %v2180_v21  ;;  %v2112_v21 = vrot.slane %v4701_v46, 3  ;;  %v2240_v47 = vrot.slane %v2238_v26, 3  ;;  %v2247_v28 = vsel %vm139_vm0, %v4702_v51, %v2113_v7  ;;  %v2250_v29 = vsel %vm143_vm1, %v4702_v51, %v2113_v7 }
 0x1b6   :  { %2479 = vst [vmem:[#allocation1 + $0x6] ss:$9 sm:$0xff] %v2183_v22  ;;  %v2237_v22 = vrot.slane %v2235_v53, 2  ;;  %v2253_v8 = vsel %vm147_vm2, %v4702_v51, %v2113_v7  ;;  %v2246_v35 = vsel %vm135_vm3, %v4702_v51, %v2113_v7  ;;  %v2249_v12 = vrot.slane %v2247_v28, 1  ;;  %4681 = vmatmul.msk.bf16.gmra.mxu1 %vm1675_vm7, %v5891_v31  ;;  %v4712_v28 = vld [vmem:[%s6984_s0 + $0x70] sm:$0xf] }
 0x1b7   :  { %2480 = vst [vmem:[#allocation1 + $0x7] ss:$9 sm:$0xff] %v2186_v24  ;;  %v4703_v24 = vld [vmem:[%s6984_s0 + $0x44] sm:$0x1]  ;;  %v2243_v32 = vsel %vm135_vm3, %v4701_v46, %v2112_v21 }
 0x1b8   :  { %v2114_v11 = vrot.slane %v4703_v24, 3 }
 0x1ba   :  { %v2258_v5 = vsel %vm135_vm3, %v4703_v24, %v2114_v11 }
 0x1be   :  { %v2481_v27 = vld [vmem:[#allocation1] sm:$0xff] }
 0x1bf   :  { %2483 = vst [vmem:[#allocation1] ss:$9 sm:$0xff] %v2189_v30  ;;  %v2252_v30 = vrot.slane %v2250_v29, 2  ;;  %v4711_v29 = vld [vmem:[%s6984_s0 + $0x6c] sm:$0x1] }
 0x1c0   :  { %2485 = vst [vmem:[#allocation1 + $0x1] ss:$9 sm:$0xff] %v2192_v34  ;;  %4753 = vmatmul.msk.bf16.gmra.mxu2 %vm1675_vm7, %v2481_v27  ;;  %v4704_v34 = vld [vmem:[%s6984_s0 + $0x48] sm:$0xf]  ;;  %v4706_v27 = vld [vmem:[%s6984_s0 + $0x50] sm:$0xf] }
 0x1c1   :  { %2487 = vst [vmem:[#allocation1 + $0x2] ss:$9 sm:$0xff] %v2195_v63  ;;  %v2255_v63 = vrot.slane %v2253_v8, 3  ;;  %v2115_v59 = vrot.slane %v4704_v34, 3  ;;  %v2123_v8 = vrot.slane %v4712_v28, 3 }
 0x1c2   :  { %2488 = vst [vmem:[#allocation1 + $0x3] ss:$9 sm:$0xff] %v2198_v9  ;;  %v7124_v9 = vld [vmem:[#allocation20_spill] sm:$0xff] }
 0x1c3   :  { %2489 = vst [vmem:[#allocation1 + $0x4] ss:$9 sm:$0xff] %v2201_v60  ;;  %4651 = vmatmul.msk.bf16.gmra.mxu0 %vm1675_vm7, %v7124_v9  ;;  %v2262_v60 = vsel %vm139_vm0, %v4704_v34, %v2115_v59  ;;  %v2268_v43 = vsel %vm147_vm2, %v4704_v34, %v2115_v59  ;;  %v2261_v25 = vsel %vm135_vm3, %v4704_v34, %v2115_v59 }
 0x1c4   :  { %2491 = vst [vmem:[#allocation1 + $0x5] ss:$9 sm:$0xff] %v2204_v13  ;;  %v2117_v13 = vrot.slane %v4706_v27, 3  ;;  %v2264_v50 = vrot.slane %v2262_v60, 1  ;;  %v2270_v41 = vrot.slane %v2268_v43, 3  ;;  %v2321_v60 = vsel %vm135_vm3, %v4712_v28, %v2123_v8 }
 0x1c5   :  { %2493 = vst [vmem:[#allocation1 + $0x6] ss:$9 sm:$0xff] %v2207_v18  ;;  %v2265_v18 = vsel %vm143_vm1, %v4704_v34, %v2115_v59  ;;  %v2325_v59 = vsel %vm143_vm1, %v4712_v28, %v2123_v8 }
 0x1c6   :  { %2495 = vst [vmem:[#allocation1 + $0x7] ss:$9 sm:$0xff] %v2210_v2  ;;  %v2116_v2 = vrot.slane %v4705_v55, 3  ;;  %v2267_v36 = vrot.slane %v2265_v18, 2  ;;  %v2277_v16 = vsel %vm139_vm0, %v4706_v27, %v2117_v13  ;;  %v2280_v37 = vsel %vm143_vm1, %v4706_v27, %v2117_v13  ;;  %4682 = vmatmul.msk.bf16.gmra.mxu1 %vm1675_vm7, %v5908_v14  ;;  %v4714_v14 = vld [vmem:[%s6984_s0 + $0x78] sm:$0xf] }
 0x1c7   :  { %v2276_v4 = vsel %vm135_vm3, %v4706_v27, %v2117_v13  ;;  %v2279_v44 = vrot.slane %v2277_v16, 1  ;;  %v2327_v18 = vrot.slane %v2325_v59, 2 }
 0x1c8   :  { %v2273_v38 = vsel %vm135_vm3, %v4705_v55, %v2116_v2  ;;  %v2328_v55 = vsel %vm147_vm2, %v4712_v28, %v2123_v8  ;;  %v4713_v2 = vld [vmem:[%s6984_s0 + $0x74] sm:$0x1] }
 0x1c9   :  { %v2330_v43 = vrot.slane %v2328_v55, 3 }
 0x1cd   :  { %v2496_v57 = vld [vmem:[#allocation1] sm:$0xff] }
 0x1ce   :  { %2497 = vst [vmem:[#allocation1] ss:$9 sm:$0xff] %v2213_v40  ;;  %v2282_v40 = vrot.slane %v2280_v37, 2 }
 0x1cf   :  { %2498 = vst [vmem:[#allocation1 + $0x1] ss:$9 sm:$0xff] %v2216_v1  ;;  %v2119_v1 = vrot.slane %v4708_v56, 3 }
 0x1d0   :  { %2500 = vst [vmem:[#allocation1 + $0x2] ss:$9 sm:$0xff] %v2219_v52  ;;  %4754 = vmatmul.msk.bf16.gmra.mxu2 %vm1675_vm7, %v2496_v57  ;;  %v2283_v52 = vsel %vm147_vm2, %v4706_v27, %v2117_v13  ;;  %v7125_v57 = vld [vmem:[#allocation27_spill] sm:$0xff] }
 0x1d1   :  { %2502 = vst [vmem:[#allocation1 + $0x3] ss:$9 sm:$0xff] %v2222_v54  ;;  %v2118_v54 = vrot.slane %v4707_v58, 3  ;;  %v2285_v42 = vrot.slane %v2283_v52, 3  ;;  %v2298_v46 = vsel %vm147_vm2, %v4708_v56, %v2119_v1  ;;  %v2291_v31 = vsel %vm135_vm3, %v4708_v56, %v2119_v1 }
 0x1d2   :  { %2504 = vst [vmem:[#allocation1 + $0x4] ss:$9 sm:$0xff] %v2225_v0  ;;  %v4709_v0 = vld [vmem:[%s6984_s0 + $0x64] sm:$0x1] }
 0x1d3   :  { %2505 = vst [vmem:[#allocation1 + $0x5] ss:$9 sm:$0xff] %v2228_v20  ;;  %4652 = vmatmul.msk.bf16.gmra.mxu0 %vm1675_vm7, %v7125_v57  ;;  %v2292_v20 = vsel %vm139_vm0, %v4708_v56, %v2119_v1  ;;  %v2288_v51 = vsel %vm135_vm3, %v4707_v58, %v2118_v54  ;;  %v2120_v23 = vrot.slane %v4709_v0, 3 }
 0x1d4   :  { %2506 = vst [vmem:[#allocation1 + $0x6] ss:$9 sm:$0xff] %v2231_v17  ;;  %v4710_v17 = vld [vmem:[%s6984_s0 + $0x68] sm:$0xf]  ;;  %v2294_v7 = vrot.slane %v2292_v20, 1 }
 0x1d5   :  { %2508 = vst [vmem:[#allocation1 + $0x7] ss:$9 sm:$0xff] %v2234_v39  ;;  %v2295_v39 = vsel %vm143_vm1, %v4708_v56, %v2119_v1  ;;  %v2121_v26 = vrot.slane %v4710_v17, 3  ;;  %v2303_v24 = vsel %vm135_vm3, %v4709_v0, %v2120_v23 }
 0x1d6   :  { %v2297_v21 = vrot.slane %v2295_v39, 2  ;;  %4683 = vmatmul.msk.bf16.gmra.mxu1 %vm1675_vm7, %v5924_v6  ;;  %v4718_v6 = vld [vmem:[%s6984_s0 + $0x88] sm:$0xf] }
 0x1d7   :  { %v2313_v11 = vsel %vm147_vm2, %v4710_v17, %v2121_v26  ;;  %v2129_v39 = vrot.slane %v4718_v6, 3 }
 0x1dc   :  { %v2509_v61 = vld [vmem:[#allocation1] sm:$0xff] }
 0x1dd   :  { %2511 = vst [vmem:[#allocation1] ss:$9 sm:$0xff] %v2237_v22  ;;  %v2300_v22 = vrot.slane %v2298_v46, 3 }
 0x1de   :  { %2513 = vst [vmem:[#allocation1 + $0x1] ss:$9 sm:$0xff] %v2240_v47  ;;  %v2306_v47 = vsel %vm135_vm3, %v4710_v17, %v2121_v26 }
 0x1df   :  { %2514 = vst [vmem:[#allocation1 + $0x2] ss:$9 sm:$0xff] %v2243_v32  ;;  %v2307_v32 = vsel %vm139_vm0, %v4710_v17, %v2121_v26 }
 0x1e0   :  { %2515 = vst [vmem:[#allocation1 + $0x3] ss:$9 sm:$0xff] %v2246_v35  ;;  %4755 = vmatmul.msk.bf16.gmra.mxu2 %vm1675_vm7, %v2509_v61  ;;  %v2310_v61 = vsel %vm143_vm1, %v4710_v17, %v2121_v26  ;;  %v7126_v35 = vld [vmem:[#allocation33_spill] sm:$0xff]  ;;  %v2367_v26 = vsel %vm139_vm0, %v4718_v6, %v2129_v39 }
 0x1e1   :  { %2517 = vst [vmem:[#allocation1 + $0x4] ss:$9 sm:$0xff] %v2249_v12  ;;  %v2122_v12 = vrot.slane %v4711_v29, 3  ;;  %v2312_v34 = vrot.slane %v2310_v61, 2  ;;  %v4717_v17 = vld [vmem:[%s6984_s0 + $0x84] sm:$0x1] }
 0x1e2   :  { %2519 = vst [vmem:[#allocation1 + $0x5] ss:$9 sm:$0xff] %v2252_v30  ;;  %v2309_v30 = vrot.slane %v2307_v32, 1  ;;  %v2128_v23 = vrot.slane %v4717_v17, 3  ;;  %v2366_v32 = vsel %vm135_vm3, %v4718_v6, %v2129_v39 }
 0x1e3   :  { %2521 = vst [vmem:[#allocation1 + $0x6] ss:$9 sm:$0xff] %v2255_v63  ;;  %4653 = vmatmul.msk.bf16.gmra.mxu0 %vm1675_vm7, %v7126_v35  ;;  %v2315_v63 = vrot.slane %v2313_v11, 3  ;;  %v2318_v9 = vsel %vm135_vm3, %v4711_v29, %v2122_v12  ;;  %v4720_v11 = vld [vmem:[%s6984_s0 + $0x90] sm:$0xf] }
 0x1e4   :  { %2522 = vst [vmem:[#allocation1 + $0x7] ss:$9 sm:$0xff] %v2258_v5  ;;  %v2322_v5 = vsel %vm139_vm0, %v4712_v28, %v2123_v8  ;;  %v2369_v8 = vrot.slane %v2367_v26, 1  ;;  %v2131_v12 = vrot.slane %v4720_v11, 3 }
 0x1e5   :  { %v2324_v13 = vrot.slane %v2322_v5, 1 }
 0x1e6   :  { %4684 = vmatmul.msk.bf16.gmra.mxu1 %vm1675_vm7, %v5936_v15  ;;  %v2385_v59 = vsel %vm143_vm1, %v4720_v11, %v2131_v12  ;;  %v2381_v55 = vsel %vm135_vm3, %v4720_v11, %v2131_v12 }
 0x1eb   :  { %v2523_v33 = vld [vmem:[#allocation1] sm:$0xff] }
 0x1ec   :  { %2524 = vst [vmem:[#allocation1] ss:$9 sm:$0xff] %v2261_v25  ;;  %v2125_v25 = vrot.slane %v4714_v14, 3 }
 0x1ed   :  { %2526 = vst [vmem:[#allocation1 + $0x1] ss:$9 sm:$0xff] %v2264_v50  ;;  %v4716_v50 = vld [vmem:[%s6984_s0 + $0x80] sm:$0xf] }
 0x1ee   :  { %2528 = vst [vmem:[#allocation1 + $0x2] ss:$9 sm:$0xff] %v2267_v36  ;;  %v2124_v36 = vrot.slane %v4713_v2, 3  ;;  %v2337_v16 = vsel %vm139_vm0, %v4714_v14, %v2125_v25  ;;  %v2340_v37 = vsel %vm143_vm1, %v4714_v14, %v2125_v25  ;;  %v2336_v56 = vsel %vm135_vm3, %v4714_v14, %v2125_v25 }
 0x1ef   :  { %2530 = vst [vmem:[#allocation1 + $0x3] ss:$9 sm:$0xff] %v2270_v41  ;;  %v4715_v41 = vld [vmem:[%s6984_s0 + $0x7c] sm:$0x1]  ;;  %v2339_v58 = vrot.slane %v2337_v16, 1  ;;  %v2342_v1 = vrot.slane %v2340_v37, 2 }
 0x1f0   :  { %2531 = vst [vmem:[#allocation1 + $0x4] ss:$9 sm:$0xff] %v2273_v38  ;;  %4756 = vmatmul.msk.bf16.gmra.mxu2 %vm1675_vm7, %v2523_v33  ;;  %v2127_v33 = vrot.slane %v4716_v50, 3  ;;  %v7127_v38 = vld [vmem:[#allocation39_spill] sm:$0xff] }
 0x1f1   :  { %2532 = vst [vmem:[#allocation1 + $0x5] ss:$9 sm:$0xff] %v2276_v4  ;;  %v2333_v4 = vsel %vm135_vm3, %v4713_v2, %v2124_v36 }
 0x1f2   :  { %2534 = vst [vmem:[#allocation1 + $0x6] ss:$9 sm:$0xff] %v2279_v44  ;;  %v2343_v44 = vsel %vm147_vm2, %v4714_v14, %v2125_v25  ;;  %v2352_v57 = vsel %vm139_vm0, %v4716_v50, %v2127_v33  ;;  %v2358_v46 = vsel %vm147_vm2, %v4716_v50, %v2127_v33 }
 0x1f3   :  { %2536 = vst [vmem:[#allocation1 + $0x7] ss:$9 sm:$0xff] %v2282_v40  ;;  %4654 = vmatmul.msk.bf16.gmra.mxu0 %vm1675_vm7, %v7127_v38  ;;  %v2126_v40 = vrot.slane %v4715_v41, 3  ;;  %v2345_v54 = vrot.slane %v2343_v44, 3  ;;  %v2354_v20 = vrot.slane %v2352_v57, 1 }
 0x1f4   :  { %v4725_v38 = vld [vmem:[%s6984_s0 + $0xa4] sm:$0x1] }
 0x1f5   :  { %v2348_v0 = vsel %vm135_vm3, %v4715_v41, %v2126_v40  ;;  %v4726_v40 = vld [vmem:[%s6984_s0 + $0xa8] sm:$0xf] }
 0x1f6   :  { %4685 = vmatmul.msk.bf16.gmra.mxu1 %vm1675_vm7, %v5953_v19  ;;  %v4723_v19 = vld [vmem:[%s6984_s0 + $0x9c] sm:$0x1] }
 0x1f7   :  { %v2134_v37 = vrot.slane %v4723_v19, 3 }
 0x1fa   :  { %v2537_v53 = vld [vmem:[#allocation1] sm:$0xff] }
 0x1fb   :  { %2539 = vst [vmem:[#allocation1] ss:$9 sm:$0xff] %v2285_v42  ;;  %v2351_v42 = vsel %vm135_vm3, %v4716_v50, %v2127_v33 }
 0x1fc   :  { %2540 = vst [vmem:[#allocation1 + $0x1] ss:$9 sm:$0xff] %v2288_v51  ;;  %v2355_v51 = vsel %vm143_vm1, %v4716_v50, %v2127_v33 }
 0x1fd   :  { %2541 = vst [vmem:[#allocation1 + $0x2] ss:$9 sm:$0xff] %v2291_v31  ;;  %v2357_v31 = vrot.slane %v2355_v51, 2 }
 0x1fe   :  { %2543 = vst [vmem:[#allocation1 + $0x3] ss:$9 sm:$0xff] %v2294_v7  ;;  %v4719_v7 = vld [vmem:[%s6984_s0 + $0x8c] sm:$0x1] }
 0x1ff   :  { %2545 = vst [vmem:[#allocation1 + $0x4] ss:$9 sm:$0xff] %v2297_v21  ;;  %v7128_v21 = vld [vmem:[#allocation48_spill] sm:$0xff]  ;;  %v2130_v29 = vrot.slane %v4719_v7, 3 }
 0x200   :  { %2547 = vst [vmem:[#allocation1 + $0x5] ss:$9 sm:$0xff] %v2300_v22  ;;  %4757 = vmatmul.msk.bf16.gmra.mxu2 %vm1675_vm7, %v2537_v53  ;;  %v2360_v53 = vrot.slane %v2358_v46, 3  ;;  %v2370_v22 = vsel %vm143_vm1, %v4718_v6, %v2129_v39  ;;  %v4766_v46 = vld [vmem:[%s6984_s0 + $0xc] sm:$0x3] }
 0x201   :  { %2548 = vst [vmem:[#allocation1 + $0x6] ss:$9 sm:$0xff] %v2303_v24  ;;  %v2363_v24 = vsel %vm135_vm3, %v4717_v17, %v2128_v23  ;;  %v2372_v61 = vrot.slane %v2370_v22, 2  ;;  %v2378_v15 = vsel %vm135_vm3, %v4719_v7, %v2130_v29  ;;  %v2857_v22 = vrot.slane %v4766_v46, 3 }
 0x202   :  { %2549 = vst [vmem:[#allocation1 + $0x7] ss:$9 sm:$0xff] %v2306_v47  ;;  %v2373_v47 = vsel %vm147_vm2, %v4718_v6, %v2129_v39 }
 0x203   :  { %4655 = vmatmul.msk.bf16.gmra.mxu0 %vm1675_vm7, %v7128_v21  ;;  %v2375_v35 = vrot.slane %v2373_v47, 3 }
 0x206   :  { %4686 = vmatmul.msk.bf16.gmra.mxu1 %vm1675_vm7, %v5980_v10  ;;  %v4727_v10 = vld [vmem:[%s6984_s0 + $0xac] sm:$0x1] }
 0x207   :  { %v2138_v26 = vrot.slane %v4727_v10, 3 }
 0x209   :  { %v2550_v27 = vld [vmem:[#allocation1] sm:$0xff] }
 0x20a   :  { %2552 = vst [vmem:[#allocation1] ss:$9 sm:$0xff] %v2309_v30  ;;  %v4722_v30 = vld [vmem:[%s6984_s0 + $0x98] sm:$0xf] }
 0x20b   :  { %2554 = vst [vmem:[#allocation1 + $0x1] ss:$9 sm:$0xff] %v2312_v34  ;;  %v4721_v34 = vld [vmem:[%s6984_s0 + $0x94] sm:$0x1]  ;;  %v2133_v5 = vrot.slane %v4722_v30, 3 }
 0x20c   :  { %2556 = vst [vmem:[#allocation1 + $0x2] ss:$9 sm:$0xff] %v2315_v63  ;;  %v2382_v63 = vsel %vm139_vm0, %v4720_v11, %v2131_v12 }
 0x20d   :  { %2557 = vst [vmem:[#allocation1 + $0x3] ss:$9 sm:$0xff] %v2318_v9  ;;  %v2132_v9 = vrot.slane %v4721_v34, 3  ;;  %v2397_v14 = vsel %vm139_vm0, %v4722_v30, %v2133_v5  ;;  %v2400_v2 = vsel %vm143_vm1, %v4722_v30, %v2133_v5  ;;  %v2396_v50 = vsel %vm135_vm3, %v4722_v30, %v2133_v5 }
 0x20e   :  { %2558 = vst [vmem:[#allocation1 + $0x4] ss:$9 sm:$0xff] %v2321_v60  ;;  %v2384_v60 = vrot.slane %v2382_v63, 1  ;;  %v2399_v36 = vrot.slane %v2397_v14, 1  ;;  %v2402_v41 = vrot.slane %v2400_v2, 2  ;;  %v2403_v33 = vsel %vm147_vm2, %v4722_v30, %v2133_v5 }
 0x20f   :  { %2560 = vst [vmem:[#allocation1 + $0x5] ss:$9 sm:$0xff] %v2324_v13  ;;  %v2387_v13 = vrot.slane %v2385_v59, 2  ;;  %v2393_v25 = vsel %vm135_vm3, %v4721_v34, %v2132_v9 }
 0x210   :  { %2562 = vst [vmem:[#allocation1 + $0x6] ss:$9 sm:$0xff] %v2327_v18  ;;  %4758 = vmatmul.msk.bf16.gmra.mxu2 %vm1675_vm7, %v2550_v27  ;;  %v2388_v27 = vsel %vm147_vm2, %v4720_v11, %v2131_v12  ;;  %v2438_v11 = vsel %vm135_vm3, %v4727_v10, %v2138_v26 }
 0x211   :  { %2564 = vst [vmem:[#allocation1 + $0x7] ss:$9 sm:$0xff] %v2330_v43  ;;  %v2390_v18 = vrot.slane %v2388_v27, 3  ;;  %v2910_v27 = vsel %vm135_vm3, %v4766_v46, %v2857_v22 }
 0x213   :  { %4656 = vmatmul.msk.bf16.gmra.mxu0 %vm1675_vm7, %v5748_v45  ;;  %v4724_v45 = vld [vmem:[%s6984_s0 + $0xa0] sm:$0xf] }
 0x214   :  { %v2135_v16 = vrot.slane %v4724_v45, 3 }
 0x216   :  { %v2412_v44 = vsel %vm139_vm0, %v4724_v45, %v2135_v16 }
 0x217   :  { %v2414_v57 = vrot.slane %v2412_v44, 1 }
 0x218   :  { %v2565_v52 = vld [vmem:[#allocation1] sm:$0xff] }
 0x219   :  { %2566 = vst [vmem:[#allocation1] ss:$9 sm:$0xff] %v2333_v4  ;;  %v2405_v4 = vrot.slane %v2403_v33, 3 }
 0x21a   :  { %2567 = vst [vmem:[#allocation1 + $0x1] ss:$9 sm:$0xff] %v2336_v56  ;;  %v2415_v56 = vsel %vm143_vm1, %v4724_v45, %v2135_v16 }
 0x21b   :  { %2569 = vst [vmem:[#allocation1 + $0x2] ss:$9 sm:$0xff] %v2339_v58  ;;  %v2408_v58 = vsel %vm135_vm3, %v4723_v19, %v2134_v37  ;;  %v3284_v19 = vshll.u32 %v2910_v27, 16  ;;  %v3287_v37 = vshrl.u32 %v2910_v27, 16 }
 0x21c   :  { %2571 = vst [vmem:[#allocation1 + $0x3] ss:$9 sm:$0xff] %v2342_v1  ;;  %v2418_v1 = vsel %vm147_vm2, %v4724_v45, %v2135_v16 }
 0x21d   :  { %2573 = vst [vmem:[#allocation1 + $0x4] ss:$9 sm:$0xff] %v2345_v54  ;;  %v2411_v54 = vsel %vm135_vm3, %v4724_v45, %v2135_v16  ;;  %v2420_v6 = vrot.slane %v2418_v1, 3  ;;  %v4769_v16 = vld [vmem:[%s6984_s0 + $0x18] sm:$0xf] }
 0x21e   :  { %2574 = vst [vmem:[#allocation1 + $0x5] ss:$9 sm:$0xff] %v2348_v0 }
 0x21f   :  { %2575 = vst [vmem:[#allocation1 + $0x6] ss:$9 sm:$0xff] %v2351_v42  ;;  %v2137_v42 = vrot.slane %v4726_v40, 3 }
 0x220   :  { %2577 = vst [vmem:[#allocation1 + $0x7] ss:$9 sm:$0xff] %v2354_v20  ;;  %4759 = vmatmul.msk.bf16.gmra.mxu2 %vm1675_vm7, %v2565_v52  ;;  %v2136_v52 = vrot.slane %v4725_v38, 3  ;;  %v2417_v20 = vrot.slane %v2415_v56, 2 }
 0x221   :  { %v2426_v39 = vsel %vm135_vm3, %v4726_v40, %v2137_v42  ;;  %v2427_v51 = vsel %vm139_vm0, %v4726_v40, %v2137_v42  ;;  %v2433_v7 = vsel %vm147_vm2, %v4726_v40, %v2137_v42 }
 0x222   :  { %v2423_v17 = vsel %vm135_vm3, %v4725_v38, %v2136_v52  ;;  %v2429_v21 = vrot.slane %v2427_v51, 1 }
 0x223   :  { %4657 = vmatmul.msk.bf16.gmra.mxu0 %vm1675_vm7, %v5781_v48  ;;  %v4765_v48 = vld [vmem:[%s6984_s0 + $0x8] sm:$0xf] }
 0x224   :  { %v2856_v23 = vrot.slane %v4765_v48, 3 }
 0x226   :  { %v2899_v47 = vsel %vm139_vm0, %v4765_v48, %v2856_v23  ;;  %v2898_v12 = vsel %vm135_vm3, %v4765_v48, %v2856_v23 }
 0x227   :  { %v2578_v28 = vld [vmem:[#allocation1] sm:$0xff] }
 0x228   :  { %2580 = vst [vmem:[#allocation1] ss:$9 sm:$0xff] %v2357_v31  ;;  %v2430_v31 = vsel %vm143_vm1, %v4726_v40, %v2137_v42 }
 0x229   :  { %2582 = vst [vmem:[#allocation1 + $0x1] ss:$9 sm:$0xff] %v2360_v53  ;;  %v4767_v53 = vld [vmem:[%s6984_s0 + $0x10] sm:$0xf] }
 0x22a   :  { %2583 = vst [vmem:[#allocation1 + $0x2] ss:$9 sm:$0xff] %v2363_v24  ;;  %v2432_v24 = vrot.slane %v2430_v31, 2  ;;  %v2858_v29 = vrot.slane %v4767_v53, 3 }
 0x22b   :  { %2584 = vst [vmem:[#allocation1 + $0x3] ss:$9 sm:$0xff] %v2366_v32  ;;  %v2902_v32 = vsel %vm143_vm1, %v4765_v48, %v2856_v23 }
 0x22c   :  { %2586 = vst [vmem:[#allocation1 + $0x4] ss:$9 sm:$0xff] %v2369_v8  ;;  %v2904_v30 = vrot.slane %v2902_v32, 2  ;;  %v2917_v63 = vsel %vm139_vm0, %v4767_v53, %v2858_v29  ;;  %v2920_v59 = vsel %vm143_vm1, %v4767_v53, %v2858_v29  ;;  %v2923_v9 = vsel %vm147_vm2, %v4767_v53, %v2858_v29 }
 0x22d   :  { %2588 = vst [vmem:[#allocation1 + $0x5] ss:$9 sm:$0xff] %v2372_v61  ;;  %v2905_v61 = vsel %vm147_vm2, %v4765_v48, %v2856_v23  ;;  %v2922_v2 = vrot.slane %v2920_v59, 2 }
 0x22e   :  { %2590 = vst [vmem:[#allocation1 + $0x6] ss:$9 sm:$0xff] %v2375_v35  ;;  %v2901_v35 = vrot.slane %v2899_v47, 1  ;;  %v2907_v34 = vrot.slane %v2905_v61, 3  ;;  %v3269_v14 = vshll.u32 %v2904_v30, 16 }
 0x22f   :  { %2591 = vst [vmem:[#allocation1 + $0x7] ss:$9 sm:$0xff] %v2378_v15  ;;  %v2911_v15 = vsel %vm139_vm0, %v4766_v46, %v2857_v22  ;;  %v3311_v42 = vshrl.u32 %v2922_v2, 16 }
 0x230   :  { %4760 = vmatmul.msk.bf16.gmra.mxu2 %vm1675_vm7, %v2578_v28  ;;  %v2435_v28 = vrot.slane %v2433_v7, 3  ;;  %v2913_v5 = vrot.slane %v2911_v15, 1  ;;  %v3280_v45 = vshrl.u32 %v2907_v34, 16 }
 0x232   :  { %v3292_v38 = vshll.u32 %v2913_v5, 16 }
 0x236   :  { %v2592_v43 = vld [vmem:[#allocation1] sm:$0xff] }
 0x237   :  { %2593 = vst [vmem:[#allocation1] ss:$9 sm:$0xff] %v2381_v55  ;;  %v3256_v55 = vshrl.u32 %v2898_v12, 16 }
 0x238   :  { %2595 = vst [vmem:[#allocation1 + $0x1] ss:$9 sm:$0xff] %v2384_v60  ;;  %v3261_v60 = vshll.u32 %v2901_v35, 16 }
 0x239   :  { %2597 = vst [vmem:[#allocation1 + $0x2] ss:$9 sm:$0xff] %v2387_v13  ;;  %v2919_v13 = vrot.slane %v2917_v63, 1 }
 0x23a   :  { %2599 = vst [vmem:[#allocation1 + $0x3] ss:$9 sm:$0xff] %v2390_v18  ;;  %v3264_v18 = vshrl.u32 %v2901_v35, 16  ;;  %v3263_v33 = vsel %vm5065_vm6, %v3256_v55, %v3261_v60 }
 0x23b   :  { %2600 = vst [vmem:[#allocation1 + $0x4] ss:$9 sm:$0xff] %v2393_v25  ;;  %v3272_v25 = vshrl.u32 %v2904_v30, 16  ;;  %v3300_v40 = vshll.u32 %v2919_v13, 16  ;;  %v3303_v52 = vshrl.u32 %v2919_v13, 16 }
 0x23c   :  { %2601 = vst [vmem:[#allocation1 + $0x5] ss:$9 sm:$0xff] %v2396_v50  ;;  %v3277_v50 = vshll.u32 %v2907_v34, 16 }
 0x23d   :  { %2603 = vst [vmem:[#allocation1 + $0x6] ss:$9 sm:$0xff] %v2399_v36  ;;  %v4768_v36 = vld [vmem:[%s6984_s0 + $0x14] sm:$0x3] }
 0x23e   :  { %2605 = vst [vmem:[#allocation1 + $0x7] ss:$9 sm:$0xff] %v2402_v41  ;;  %v2925_v41 = vrot.slane %v2923_v9, 3  ;;  %v2859_v56 = vrot.slane %v4768_v36, 3  ;;  %v3279_v1 = vsel %vm5065_vm6, %v3272_v25, %v3277_v50  ;;  %v4773_v25 = vld [vmem:[%s6984_s0 + $0x28] sm:$0xf] }
 0x240   :  { %4761 = vmatmul.msk.bf16.gmra.mxu2 %vm1675_vm7, %v2592_v43  ;;  %v2916_v43 = vsel %vm135_vm3, %v4767_v53, %v2858_v29  ;;  %v2929_v10 = vsel %vm139_vm0, %v4768_v36, %v2859_v56  ;;  %v2928_v26 = vsel %vm135_vm3, %v4768_v36, %v2859_v56  ;;  %v3319_v61 = vshrl.u32 %v2925_v41, 16 }
 0x241   :  { %v3295_v44 = vshrl.u32 %v2916_v43, 16  ;;  %v3326_v35 = vshrl.u32 %v2928_v26, 16 }
 0x243   :  { %v3302_v48 = vsel %vm5065_vm6, %v3295_v44, %v3300_v40 }
 0x245   :  { %v2606_v0 = vld [vmem:[#allocation1] sm:$0xff] }
 0x246   :  { %2608 = vst [vmem:[#allocation1] ss:$9 sm:$0xff] %v2405_v4  ;;  %v3271_v4 = vsel %vm5065_vm6, %v3264_v18, %v3269_v14  ;;  %v4772_v18 = vld [vmem:[%s6984_s0 + $0x24] sm:$0x3] }
 0x247   :  { %2609 = vst [vmem:[#allocation1 + $0x1] ss:$9 sm:$0xff] %v2408_v58 }
 0x248   :  { %2610 = vst [vmem:[#allocation1 + $0x2] ss:$9 sm:$0xff] %v2411_v54  ;;  %v3308_v54 = vshll.u32 %v2922_v2, 16 }
 0x249   :  { %2612 = vst [vmem:[#allocation1 + $0x3] ss:$9 sm:$0xff] %v2414_v57  ;;  %v2860_v57 = vrot.slane %v4769_v16, 3 }
 0x24a   :  { %2614 = vst [vmem:[#allocation1 + $0x4] ss:$9 sm:$0xff] %v2417_v20  ;;  %v3316_v20 = vshll.u32 %v2925_v41, 16  ;;  %v3310_v51 = vsel %vm5065_vm6, %v3303_v52, %v3308_v54 }
 0x24b   :  { %2616 = vst [vmem:[#allocation1 + $0x5] ss:$9 sm:$0xff] %v2420_v6  ;;  %v4770_v6 = vld [vmem:[%s6984_s0 + $0x1c] sm:$0x3]  ;;  %v2935_v23 = vsel %vm139_vm0, %v4769_v16, %v2860_v57  ;;  %v2938_v53 = vsel %vm143_vm1, %v4769_v16, %v2860_v57  ;;  %v2941_v22 = vsel %vm147_vm2, %v4769_v16, %v2860_v57  ;;  %v2934_v47 = vsel %vm135_vm3, %v4769_v16, %v2860_v57 }
 0x24c   :  { %2617 = vst [vmem:[#allocation1 + $0x6] ss:$9 sm:$0xff] %v2423_v17  ;;  %v3294_v17 = vsel %vm5065_vm6, %v3287_v37, %v3292_v38  ;;  %v2861_v46 = vrot.slane %v4770_v6, 3  ;;  %v3318_v31 = vsel %vm5065_vm6, %v3311_v42, %v3316_v20  ;;  %v2943_v32 = vrot.slane %v2941_v22, 3 }
 0x24d   :  { %2618 = vst [vmem:[#allocation1 + $0x7] ss:$9 sm:$0xff] %v2426_v39  ;;  %v4771_v39 = vld [vmem:[%s6984_s0 + $0x20] sm:$0xf]  ;;  %v3334_v34 = vshrl.u32 %v2934_v47, 16  ;;  %v2863_v37 = vrot.slane %v4772_v18, 3 }
 0x24e   :  { %v2862_v7 = vrot.slane %v4771_v39, 3  ;;  %v2947_v29 = vsel %vm139_vm0, %v4770_v6, %v2861_v46  ;;  %v2946_v12 = vsel %vm135_vm3, %v4770_v6, %v2861_v46  ;;  %v3355_v13 = vshll.u32 %v2943_v32, 16  ;;  %v4775_v47 = vld [vmem:[%s6984_s0 + $0x30] sm:$0xf] }
 0x24f   :  { %v2949_v30 = vrot.slane %v2947_v29, 1  ;;  %v3358_v43 = vshrl.u32 %v2943_v32, 16  ;;  %v3362_v2 = vshll.u32 %v2946_v12, 16  ;;  %v3365_v41 = vshrl.u32 %v2946_v12, 16 }
 0x250   :  { %4762 = vmatmul.msk.bf16.gmra.mxu2 %vm1675_vm7, %v2606_v0  ;;  %v3286_v0 = vsel %vm5065_vm6, %v3280_v45, %v3284_v19  ;;  %v2952_v9 = vsel %vm135_vm3, %v4771_v39, %v2862_v7  ;;  %v2956_v44 = vsel %vm143_vm1, %v4771_v39, %v2862_v7  ;;  %v2959_v56 = vsel %vm147_vm2, %v4771_v39, %v2862_v7 }
 0x251   :  { %v3370_v45 = vshll.u32 %v2949_v30, 16  ;;  %v3373_v16 = vshrl.u32 %v2952_v9, 16  ;;  %v3364_v40 = vsel %vm5065_vm6, %v3358_v43, %v3362_v2  ;;  %v2958_v54 = vrot.slane %v2956_v44, 2 }
 0x252   :  { %v2965_v57 = vsel %vm139_vm0, %v4772_v18, %v2863_v37  ;;  %v2961_v42 = vrot.slane %v2959_v56, 3  ;;  %v2866_v30 = vrot.slane %v4775_v47, 3 }
 0x254   :  { %v2619_v8 = vld [vmem:[#allocation1] sm:$0xff]  ;;  %v3397_v22 = vshrl.u32 %v2961_v42, 16 }
 0x255   :  { %2621 = vst [vmem:[#allocation1] ss:$9 sm:$0xff] %v2429_v21  ;;  %v2931_v21 = vrot.slane %v2929_v10, 1 }
 0x256   :  { %2623 = vst [vmem:[#allocation1 + $0x1] ss:$9 sm:$0xff] %v2432_v24  ;;  %v2937_v24 = vrot.slane %v2935_v23, 1  ;;  %v3386_v23 = vshll.u32 %v2958_v54, 16 }
 0x257   :  { %2625 = vst [vmem:[#allocation1 + $0x2] ss:$9 sm:$0xff] %v2435_v28  ;;  %v2940_v28 = vrot.slane %v2938_v53, 2  ;;  %v3331_v15 = vshll.u32 %v2931_v21, 16  ;;  %v3389_v53 = vshrl.u32 %v2958_v54, 16 }
 0x258   :  { %2626 = vst [vmem:[#allocation1 + $0x3] ss:$9 sm:$0xff] %v2438_v11  ;;  %v3323_v11 = vshll.u32 %v2928_v26, 16  ;;  %v3339_v63 = vshll.u32 %v2937_v24, 16  ;;  %v3342_v59 = vshrl.u32 %v2937_v24, 16  ;;  %v3394_v26 = vshll.u32 %v2961_v42, 16 }
 0x259   :  { %v3347_v27 = vshll.u32 %v2940_v28, 16  ;;  %v3350_v60 = vshrl.u32 %v2940_v28, 16  ;;  %v3333_v14 = vsel %vm5065_vm6, %v3326_v35, %v3331_v15 }
 0x25a   :  { %v3325_v55 = vsel %vm5065_vm6, %v3319_v61, %v3323_v11  ;;  %v3341_v36 = vsel %vm5065_vm6, %v3334_v34, %v3339_v63  ;;  %v3396_v35 = vsel %vm5065_vm6, %v3389_v53, %v3394_v26  ;;  %v4779_v53 = vld [vmem:[%s6984_s0 + $0x40] sm:$0xf] }
 0x25b   :  { %v3349_v19 = vsel %vm5065_vm6, %v3342_v59, %v3347_v27  ;;  %v3357_v38 = vsel %vm5065_vm6, %v3350_v60, %v3355_v13  ;;  %v4776_v27 = vld [vmem:[%s6984_s0 + $0x34] sm:$0x3]  ;;  %v4777_v13 = vld [vmem:[%s6984_s0 + $0x38] sm:$0xf] }
 0x25c   :  { %v2867_v2 = vrot.slane %v4776_v27, 3 }
 0x25e   :  { %v3000_v54 = vsel %vm135_vm3, %v4776_v27, %v2867_v2 }
 0x25f   :  { %v6293_v58 = vld [vmem:[#allocation1] sm:$0xff] }
 0x260   :  { %4046 = vst [vmem:[#allocation1] ss:$9 sm:$0xff] %v3263_v33  ;;  %4763 = vmatmul.msk.bf16.gmra.mxu2 %vm1675_vm7, %v2619_v8  ;;  %v2953_v8 = vsel %vm139_vm0, %v4771_v39, %v2862_v7  ;;  %v2967_v39 = vrot.slane %v2965_v57, 1 }
 0x261   :  { %4049 = vst [vmem:[#allocation1 + $0x1] ss:$9 sm:$0xff] %v3271_v4  ;;  %v2955_v5 = vrot.slane %v2953_v8, 1  ;;  %v2864_v4 = vrot.slane %v4773_v25, 3 }
 0x262   :  { %4052 = vst [vmem:[#allocation1 + $0x2] ss:$9 sm:$0xff] %v3279_v1  ;;  %v3372_v1 = vsel %vm5065_vm6, %v3365_v41, %v3370_v45  ;;  %v3409_v29 = vshll.u32 %v2967_v39, 16  ;;  %v2992_v41 = vsel %vm143_vm1, %v4775_v47, %v2866_v30 }
 0x263   :  { %4055 = vst [vmem:[#allocation1 + $0x3] ss:$9 sm:$0xff] %v3286_v0  ;;  %v3378_v33 = vshll.u32 %v2955_v5, 16  ;;  %v4774_v0 = vld [vmem:[%s6984_s0 + $0x2c] sm:$0x3]  ;;  %v2971_v20 = vsel %vm139_vm0, %v4773_v25, %v2864_v4  ;;  %v2974_v6 = vsel %vm143_vm1, %v4773_v25, %v2864_v4  ;;  %v3381_v46 = vshrl.u32 %v2955_v5, 16 }
 0x264   :  { %4058 = vst [vmem:[#allocation1 + $0x4] ss:$9 sm:$0xff] %v3294_v17  ;;  %v2964_v17 = vsel %vm135_vm3, %v4772_v18, %v2863_v37  ;;  %v2865_v10 = vrot.slane %v4774_v0, 3  ;;  %v2976_v7 = vrot.slane %v2974_v6, 2  ;;  %v2988_v37 = vsel %vm135_vm3, %v4775_v47, %v2866_v30 }
 0x265   :  { %4061 = vst [vmem:[#allocation1 + $0x5] ss:$9 sm:$0xff] %v3302_v48  ;;  %v3380_v52 = vsel %vm5065_vm6, %v3373_v16, %v3378_v33  ;;  %v2977_v48 = vsel %vm147_vm2, %v4773_v25, %v2864_v4  ;;  %v3401_v24 = vshll.u32 %v2964_v17, 16  ;;  %v3404_v28 = vshrl.u32 %v2964_v17, 16 }
 0x266   :  { %4064 = vst [vmem:[#allocation1 + $0x6] ss:$9 sm:$0xff] %v3310_v51  ;;  %v2973_v51 = vrot.slane %v2971_v20, 1  ;;  %v2979_v21 = vrot.slane %v2977_v48, 3  ;;  %v2982_v32 = vsel %vm135_vm3, %v4774_v0, %v2865_v10  ;;  %v3388_v8 = vsel %vm5065_vm6, %v3381_v46, %v3386_v23  ;;  %v4778_v46 = vld [vmem:[%s6984_s0 + $0x3c] sm:$0x3] }
 0x267   :  { %4067 = vst [vmem:[#allocation1 + $0x7] ss:$9 sm:$0xff] %v3318_v31  ;;  %v2970_v31 = vsel %vm135_vm3, %v4773_v25, %v2864_v4  ;;  %v3425_v12 = vshll.u32 %v2976_v7, 16  ;;  %v3403_v63 = vsel %vm5065_vm6, %v3397_v22, %v3401_v24  ;;  %v3428_v5 = vshrl.u32 %v2976_v7, 16 }
 0x268   :  { %v3412_v61 = vshrl.u32 %v2970_v31, 16  ;;  %v3417_v11 = vshll.u32 %v2973_v51, 16  ;;  %v3420_v15 = vshrl.u32 %v2973_v51, 16  ;;  %v3433_v59 = vshll.u32 %v2979_v21, 16 }
 0x269   :  { %v3411_v9 = vsel %vm5065_vm6, %v3404_v28, %v3409_v29  ;;  %v3440_v60 = vshll.u32 %v2982_v32, 16  ;;  %v2989_v25 = vsel %vm139_vm0, %v4775_v47, %v2866_v30  ;;  %v2995_v16 = vsel %vm147_vm2, %v4775_v47, %v2866_v30 }
 0x26a   :  { %v3419_v18 = vsel %vm5065_vm6, %v3412_v61, %v3417_v11  ;;  %v3427_v43 = vsel %vm5065_vm6, %v3420_v15, %v3425_v12  ;;  %v2991_v33 = vrot.slane %v2989_v25, 1  ;;  %v3001_v4 = vsel %vm139_vm0, %v4776_v27, %v2867_v2  ;;  %v4780_v12 = vld [vmem:[%s6984_s0 + $0x44] sm:$0x3] }
 0x26b   :  { %v2997_v44 = vrot.slane %v2995_v16, 3  ;;  %v3003_v57 = vrot.slane %v3001_v4, 1  ;;  %v3479_v7 = vshll.u32 %v3000_v54, 16  ;;  %v2871_v27 = vrot.slane %v4780_v12, 3 }
 0x26c   :  { %v3456_v42 = vshll.u32 %v2991_v33, 16  ;;  %v3459_v6 = vshrl.u32 %v2991_v33, 16  ;;  %v4781_v33 = vld [vmem:[%s6984_s0 + $0x48] sm:$0xf] }
 0x26d   :  { %v3472_v51 = vshll.u32 %v2997_v44, 16  ;;  %v3475_v31 = vshrl.u32 %v2997_v44, 16  ;;  %v3487_v22 = vshll.u32 %v3003_v57, 16  ;;  %v3036_v4 = vsel %vm135_vm3, %v4780_v12, %v2871_v27 }
 0x26e   :  { %v4068_v50 = vld [vmem:[#allocation1] sm:$0xff]  ;;  %v2872_v57 = vrot.slane %v4781_v33, 3 }
 0x26f   :  { %4929 = vmatmul.msk.bf16.vlgmr.msra.gmra.mxu3 %vm1675_vm7, %v4068_v50  ;;  %4070 = vst [vmem:[#allocation1] ss:$9 sm:$0xff] %v3325_v55  ;;  %v3436_v55 = vshrl.u32 %v2979_v21, 16  ;;  %v3435_v50 = vsel %vm5065_vm6, %v3428_v5, %v3433_v59  ;;  %v3482_v21 = vshrl.u32 %v3000_v54, 16  ;;  %v3481_v15 = vsel %vm5065_vm6, %v3475_v31, %v3479_v7 }
 0x270   :  { %4072 = vst [vmem:[#allocation1 + $0x1] ss:$9 sm:$0xff] %v3333_v14  ;;  %v2983_v14 = vsel %vm139_vm0, %v4774_v0, %v2865_v10  ;;  %v3451_v0 = vshrl.u32 %v2988_v37, 16 }
 0x271   :  { %4074 = vst [vmem:[#allocation1 + $0x2] ss:$9 sm:$0xff] %v3341_v36  ;;  %v2868_v36 = vrot.slane %v4777_v13, 3  ;;  %v3442_v45 = vsel %vm5065_vm6, %v3436_v55, %v3440_v60 }
 0x272   :  { %4076 = vst [vmem:[#allocation1 + $0x3] ss:$9 sm:$0xff] %v3349_v19  ;;  %v2985_v19 = vrot.slane %v2983_v14, 1  ;;  %v3458_v26 = vsel %vm5065_vm6, %v3451_v0, %v3456_v42 }
 0x273   :  { %4078 = vst [vmem:[#allocation1 + $0x4] ss:$9 sm:$0xff] %v3357_v38  ;;  %v2994_v38 = vrot.slane %v2992_v41, 2  ;;  %v3010_v56 = vsel %vm143_vm1, %v4777_v13, %v2868_v36  ;;  %v3006_v39 = vsel %vm135_vm3, %v4777_v13, %v2868_v36  ;;  %v3013_v30 = vsel %vm147_vm2, %v4777_v13, %v2868_v36 }
 0x274   :  { %4080 = vst [vmem:[#allocation1 + $0x5] ss:$9 sm:$0xff] %v3364_v40  ;;  %v3007_v40 = vsel %vm139_vm0, %v4777_v13, %v2868_v36  ;;  %v3012_v48 = vrot.slane %v3010_v56, 2  ;;  %v3490_v28 = vshrl.u32 %v3006_v39, 16  ;;  %v3037_v36 = vsel %vm139_vm0, %v4780_v12, %v2871_v27 }
 0x275   :  { %4082 = vst [vmem:[#allocation1 + $0x6] ss:$9 sm:$0xff] %v3372_v1  ;;  %v3443_v1 = vshrl.u32 %v2982_v32, 16  ;;  %v3009_v20 = vrot.slane %v3007_v40, 1  ;;  %v3464_v17 = vshll.u32 %v2994_v38, 16  ;;  %v3467_v10 = vshrl.u32 %v2994_v38, 16 }
 0x276   :  { %4084 = vst [vmem:[#allocation1 + $0x7] ss:$9 sm:$0xff] %v3380_v52  ;;  %v3448_v52 = vshll.u32 %v2985_v19, 16  ;;  %v2869_v32 = vrot.slane %v4778_v46, 3  ;;  %v3503_v11 = vshll.u32 %v3012_v48, 16  ;;  %v3506_v2 = vshrl.u32 %v3012_v48, 16 }
 0x277   :  { %v3466_v47 = vsel %vm5065_vm6, %v3459_v6, %v3464_v17  ;;  %v3495_v29 = vshll.u32 %v3009_v20, 16  ;;  %v3498_v61 = vshrl.u32 %v3009_v20, 16  ;;  %v3039_v44 = vrot.slane %v3037_v36, 1  ;;  %v4782_v6 = vld [vmem:[%s6984_s0 + $0x4c] sm:$0x3] }
 0x278   :  { %v3450_v23 = vsel %vm5065_vm6, %v3443_v1, %v3448_v52  ;;  %v3019_v5 = vsel %vm139_vm0, %v4778_v46, %v2869_v32  ;;  %v3018_v13 = vsel %vm135_vm3, %v4778_v46, %v2869_v32  ;;  %v4785_v36 = vld [vmem:[%s6984_s0 + $0x60] sm:$0xf] }
 0x279   :  { %v3505_v59 = vsel %vm5065_vm6, %v3498_v61, %v3503_v11  ;;  %v3518_v16 = vshll.u32 %v3018_v13, 16  ;;  %v3521_v37 = vshrl.u32 %v3018_v13, 16  ;;  %v3565_v31 = vshll.u32 %v3039_v44, 16 }
 0x27d   :  { %v4085_v34 = vld [vmem:[#allocation1] sm:$0xff] }
 0x27e   :  { %4087 = vst [vmem:[#allocation1] ss:$9 sm:$0xff] %v3388_v8  ;;  %v3474_v8 = vsel %vm5065_vm6, %v3467_v10, %v3472_v51  ;;  %v3557_v10 = vshll.u32 %v3036_v4, 16  ;;  %v4783_v51 = vld [vmem:[%s6984_s0 + $0x50] sm:$0xf] }
 0x27f   :  { %4930 = vmatmul.msk.bf16.gmra.mxu3 %vm1675_vm7, %v4085_v34  ;;  %4089 = vst [vmem:[#allocation1 + $0x1] ss:$9 sm:$0xff] %v3396_v35  ;;  %v2870_v35 = vrot.slane %v4779_v53, 3  ;;  %v3489_v34 = vsel %vm5065_vm6, %v3482_v21, %v3487_v22  ;;  %v2874_v22 = vrot.slane %v4783_v51, 3 }
 0x280   :  { %4091 = vst [vmem:[#allocation1 + $0x2] ss:$9 sm:$0xff] %v3403_v63  ;;  %v3497_v63 = vsel %vm5065_vm6, %v3490_v28, %v3495_v29  ;;  %v3049_v28 = vsel %vm147_vm2, %v4781_v33, %v2872_v57 }
 0x281   :  { %4093 = vst [vmem:[#allocation1 + $0x3] ss:$9 sm:$0xff] %v3411_v9  ;;  %v3015_v9 = vrot.slane %v3013_v30, 3  ;;  %v3025_v55 = vsel %vm139_vm0, %v4779_v53, %v2870_v35  ;;  %v3028_v60 = vsel %vm143_vm1, %v4779_v53, %v2870_v35  ;;  %v3031_v14 = vsel %vm147_vm2, %v4779_v53, %v2870_v35 }
 0x282   :  { %4095 = vst [vmem:[#allocation1 + $0x4] ss:$9 sm:$0xff] %v3419_v18  ;;  %v3021_v18 = vrot.slane %v3019_v5, 1  ;;  %v3024_v25 = vsel %vm135_vm3, %v4779_v53, %v2870_v35  ;;  %v2873_v53 = vrot.slane %v4782_v6, 3  ;;  %v3051_v35 = vrot.slane %v3049_v28, 3 }
 0x283   :  { %4097 = vst [vmem:[#allocation1 + $0x5] ss:$9 sm:$0xff] %v3427_v43  ;;  %v3027_v43 = vrot.slane %v3025_v55, 1  ;;  %v3511_v41 = vshll.u32 %v3015_v9, 16  ;;  %v3514_v19 = vshrl.u32 %v3015_v9, 16  ;;  %v3529_v40 = vshrl.u32 %v3024_v25, 16 }
 0x284   :  { %4099 = vst [vmem:[#allocation1 + $0x6] ss:$9 sm:$0xff] %v3435_v50  ;;  %v3030_v50 = vrot.slane %v3028_v60, 2  ;;  %v3526_v38 = vshll.u32 %v3021_v18, 16  ;;  %v3055_v11 = vsel %vm139_vm0, %v4782_v6, %v2873_v53  ;;  %v3054_v12 = vsel %vm135_vm3, %v4782_v6, %v2873_v53 }
 0x285   :  { %4101 = vst [vmem:[#allocation1 + $0x7] ss:$9 sm:$0xff] %v3442_v45  ;;  %v3033_v45 = vrot.slane %v3031_v14, 3  ;;  %v3534_v56 = vshll.u32 %v3027_v43, 16  ;;  %v3513_v1 = vsel %vm5065_vm6, %v3506_v2, %v3511_v41  ;;  %v3537_v52 = vshrl.u32 %v3027_v43, 16 }
 0x286   :  { %v3542_v54 = vshll.u32 %v3030_v50, 16  ;;  %v3520_v0 = vsel %vm5065_vm6, %v3514_v19, %v3518_v16  ;;  %v3545_v42 = vshrl.u32 %v3030_v50, 16  ;;  %v3528_v39 = vsel %vm5065_vm6, %v3521_v37, %v3526_v38  ;;  %v4784_v43 = vld [vmem:[%s6984_s0 + $0x54] sm:$0x3] }
 0x287   :  { %v3550_v20 = vshll.u32 %v3033_v45, 16  ;;  %v3553_v48 = vshrl.u32 %v3033_v45, 16  ;;  %v3536_v46 = vsel %vm5065_vm6, %v3529_v40, %v3534_v56  ;;  %v3064_v30 = vsel %vm143_vm1, %v4783_v51, %v2874_v22 }
 0x288   :  { %v3544_v7 = vsel %vm5065_vm6, %v3537_v52, %v3542_v54  ;;  %v3060_v60 = vsel %vm135_vm3, %v4783_v51, %v2874_v22  ;;  %v3066_v13 = vrot.slane %v3064_v30, 2  ;;  %v3589_v14 = vshll.u32 %v3051_v35, 16 }
 0x289   :  { %v3552_v21 = vsel %vm5065_vm6, %v3545_v42, %v3550_v20  ;;  %v3592_v25 = vshrl.u32 %v3051_v35, 16  ;;  %v3596_v50 = vshll.u32 %v3054_v12, 16  ;;  %v3599_v45 = vshrl.u32 %v3054_v12, 16  ;;  %v4787_v20 = vld [vmem:[%s6984_s0 + $0x68] sm:$0xf] }
 0x28a   :  { %v2875_v38 = vrot.slane %v4784_v43, 3  ;;  %v3620_v56 = vshll.u32 %v3066_v13, 16  ;;  %v3623_v54 = vshrl.u32 %v3066_v13, 16 }
 0x28b   :  { %v3598_v52 = vsel %vm5065_vm6, %v3592_v25, %v3596_v50 }
 0x28c   :  { %v4102_v24 = vld [vmem:[#allocation1] sm:$0xff] }
 0x28d   :  { %4104 = vst [vmem:[#allocation1] ss:$9 sm:$0xff] %v3450_v23  ;;  %v3560_v23 = vshrl.u32 %v3036_v4, 16 }
 0x28e   :  { %4106 = vst [vmem:[#allocation1 + $0x1] ss:$9 sm:$0xff] %v3458_v26  ;;  %v3043_v26 = vsel %vm139_vm0, %v4781_v33, %v2872_v57 }
 0x28f   :  { %4931 = vmatmul.msk.bf16.gmra.mxu3 %vm1675_vm7, %v4102_v24  ;;  %4108 = vst [vmem:[#allocation1 + $0x2] ss:$9 sm:$0xff] %v3466_v47  ;;  %v3046_v24 = vsel %vm143_vm1, %v4781_v33, %v2872_v57  ;;  %v3559_v47 = vsel %vm5065_vm6, %v3553_v48, %v3557_v10  ;;  %v3567_v29 = vsel %vm5065_vm6, %v3560_v23, %v3565_v31  ;;  %v3045_v32 = vrot.slane %v3043_v26, 1 }
 0x290   :  { %4110 = vst [vmem:[#allocation1 + $0x3] ss:$9 sm:$0xff] %v3474_v8  ;;  %v3042_v8 = vsel %vm135_vm3, %v4781_v33, %v2872_v57  ;;  %v3048_v61 = vrot.slane %v3046_v24, 2  ;;  %v3607_v33 = vshrl.u32 %v3060_v60, 16  ;;  %v3072_v31 = vsel %vm135_vm3, %v4784_v43, %v2875_v38 }
 0x291   :  { %4112 = vst [vmem:[#allocation1 + $0x4] ss:$9 sm:$0xff] %v3481_v15  ;;  %v3061_v15 = vsel %vm139_vm0, %v4783_v51, %v2874_v22  ;;  %v3568_v5 = vshrl.u32 %v3042_v8, 16  ;;  %v3576_v9 = vshrl.u32 %v3045_v32, 16  ;;  %v3638_v8 = vshrl.u32 %v3072_v31, 16 }
 0x292   :  { %4114 = vst [vmem:[#allocation1 + $0x5] ss:$9 sm:$0xff] %v3489_v34  ;;  %v3057_v34 = vrot.slane %v3055_v11, 1  ;;  %v3063_v27 = vrot.slane %v3061_v15, 1  ;;  %v3581_v55 = vshll.u32 %v3048_v61, 16  ;;  %v3584_v18 = vshrl.u32 %v3048_v61, 16 }
 0x293   :  { %4116 = vst [vmem:[#allocation1 + $0x6] ss:$9 sm:$0xff] %v3497_v63  ;;  %v3067_v63 = vsel %vm147_vm2, %v4783_v51, %v2874_v22 }
 0x294   :  { %4118 = vst [vmem:[#allocation1 + $0x7] ss:$9 sm:$0xff] %v3505_v59  ;;  %v3573_v59 = vshll.u32 %v3045_v32, 16  ;;  %v3069_v2 = vrot.slane %v3067_v63, 3  ;;  %v3604_v19 = vshll.u32 %v3057_v34, 16  ;;  %v3583_v16 = vsel %vm5065_vm6, %v3576_v9, %v3581_v55 }
 0x295   :  { %v3612_v37 = vshll.u32 %v3063_v27, 16  ;;  %v3591_v44 = vsel %vm5065_vm6, %v3584_v18, %v3589_v14  ;;  %v3615_v40 = vshrl.u32 %v3063_v27, 16  ;;  %v3635_v32 = vshll.u32 %v3072_v31, 16  ;;  %v4788_v55 = vld [vmem:[%s6984_s0 + $0x6c] sm:$0x3] }
 0x296   :  { %v3575_v41 = vsel %vm5065_vm6, %v3568_v5, %v3573_v59  ;;  %v3628_v57 = vshll.u32 %v3069_v2, 16  ;;  %v3606_v42 = vsel %vm5065_vm6, %v3599_v45, %v3604_v19  ;;  %v4789_v14 = vld [vmem:[%s6984_s0 + $0x70] sm:$0xf]  ;;  %v2879_v19 = vrot.slane %v4788_v55, 3 }
 0x297   :  { %v3614_v6 = vsel %vm5065_vm6, %v3607_v33, %v3612_v37  ;;  %v2880_v33 = vrot.slane %v4789_v14, 3 }
 0x298   :  { %v3630_v51 = vsel %vm5065_vm6, %v3623_v54, %v3628_v57 }
 0x299   :  { %v3115_v57 = vsel %vm139_vm0, %v4789_v14, %v2880_v33 }
 0x29b   :  { %v4119_v17 = vld [vmem:[#allocation1] sm:$0xff] }
 0x29c   :  { %4121 = vst [vmem:[#allocation1] ss:$9 sm:$0xff] %v3513_v1  ;;  %v2876_v1 = vrot.slane %v4785_v36, 3 }
 0x29d   :  { %4123 = vst [vmem:[#allocation1 + $0x1] ss:$9 sm:$0xff] %v3520_v0  ;;  %v4786_v0 = vld [vmem:[%s6984_s0 + $0x64] sm:$0x3] }
 0x29e   :  { %4125 = vst [vmem:[#allocation1 + $0x2] ss:$9 sm:$0xff] %v3528_v39  ;;  %v3622_v39 = vsel %vm5065_vm6, %v3615_v40, %v3620_v56  ;;  %v2877_v48 = vrot.slane %v4786_v0, 3  ;;  %v3079_v10 = vsel %vm139_vm0, %v4785_v36, %v2876_v1  ;;  %v3082_v23 = vsel %vm143_vm1, %v4785_v36, %v2876_v1  ;;  %v4790_v56 = vld [vmem:[%s6984_s0 + $0x74] sm:$0x3] }
 0x29f   :  { %4932 = vmatmul.msk.bf16.gmra.mxu3 %vm1675_vm7, %v4119_v17  ;;  %4127 = vst [vmem:[#allocation1 + $0x3] ss:$9 sm:$0xff] %v3536_v46  ;;  %v3073_v17 = vsel %vm139_vm0, %v4784_v43, %v2875_v38  ;;  %v2878_v46 = vrot.slane %v4787_v20, 3  ;;  %v3085_v53 = vsel %vm147_vm2, %v4785_v36, %v2876_v1  ;;  %v3081_v26 = vrot.slane %v3079_v10, 1 }
 0x2a0   :  { %4129 = vst [vmem:[#allocation1 + $0x4] ss:$9 sm:$0xff] %v3544_v7  ;;  %v3075_v7 = vrot.slane %v3073_v17, 1  ;;  %v3084_v22 = vrot.slane %v3082_v23, 2  ;;  %v3091_v24 = vsel %vm139_vm0, %v4786_v0, %v2877_v48  ;;  %v3090_v11 = vsel %vm135_vm3, %v4786_v0, %v2877_v48  ;;  %v6535_v0 = vpop.f32.mrf.mxu0 }
 0x2a1   :  { %4131 = vst [vmem:[#allocation1 + $0x5] ss:$9 sm:$0xff] %v3552_v21  ;;  %v3078_v21 = vsel %vm135_vm3, %v4785_v36, %v2876_v1  ;;  %v3097_v28 = vsel %vm139_vm0, %v4787_v20, %v2878_v46  ;;  %v3093_v35 = vrot.slane %v3091_v24, 1  ;;  %v3651_v12 = vshll.u32 %v3081_v26, 16 }
 0x2a2   :  { %4133 = vst [vmem:[#allocation1 + $0x6] ss:$9 sm:$0xff] %v3559_v47  ;;  %v3087_v47 = vrot.slane %v3085_v53, 3  ;;  %v3643_v61 = vshll.u32 %v3075_v7, 16  ;;  %v3646_v15 = vshrl.u32 %v3078_v21, 16  ;;  %v3099_v30 = vrot.slane %v3097_v28, 1 }
 0x2a3   :  { %4135 = vst [vmem:[#allocation1 + $0x7] ss:$9 sm:$0xff] %v3567_v29  ;;  %v3631_v29 = vshrl.u32 %v3069_v2, 16  ;;  %v3654_v34 = vshrl.u32 %v3081_v26, 16  ;;  %v3659_v63 = vshll.u32 %v3084_v22, 16  ;;  %v3096_v5 = vsel %vm135_vm3, %v4787_v20, %v2878_v46 }
 0x2a4   :  { %v3662_v27 = vshrl.u32 %v3084_v22, 16  ;;  %v3667_v9 = vshll.u32 %v3087_v47, 16  ;;  %v3645_v60 = vsel %vm5065_vm6, %v3638_v8, %v3643_v61  ;;  %v3670_v13 = vshrl.u32 %v3087_v47, 16  ;;  %v4791_v26 = vld [vmem:[%s6984_s0 + $0x78] sm:$0xf] }
 0x2a5   :  { %v3637_v59 = vsel %vm5065_vm6, %v3631_v29, %v3635_v32  ;;  %v3674_v18 = vshll.u32 %v3090_v11, 16  ;;  %v3653_v2 = vsel %vm5065_vm6, %v3646_v15, %v3651_v12  ;;  %v3677_v25 = vshrl.u32 %v3090_v11, 16  ;;  %v6549_v32 = vpop.f32.mrf.mxu2 }
 0x2a6   :  { %v3682_v50 = vshll.u32 %v3093_v35, 16  ;;  %v3661_v36 = vsel %vm5065_vm6, %v3654_v34, %v3659_v63  ;;  %v3690_v45 = vshll.u32 %v3099_v30, 16  ;;  %v3100_v37 = vsel %vm143_vm1, %v4787_v20, %v2878_v46 }
 0x2a7   :  { %v3676_v38 = vsel %vm5065_vm6, %v3670_v13, %v3674_v18  ;;  %v3102_v1 = vrot.slane %v3100_v37, 2  ;;  %v3108_v17 = vsel %vm135_vm3, %v4788_v55, %v2879_v19  ;;  %v3121_v48 = vsel %vm147_vm2, %v4789_v14, %v2880_v33 }
 0x2a8   :  { %v3117_v10 = vrot.slane %v3115_v57, 1  ;;  %v3114_v23 = vsel %vm135_vm3, %v4789_v14, %v2880_v33  ;;  %v3123_v21 = vrot.slane %v3121_v48, 3  ;;  %v3713_v24 = vshll.u32 %v3108_v17, 16  ;;  %v6555_v34 = vpop.f32.mrf.mxu0  ;;  %4658 = vmatmul.msk.bf16.gmra.mxu0 %vm1675_vm7, %v5788_v62  ;;  %v6574_v62 = vld [vmem:[%s6984_s0 + $0x80] sm:$0xf] }
 0x2a9   :  { %v3701_v7 = vshrl.u32 %v3102_v1, 16  ;;  %v3716_v28 = vshrl.u32 %v3108_v17, 16  ;;  %v3724_v61 = vshrl.u32 %v3114_v23, 16  ;;  %v2882_v35 = vrot.slane %v4791_v26, 3 }
 0x2aa   :  { %v4136_v4 = vld [vmem:[#allocation1] sm:$0xff]  ;;  %v3729_v11 = vshll.u32 %v3117_v10, 16  ;;  %v3732_v12 = vshrl.u32 %v3117_v10, 16  ;;  %v3748_v13 = vshrl.u32 %v3123_v21, 16 }
 0x2ab   :  { %4138 = vst [vmem:[#allocation1] ss:$9 sm:$0xff] %v3575_v41  ;;  %v3685_v41 = vshrl.u32 %v3096_v5, 16  ;;  %v3132_v37 = vsel %vm135_vm3, %v4791_v26, %v2882_v35 }
 0x2ac   :  { %4140 = vst [vmem:[#allocation1 + $0x1] ss:$9 sm:$0xff] %v3583_v16  ;;  %v3669_v16 = vsel %vm5065_vm6, %v3662_v27, %v3667_v9  ;;  %v3745_v9 = vshll.u32 %v3123_v21, 16  ;;  %v3763_v57 = vshrl.u32 %v3132_v37, 16 }
 0x2ad   :  { %4142 = vst [vmem:[#allocation1 + $0x2] ss:$9 sm:$0xff] %v3591_v44  ;;  %v3684_v44 = vsel %vm5065_vm6, %v3677_v25, %v3682_v50  ;;  %v3692_v40 = vsel %vm5065_vm6, %v3685_v41, %v3690_v45  ;;  %v3136_v50 = vsel %vm143_vm1, %v4791_v26, %v2882_v35  ;;  %v2884_v41 = vrot.slane %v6574_v62, 3 }
 0x2ae   :  { %4144 = vst [vmem:[#allocation1 + $0x3] ss:$9 sm:$0xff] %v3598_v52  ;;  %v3109_v52 = vsel %vm139_vm0, %v4788_v55, %v2879_v19  ;;  %v4792_v55 = vld [vmem:[%s6984_s0 + $0x7c] sm:$0x3] }
 0x2af   :  { %4933 = vmatmul.msk.bf16.gmra.mxu3 %vm1675_vm7, %v4136_v4  ;;  %4146 = vst [vmem:[#allocation1 + $0x4] ss:$9 sm:$0xff] %v3606_v42  ;;  %v3103_v4 = vsel %vm147_vm2, %v4787_v20, %v2878_v46  ;;  %v6537_v42 = vpop.f32.mrf.mxu1  ;;  %v3118_v20 = vsel %vm143_vm1, %v4789_v14, %v2880_v33  ;;  %v3698_v46 = vshll.u32 %v3102_v1, 16  ;;  %v2883_v25 = vrot.slane %v4792_v55, 3 }
 0x2b0   :  { %4148 = vst [vmem:[#allocation1 + $0x5] ss:$9 sm:$0xff] %v3614_v6  ;;  %v3105_v54 = vrot.slane %v3103_v4, 3  ;;  %v2881_v6 = vrot.slane %v4790_v56, 3  ;;  %v3120_v31 = vrot.slane %v3118_v20, 2  ;;  %v3139_v33 = vsel %vm147_vm2, %v4791_v26, %v2882_v35 }
 0x2b1   :  { %4150 = vst [vmem:[#allocation1 + $0x6] ss:$9 sm:$0xff] %v3622_v39  ;;  %v3111_v39 = vrot.slane %v3109_v52, 1  ;;  %v3145_v4 = vsel %vm139_vm0, %v4792_v55, %v2883_v25  ;;  %v6600_v1 = vsel %vm143_vm1, %v6574_v62, %v2884_v41 }
 0x2b2   :  { %4152 = vst [vmem:[#allocation1 + $0x7] ss:$9 sm:$0xff] %v3630_v51  ;;  %v3693_v51 = vshrl.u32 %v3099_v30, 16  ;;  %v3706_v53 = vshll.u32 %v3105_v54, 16  ;;  %v3709_v22 = vshrl.u32 %v3105_v54, 16  ;;  %v6547_v47 = vsel %vm135_vm3, %v4790_v56, %v2881_v6 }
 0x2b3   :  { %v3721_v29 = vshll.u32 %v3111_v39, 16  ;;  %v3737_v30 = vshll.u32 %v3120_v31, 16  ;;  %v3740_v27 = vshrl.u32 %v3120_v31, 16  ;;  %v3752_v18 = vshll.u32 %v6547_v47, 16  ;;  %v4794_v31 = vld [vmem:[%s6984_s0 + $0x84] sm:$0x3] }
 0x2b4   :  { %v3700_v8 = vsel %vm5065_vm6, %v3693_v51, %v3698_v46  ;;  %v3708_v15 = vsel %vm5065_vm6, %v3701_v7, %v3706_v53  ;;  %v3127_v14 = vsel %vm139_vm0, %v4790_v56, %v2881_v6  ;;  %v3151_v56 = vsel %vm139_vm0, %v6574_v62, %v2884_v41 }
 0x2b5   :  { %v3754_v45 = vsel %vm5065_vm6, %v3748_v13, %v3752_v18  ;;  %v3129_v19 = vrot.slane %v3127_v14, 1  ;;  %v3755_v52 = vshrl.u32 %v6547_v47, 16  ;;  %v3144_v6 = vsel %vm135_vm3, %v4792_v55, %v2883_v25  ;;  %v4796_v55 = vld [vmem:[%s6984_s0 + $0x8c] sm:$0x3] }
 0x2b6   :  { %v3147_v17 = vrot.slane %v3145_v4, 1  ;;  %v3153_v10 = vrot.slane %v3151_v56, 1  ;;  %v3156_v51 = vrot.slane %v6600_v1, 2  ;;  %v3791_v21 = vshll.u32 %v3144_v6, 16 }
 0x2b7   :  { %v6557_v63 = vpop.f32.mrf.mxu1  ;;  %4687 = vmatmul.msk.bf16.gmra.mxu1 %vm1675_vm7, %v6000_v3  ;;  %v3731_v3 = vsel %vm5065_vm6, %v3724_v61, %v3729_v11  ;;  %v3760_v54 = vshll.u32 %v3129_v19, 16  ;;  %v3794_v47 = vshrl.u32 %v3144_v6, 16 }
 0x2b8   :  { %v3818_v4 = vshrl.u32 %v3156_v51, 16 }
 0x2b9   :  { %v4153_v43 = vld [vmem:[#allocation1] sm:$0xff]  ;;  %v3762_v7 = vsel %vm5065_vm6, %v3755_v52, %v3760_v54 }
 0x2ba   :  { %4155 = vst [vmem:[#allocation1] ss:$9 sm:$0xff] %v3637_v59  ;;  %v3715_v59 = vsel %vm5065_vm6, %v3709_v22, %v3713_v24  ;;  %v4795_v22 = vld [vmem:[%s6984_s0 + $0x88] sm:$0xf] }
 0x2bb   :  { %4157 = vst [vmem:[#allocation1 + $0x1] ss:$9 sm:$0xff] %v3645_v60  ;;  %v3723_v60 = vsel %vm5065_vm6, %v3716_v28, %v3721_v29  ;;  %v3799_v28 = vshll.u32 %v3147_v17, 16 }
 0x2bc   :  { %4159 = vst [vmem:[#allocation1 + $0x2] ss:$9 sm:$0xff] %v3653_v2  ;;  %v3739_v2 = vsel %vm5065_vm6, %v3732_v12, %v3737_v30  ;;  %v3815_v12 = vshll.u32 %v3156_v51, 16  ;;  %v2885_v30 = vrot.slane %v4794_v31, 3 }
 0x2bd   :  { %4161 = vst [vmem:[#allocation1 + $0x3] ss:$9 sm:$0xff] %v3661_v36  ;;  %v3747_v36 = vsel %vm5065_vm6, %v3740_v27, %v3745_v9  ;;  %v2886_v27 = vrot.slane %v4795_v22, 3  ;;  %v3801_v13 = vsel %vm5065_vm6, %v3794_v47, %v3799_v28 }
 0x2be   :  { %4163 = vst [vmem:[#allocation1 + $0x4] ss:$9 sm:$0xff] %v3669_v16  ;;  %v3163_v14 = vsel %vm139_vm0, %v4794_v31, %v2885_v30 }
 0x2bf   :  { %4934 = vmatmul.msk.bf16.gmra.mxu3 %vm1675_vm7, %v4153_v43  ;;  %4165 = vst [vmem:[#allocation1 + $0x5] ss:$9 sm:$0xff] %v3676_v38  ;;  %v3133_v43 = vsel %vm139_vm0, %v4791_v26, %v2882_v35  ;;  %v3138_v38 = vrot.slane %v3136_v50, 2  ;;  %v6621_v61 = vpop.f32.mrf.mxu1  ;;  %v3807_v35 = vshll.u32 %v3153_v10, 16  ;;  %v3169_v25 = vsel %vm139_vm0, %v4795_v22, %v2886_v27 }
 0x2c0   :  { %4167 = vst [vmem:[#allocation1 + $0x6] ss:$9 sm:$0xff] %v3684_v44  ;;  %v3135_v16 = vrot.slane %v3133_v43, 1  ;;  %v6592_v44 = vpop.f32.mrf.mxu2  ;;  %4764 = vmatmul.msk.bf16.gmra.mxu2 %vm1675_vm7, %v6293_v58  ;;  %v3150_v58 = vsel %vm135_vm3, %v6574_v62, %v2884_v41  ;;  %v2887_v43 = vrot.slane %v4796_v55, 3  ;;  %v3175_v19 = vsel %vm147_vm2, %v4795_v22, %v2886_v27 }
 0x2c1   :  { %4169 = vst [vmem:[#allocation1 + $0x7] ss:$9 sm:$0xff] %v3692_v40  ;;  %v3141_v40 = vrot.slane %v3139_v33, 3  ;;  %v3776_v48 = vshll.u32 %v3138_v38, 16  ;;  %v3779_v46 = vshrl.u32 %v3138_v38, 16  ;;  %v3802_v29 = vshrl.u32 %v3150_v58, 16 }
 0x2c2   :  { %v3768_v20 = vshll.u32 %v3135_v16, 16  ;;  %v3771_v39 = vshrl.u32 %v3135_v16, 16  ;;  %v3171_v16 = vrot.slane %v3169_v25, 1  ;;  %v3168_v37 = vsel %vm135_vm3, %v4795_v22, %v2886_v27 }
 0x2c3   :  { %v3784_v23 = vshll.u32 %v3141_v40, 16  ;;  %v3787_v26 = vshrl.u32 %v3141_v40, 16  ;;  %v3809_v18 = vsel %vm5065_vm6, %v3802_v29, %v3807_v35  ;;  %v3181_v38 = vsel %vm139_vm0, %v4796_v55, %v2887_v43 }
 0x2c4   :  { %v3770_v53 = vsel %vm5065_vm6, %v3763_v57, %v3768_v20  ;;  %v3778_v24 = vsel %vm5065_vm6, %v3771_v39, %v3776_v48  ;;  %v3177_v1 = vrot.slane %v3175_v19, 3  ;;  %v4797_v57 = vld [vmem:[%s6984_s0 + $0x90] sm:$0xf]  ;;  %v3180_v17 = vsel %vm135_vm3, %v4796_v55, %v2887_v43 }
 0x2c5   :  { %v3793_v9 = vsel %vm5065_vm6, %v3787_v26, %v3791_v21  ;;  %v3183_v39 = vrot.slane %v3181_v38, 1  ;;  %v3841_v48 = vshrl.u32 %v3168_v37, 16  ;;  %v3846_v58 = vshll.u32 %v3171_v16, 16 }
 0x2c6   :  { %v3849_v51 = vshrl.u32 %v3171_v16, 16  ;;  %v3862_v26 = vshll.u32 %v3177_v1, 16  ;;  %v3869_v47 = vshll.u32 %v3180_v17, 16  ;;  %v3872_v28 = vshrl.u32 %v3180_v17, 16 }
 0x2c7   :  { %v3848_v35 = vsel %vm5065_vm6, %v3841_v48, %v3846_v58 }
 0x2c8   :  { %v4170_v5 = vld [vmem:[#allocation1] sm:$0xff] }
 0x2c9   :  { %4172 = vst [vmem:[#allocation1] ss:$9 sm:$0xff] %v3700_v8  ;;  %v6619_v8 = vpop.f32.mrf.mxu0 }
 0x2ca   :  { %4174 = vst [vmem:[#allocation1 + $0x1] ss:$9 sm:$0xff] %v3708_v15  ;;  %v3810_v15 = vshrl.u32 %v3153_v10, 16 }
 0x2cb   :  { %4176 = vst [vmem:[#allocation1 + $0x2] ss:$9 sm:$0xff] %v3715_v59  ;;  %v6625_v59 = vpop.f32.mrf.mxu2 }
 0x2cc   :  { %4178 = vst [vmem:[#allocation1 + $0x3] ss:$9 sm:$0xff] %v3723_v60  ;;  %v3157_v60 = vsel %vm147_vm2, %v6574_v62, %v2884_v41  ;;  %v3172_v62 = vsel %vm143_vm1, %v4795_v22, %v2886_v27  ;;  %v3162_v41 = vsel %vm135_vm3, %v4794_v31, %v2885_v30  ;;  %v2888_v31 = vrot.slane %v4797_v57, 3 }
 0x2cd   :  { %4180 = vst [vmem:[#allocation1 + $0x4] ss:$9 sm:$0xff] %v3731_v3  ;;  %v3817_v3 = vsel %vm5065_vm6, %v3810_v15, %v3815_v12  ;;  %v3174_v33 = vrot.slane %v3172_v62, 2  ;;  %v3830_v54 = vshll.u32 %v3162_v41, 16  ;;  %v3833_v20 = vshrl.u32 %v3162_v41, 16 }
 0x2ce   :  { %4182 = vst [vmem:[#allocation1 + $0x5] ss:$9 sm:$0xff] %v3739_v2  ;;  %v3159_v2 = vrot.slane %v3157_v60, 3  ;;  %v3877_v15 = vshll.u32 %v3183_v39, 16  ;;  %v4799_v12 = vld [vmem:[%s6984_s0 + $0x98] sm:$0xf]  ;;  %v3190_v60 = vsel %vm143_vm1, %v4797_v57, %v2888_v31  ;;  %v3186_v62 = vsel %vm135_vm3, %v4797_v57, %v2888_v31 }
 0x2cf   :  { %4935 = vmatmul.msk.bf16.gmra.mxu3 %vm1675_vm7, %v4170_v5  ;;  %4184 = vst [vmem:[#allocation1 + $0x6] ss:$9 sm:$0xff] %v3747_v36  ;;  %v3786_v5 = vsel %vm5065_vm6, %v3779_v46, %v3784_v23  ;;  %v6645_v36 = vpop.f32.mrf.mxu1  ;;  %v3854_v46 = vshll.u32 %v3174_v33, 16  ;;  %v4798_v23 = vld [vmem:[%s6984_s0 + $0x94] sm:$0x3]  ;;  %v3192_v41 = vrot.slane %v3190_v60, 2 }
 0x2d0   :  { %4186 = vst [vmem:[#allocation1 + $0x7] ss:$9 sm:$0xff] %v3754_v45  ;;  %v3165_v45 = vrot.slane %v3163_v14, 1  ;;  %v3823_v40 = vshll.u32 %v3159_v2, 16  ;;  %v3826_v52 = vshrl.u32 %v3159_v2, 16  ;;  %v2889_v30 = vrot.slane %v4798_v23, 3 }
 0x2d1   :  { %v6643_v50 = vpop.f32.mrf.mxu0  ;;  %v2890_v14 = vrot.slane %v4799_v12, 3  ;;  %v3879_v43 = vsel %vm5065_vm6, %v3872_v28, %v3877_v15 }
 0x2d2   :  { %v3838_v6 = vshll.u32 %v3165_v45, 16  ;;  %v3825_v10 = vsel %vm5065_vm6, %v3818_v4, %v3823_v40  ;;  %v3199_v25 = vsel %vm139_vm0, %v4798_v23, %v2889_v30  ;;  %v3198_v16 = vsel %vm135_vm3, %v4798_v23, %v2889_v30  ;;  %v4800_v23 = vld [vmem:[%s6984_s0 + $0x9c] sm:$0x3] }
 0x2d3   :  { %v6652_v56 = vpop.f32.mrf.mxu2  ;;  %v3205_v37 = vsel %vm139_vm0, %v4799_v12, %v2890_v14  ;;  %v3208_v38 = vsel %vm143_vm1, %v4799_v12, %v2890_v14  ;;  %v6703_v4 = vsel %vm147_vm2, %v4799_v12, %v2890_v14  ;;  %v3880_v40 = vshrl.u32 %v3186_v62, 16 }
 0x2d4   :  { %v3840_v22 = vsel %vm5065_vm6, %v3833_v20, %v3838_v6  ;;  %v6710_v6 = vld [vmem:[%s6985_s2] ss:$0 sm:$0xff]  ;;  %v3204_v17 = vsel %vm135_vm3, %v4799_v12, %v2890_v14  ;;  %v3207_v39 = vrot.slane %v3205_v37, 1  ;;  %v3908_v58 = vshll.u32 %v3198_v16, 16 }
 0x2d5   :  { %v3919_v28 = vshrl.u32 %v3204_v17, 16 }
 0x2d6   :  { %v3924_v30 = vshll.u32 %v3207_v39, 16 }
 0x2d7   :  { %v4187_v11 = vld [vmem:[#allocation1] sm:$0xff] }
 0x2d8   :  { %4189 = vst [vmem:[#allocation1] ss:$9 sm:$0xff] %v3762_v7  ;;  %v3832_v7 = vsel %vm5065_vm6, %v3826_v52, %v3830_v54  ;;  %v3893_v52 = vshll.u32 %v3192_v41, 16  ;;  %v3896_v54 = vshrl.u32 %v3192_v41, 16  ;;  %v3926_v41 = vsel %vm5065_vm6, %v3919_v28, %v3924_v30 }
 0x2d9   :  { %4191 = vst [vmem:[#allocation1 + $0x1] ss:$9 sm:$0xff] %v3770_v53  ;;  %v3857_v53 = vshrl.u32 %v3174_v33, 16  ;;  %v6667_v29 = vpop.f32.mrf.mxu0  ;;  %v3201_v33 = vrot.slane %v3199_v25, 1 }
 0x2da   :  { %4193 = vst [vmem:[#allocation1 + $0x2] ss:$9 sm:$0xff] %v3778_v24  ;;  %v3865_v24 = vshrl.u32 %v3177_v1, 16 }
 0x2db   :  { %4195 = vst [vmem:[#allocation1 + $0x3] ss:$9 sm:$0xff] %v3786_v5  ;;  %v3856_v5 = vsel %vm5065_vm6, %v3849_v51, %v3854_v46  ;;  %v6678_v27 = vpop.f32.mrf.mxu2  ;;  %v3864_v55 = vsel %vm5065_vm6, %v3857_v53, %v3862_v26  ;;  %v3210_v51 = vrot.slane %v3208_v38, 2  ;;  %v3213_v46 = vrot.slane %v6703_v4, 3 }
 0x2dc   :  { %4197 = vst [vmem:[#allocation1 + $0x4] ss:$9 sm:$0xff] %v3793_v9  ;;  %v3187_v9 = vsel %vm139_vm0, %v4797_v57, %v2888_v31  ;;  %v3911_v53 = vshrl.u32 %v3198_v16, 16  ;;  %v3916_v26 = vshll.u32 %v3201_v33, 16  ;;  %v1960_v16 = vadd.f32 %v6621_v61, %v6619_v8 }
 0x2dd   :  { %4199 = vst [vmem:[#allocation1 + $0x5] ss:$9 sm:$0xff] %v3801_v13  ;;  %v3193_v13 = vsel %vm147_vm2, %v4797_v57, %v2888_v31  ;;  %v3189_v2 = vrot.slane %v3187_v9, 1  ;;  %v3927_v9 = vshrl.u32 %v3207_v39, 16  ;;  %v3935_v60 = vshrl.u32 %v3210_v51, 16 }
 0x2de   :  { %4201 = vst [vmem:[#allocation1 + $0x6] ss:$9 sm:$0xff] %v3809_v18  ;;  %v1955_v18 = vadd.f32 %v6537_v42, %v6535_v0  ;;  %v3195_v45 = vrot.slane %v3193_v13, 3  ;;  %v3940_v14 = vshll.u32 %v3213_v46, 16 }
 0x2df   :  { %4936 = vmatmul.msk.bf16.gmra.mxu3 %vm1675_vm7, %v4187_v11  ;;  %4203 = vst [vmem:[#allocation1 + $0x7] ss:$9 sm:$0xff] %v3817_v3  ;;  %v6669_v11 = vpop.f32.mrf.mxu1  ;;  %v3871_v3 = vsel %vm5065_vm6, %v3865_v24, %v3869_v47  ;;  %v3885_v1 = vshll.u32 %v3189_v2, 16 }
 0x2e0   :  { %v2751_v0 = vadd.f32 %v6549_v32, %v1955_v18  ;;  %v3888_v32 = vshrl.u32 %v3189_v2, 16  ;;  %v3901_v57 = vshll.u32 %v3195_v45, 16  ;;  %v3904_v48 = vshrl.u32 %v3195_v45, 16  ;;  %v6750_v45 = vld [vmem:[%s6984_s0 + $0xa8] sm:$0xf] }
 0x2e1   :  { %v6694_v42 = vpop.f32.mrf.mxu0  ;;  %v6767_v61 = vrot.slane %v6750_v45, 3 }
 0x2e2   :  { %v3895_v24 = vsel %vm5065_vm6, %v3888_v32, %v3893_v52  ;;  %v3903_v47 = vsel %vm5065_vm6, %v3896_v54, %v3901_v57  ;;  %v3910_v12 = vsel %vm5065_vm6, %v3904_v48, %v3908_v58 }
 0x2e3   :  { %v6705_v20 = vpop.f32.mrf.mxu2 }
 0x2e6   :  { %v4204_v21 = vld [vmem:[#allocation1] sm:$0xff] }
 0x2e7   :  { %4206 = vst [vmem:[#allocation1] ss:$9 sm:$0xff] %v3825_v10  ;;  %v6696_v19 = vpop.f32.mrf.mxu1 }
 0x2e8   :  { %4208 = vst [vmem:[#allocation1 + $0x1] ss:$9 sm:$0xff] %v3832_v7  ;;  %v3887_v7 = vsel %vm5065_vm6, %v3880_v40, %v3885_v1  ;;  %v3942_v1 = vsel %vm5065_vm6, %v3935_v60, %v3940_v14 }
 0x2e9   :  { %4210 = vst [vmem:[#allocation1 + $0x2] ss:$9 sm:$0xff] %v3840_v22  ;;  %v1957_v22 = vadd.f32 %v6557_v63, %v6555_v34  ;;  %v6731_v34 = vpop.f32.mrf.mxu0 }
 0x2ea   :  { %4212 = vst [vmem:[#allocation1 + $0x3] ss:$9 sm:$0xff] %v3848_v35 }
 0x2eb   :  { %4214 = vst [vmem:[#allocation1 + $0x4] ss:$9 sm:$0xff] %v3856_v5  ;;  %v2891_v5 = vrot.slane %v4800_v23, 3  ;;  %v6742_v2 = vpop.f32.mrf.mxu2  ;;  %v2752_v25 = vadd.f32 %v6592_v44, %v1957_v22 }
 0x2ec   :  { %4216 = vst [vmem:[#allocation1 + $0x5] ss:$9 sm:$0xff] %v3864_v55  ;;  %v3932_v55 = vshll.u32 %v3210_v51, 16 }
 0x2ed   :  { %4218 = vst [vmem:[#allocation1 + $0x6] ss:$9 sm:$0xff] %v3871_v3  ;;  %v3918_v3 = vsel %vm5065_vm6, %v3911_v53, %v3916_v26  ;;  %v3216_v52 = vsel %vm135_vm3, %v4800_v23, %v2891_v5 }
 0x2ee   :  { %4220 = vst [vmem:[#allocation1 + $0x7] ss:$9 sm:$0xff] %v3879_v43  ;;  %v4802_v43 = vld [vmem:[%s6984_s0 + $0xa4] sm:$0x3]  ;;  %v3934_v37 = vsel %vm5065_vm6, %v3927_v9, %v3932_v55  ;;  %v3947_v26 = vshll.u32 %v3216_v52, 16 }
 0x2ef   :  { %4937 = vmatmul.msk.bf16.gmra.mxu3 %vm1675_vm7, %v4204_v21  ;;  %v4801_v21 = vld [vmem:[%s6984_s0 + $0xa0] sm:$0xf]  ;;  %v6733_v63 = vpop.f32.mrf.mxu1  ;;  %v2893_v44 = vrot.slane %v4802_v43, 3 }
 0x2f0   :  { %v2892_v13 = vrot.slane %v4801_v21, 3  ;;  %v1970_v49 = vadd.f32 %v6733_v63, %v6731_v34 }
 0x2f1   :  { %v6771_v39 = vpop.f32.mrf.mxu0  ;;  %v3234_v22 = vsel %vm135_vm3, %v4802_v43, %v2893_v44 }
 0x2f2   :  { %v4324_v10 = vpop.f32.mrf.mxu3  ;;  %v3223_v38 = vsel %vm139_vm0, %v4801_v21, %v2892_v13  ;;  %v3226_v32 = vsel %vm143_vm1, %v4801_v21, %v2892_v13  ;;  %v3229_v8 = vsel %vm147_vm2, %v4801_v21, %v2892_v13  ;;  %v3222_v58 = vsel %vm135_vm3, %v4801_v21, %v2892_v13 }
 0x2f3   :  { %v4388_v31 = vadd.f32 %v4324_v10, %v2751_v0  ;;  %v3217_v0 = vsel %vm139_vm0, %v4800_v23, %v2891_v5  ;;  %v3225_v17 = vrot.slane %v3223_v38, 1  ;;  %v3228_v10 = vrot.slane %v3226_v32, 2  ;;  %v6787_v28 = vpop.f32.mrf.mxu2 }
 0x2f4   :  { %v3219_v54 = vrot.slane %v3217_v0, 1  ;;  %v3231_v51 = vrot.slane %v3229_v8, 3  ;;  %v3943_v23 = vshrl.u32 %v3213_v46, 16  ;;  %v3950_v21 = vshrl.u32 %v3216_v52, 16 }
 0x2f5   :  { %v4417_v35 = vadd.f32 %v6710_v6, %v4388_v31  ;;  %v4221_v15 = vld [vmem:[#allocation1] sm:$0xff]  ;;  %v3235_v31 = vsel %vm139_vm0, %v4802_v43, %v2893_v44  ;;  %v3963_v30 = vshll.u32 %v3225_v17, 16  ;;  %v3966_v5 = vshrl.u32 %v3225_v17, 16  ;;  %v4804_v43 = vld [vmem:[%s6984_s0 + $0xac] sm:$0x3] }
 0x2f6   :  { %4223 = vst [vmem:[#allocation1] ss:$9 sm:$0xff] %v3887_v7  ;;  %v2753_v7 = vadd.f32 %v6625_v59, %v1960_v16  ;;  %v3237_v59 = vrot.slane %v3235_v31, 1  ;;  %v3971_v4 = vshll.u32 %v3228_v10, 16  ;;  %v3974_v46 = vshrl.u32 %v3228_v10, 16 }
 0x2f7   :  { %v4442_v18 = vmax.f32 %v4417_v35, 0.0  ;;  %4225 = vst [vmem:[#allocation1 + $0x1] ss:$9 sm:$0xff] %v3895_v24  ;;  %v6773_v48 = vpop.f32.mrf.mxu1  ;;  %v6785_v24 = vsel %vm139_vm0, %v6750_v45, %v6767_v61  ;;  %v3979_v9 = vshll.u32 %v3231_v51, 16  ;;  %v3949_v13 = vsel %vm5065_vm6, %v3943_v23, %v3947_v26 }
 0x2f8   :  { %4227 = vst [vmem:[#allocation1 + $0x2] ss:$9 sm:$0xff] %v3903_v47  ;;  %v3955_v47 = vshll.u32 %v3219_v54, 16  ;;  %v3243_v60 = vrot.slane %v6785_v24, 1  ;;  %v3982_v0 = vshrl.u32 %v3231_v51, 16  ;;  %v3986_v16 = vshll.u32 %v3234_v22, 16 }
 0x2f9   :  { %v4467_v62 = vpack.c.bf16 %v4442_v18, %v4442_v18  ;;  %4229 = vst [vmem:[#allocation1 + $0x3] ss:$9 sm:$0xff] %v3910_v12  ;;  %v3958_v12 = vshrl.u32 %v3222_v58, 16  ;;  %v1962_v18 = vadd.f32 %v6645_v36, %v6643_v50  ;;  %v3973_v50 = vsel %vm5065_vm6, %v3966_v5, %v3971_v4  ;;  %v6813_v44 = vpop.f32.mrf.mxu0 }
 0x2fa   :  { %v4326_v33 = vpop.f32.mrf.mxu3  ;;  %4231 = vst [vmem:[#allocation1 + $0x4] ss:$9 sm:$0xff] %v3918_v3  ;;  %v3240_v3 = vsel %vm135_vm3, %v6750_v45, %v6767_v61  ;;  %v3957_v14 = vsel %vm5065_vm6, %v3950_v21, %v3955_v47  ;;  %v3981_v36 = vsel %vm5065_vm6, %v3974_v46, %v3979_v9  ;;  %v4002_v32 = vshll.u32 %v3243_v60, 16 }
 0x2fb   :  { %4493 = vst.msk [vmem:[%s6986_s3] sm:$0xf] %vm4492_vm8, %v4467_v62  ;;  %v4389_v40 = vadd.f32 %v4326_v33, %v2752_v25  ;;  %v3989_v33 = vshrl.u32 %v3234_v22, 16  ;;  %v2895_v8 = vrot.slane %v4804_v43, 3  ;;  %v3244_v52 = vsel %vm143_vm1, %v6750_v45, %v6767_v61  ;;  %v6820_v54 = vpop.f32.mrf.mxu2 }
 0x2fc   :  { %4233 = vst [vmem:[#allocation1 + $0x5] ss:$9 sm:$0xff] %v3926_v41  ;;  %v3965_v41 = vsel %vm5065_vm6, %v3958_v12, %v3963_v30  ;;  %v3247_v58 = vsel %vm147_vm2, %v6750_v45, %v6767_v61  ;;  %v3988_v10 = vsel %vm5065_vm6, %v3982_v0, %v3986_v16  ;;  %v1965_v51 = vadd.f32 %v6669_v11, %v6667_v29 }
 0x2fd   :  { %v4418_v57 = vadd.f32 %v6710_v6, %v4389_v40  ;;  %4235 = vst [vmem:[#allocation1 + $0x6] ss:$9 sm:$0xff] %v3934_v37  ;;  %v3994_v37 = vshll.u32 %v3237_v59, 16  ;;  %v3253_v61 = vsel %vm139_vm0, %v4804_v43, %v2895_v8  ;;  %v3249_v23 = vrot.slane %v3247_v58, 3 }
 0x2fe   :  { %4237 = vst [vmem:[#allocation1 + $0x7] ss:$9 sm:$0xff] %v3942_v1  ;;  %v3997_v1 = vshrl.u32 %v3240_v3, 16  ;;  %v3252_v22 = vsel %vm135_vm3, %v4804_v43, %v2895_v8  ;;  %v3255_v24 = vrot.slane %v3253_v61, 1  ;;  %v2755_v21 = vadd.f32 %v6678_v27, %v1965_v51 }
 0x2ff   :  { %v4443_v53 = vmax.f32 %v4418_v57, 0.0  ;;  %4938 = vmatmul.msk.bf16.gmra.mxu3 %vm1675_vm7, %v4221_v15  ;;  %v6815_v38 = vpop.f32.mrf.mxu1  ;;  %v2754_v57 = vadd.f32 %v6652_v56, %v1962_v18  ;;  %v4018_v30 = vshll.u32 %v3249_v23, 16  ;;  %v4021_v4 = vshrl.u32 %v3249_v23, 16 }
 0x300   :  { %v4004_v45 = vsel %vm5065_vm6, %v3997_v1, %v4002_v32  ;;  %v4025_v46 = vshll.u32 %v3252_v22, 16  ;;  %v1967_v3 = vadd.f32 %v6696_v19, %v6694_v42  ;;  %v2757_v32 = vadd.f32 %v6742_v2, %v1970_v49 }
 0x301   :  { %v4468_v35 = vpack.c.bf16 %v4443_v53, %v4443_v53  ;;  %v3246_v53 = vrot.slane %v3244_v52, 2  ;;  %v6840_v11 = vpop.f32.mrf.mxu0  ;;  %v1972_v34 = vadd.f32 %v6773_v48, %v6771_v39 }
 0x302   :  { %v4329_v15 = vpop.f32.mrf.mxu3 }
 0x303   :  { %4494 = vst.msk [vmem:[%s6986_s3 + $0x4] sm:$0xf] %vm4492_vm8, %v4468_v35  ;;  %v4390_v55 = vadd.f32 %v4329_v15, %v2753_v7  ;;  %v3996_v7 = vsel %vm5065_vm6, %v3989_v33, %v3994_v37  ;;  %v4005_v35 = vshrl.u32 %v3243_v60, 16  ;;  %v4010_v59 = vshll.u32 %v3246_v53, 16  ;;  %v6847_v15 = vpop.f32.mrf.mxu2 }
 0x304   :  { %v4013_v12 = vshrl.u32 %v3246_v53, 16  ;;  %v1975_v53 = vadd.f32 %v6815_v38, %v6813_v44 }
 0x305   :  { %v4419_v25 = vadd.f32 %v6710_v6, %v4390_v55  ;;  %v4238_v62 = vld [vmem:[#allocation1] sm:$0xff]  ;;  %v4028_v55 = vshrl.u32 %v3252_v22, 16  ;;  %v4012_v60 = vsel %vm5065_vm6, %v4005_v35, %v4010_v59 }
 0x306   :  { %4240 = vst [vmem:[#allocation1] ss:$9 sm:$0xff] %v3949_v13  ;;  %v4033_v13 = vshll.u32 %v3255_v24, 16  ;;  %v4020_v18 = vsel %vm5065_vm6, %v4013_v12, %v4018_v30 }
 0x307   :  { %v4444_v40 = vmax.f32 %v4419_v25, 0.0  ;;  %4242 = vst [vmem:[#allocation1 + $0x1] ss:$9 sm:$0xff] %v3957_v14  ;;  %v6842_v26 = vpop.f32.mrf.mxu1  ;;  %v4027_v25 = vsel %vm5065_vm6, %v4021_v4, %v4025_v46 }
 0x308   :  { %4244 = vst [vmem:[#allocation1 + $0x2] ss:$9 sm:$0xff] %v3965_v41  ;;  %v1977_v38 = vadd.f32 %v6842_v26, %v6840_v11 }
 0x309   :  { %v4469_v17 = vpack.c.bf16 %v4444_v40, %v4444_v40  ;;  %4246 = vst [vmem:[#allocation1 + $0x3] ss:$9 sm:$0xff] %v3973_v50  ;;  %v1736_v41 = vpop.f32.mrf.mxu0 }
 0x30a   :  { %v4331_v31 = vpop.f32.mrf.mxu3  ;;  %4248 = vst [vmem:[#allocation1 + $0x4] ss:$9 sm:$0xff] %v3981_v36  ;;  %v2756_v36 = vadd.f32 %v6705_v20, %v1967_v3  ;;  %v2760_v30 = vadd.f32 %v6847_v15, %v1977_v38 }
 0x30b   :  { %4495 = vst.msk [vmem:[%s6986_s3 + $0x8] sm:$0xf] %vm4492_vm8, %v4469_v17  ;;  %v4391_v56 = vadd.f32 %v4331_v31, %v2754_v57  ;;  %v2712_v50 = vpop.f32.mrf.mxu2  ;;  %v2758_v31 = vadd.f32 %v6787_v28, %v1972_v34 }
 0x30c   :  { %4250 = vst [vmem:[#allocation1 + $0x5] ss:$9 sm:$0xff] %v3988_v10 }
 0x30d   :  { %v4420_v29 = vadd.f32 %v6710_v6, %v4391_v56  ;;  %4252 = vst [vmem:[#allocation1 + $0x6] ss:$9 sm:$0xff] %v3996_v7 }
 0x30e   :  { %4254 = vst [vmem:[#allocation1 + $0x7] ss:$9 sm:$0xff] %v4004_v45 }
 0x30f   :  { %v4445_v47 = vmax.f32 %v4420_v29, 0.0  ;;  %4939 = vmatmul.msk.bf16.gmra.mxu3 %vm1675_vm7, %v4238_v62  ;;  %v4035_v62 = vsel %vm5065_vm6, %v4028_v55, %v4033_v13  ;;  %v1979_v0 = vpop.f32.mrf.mxu1  ;;  %v2759_v29 = vadd.f32 %v6820_v54, %v1975_v53 }
 0x310   :  { %v1980_v46 = vadd.f32 %v1979_v0, %v1736_v41 }
 0x311   :  { %v4470_v5 = vpack.c.bf16 %v4445_v47, %v4445_v47  ;;  %v1738_v40 = vpop.f32.mrf.mxu0 }
 0x312   :  { %v4334_v9 = vpop.f32.mrf.mxu3  ;;  %v2761_v13 = vadd.f32 %v2712_v50, %v1980_v46 }
 0x313   :  { %4496 = vst.msk [vmem:[%s6986_s3 + $0xc] sm:$0xf] %vm4492_vm8, %v4470_v5  ;;  %v4392_v27 = vadd.f32 %v4334_v9, %v2755_v21  ;;  %v2714_v20 = vpop.f32.mrf.mxu2 }
 0x315   :  { %v4421_v14 = vadd.f32 %v6710_v6, %v4392_v27  ;;  %v4255_v43 = vld [vmem:[#allocation1] sm:$0xff] }
 0x316   :  { %4257 = vst [vmem:[#allocation1] ss:$9 sm:$0xff] %v4012_v60 }
 0x317   :  { %v4446_v16 = vmax.f32 %v4421_v14, 0.0  ;;  %4259 = vst [vmem:[#allocation1 + $0x1] ss:$9 sm:$0xff] %v4020_v18  ;;  %v1981_v1 = vpop.f32.mrf.mxu1 }
 0x318   :  { %4261 = vst [vmem:[#allocation1 + $0x2] ss:$9 sm:$0xff] %v4027_v25  ;;  %v1982_v14 = vadd.f32 %v1981_v1, %v1738_v40 }
 0x319   :  { %v4471_v33 = vpack.c.bf16 %v4446_v16, %v4446_v16  ;;  %4263 = vst [vmem:[#allocation1 + $0x3] ss:$9 sm:$0xff] %v4035_v62  ;;  %v1741_v58 = vpop.f32.mrf.mxu0 }
 0x31a   :  { %v4336_v42 = vpop.f32.mrf.mxu3  ;;  %v2762_v16 = vadd.f32 %v2714_v20, %v1982_v14 }
 0x31b   :  { %4497 = vst.msk [vmem:[%s6986_s3 + $0x10] sm:$0xf] %vm4492_vm8, %v4471_v33  ;;  %v4393_v19 = vadd.f32 %v4336_v42, %v2756_v36  ;;  %v2717_v51 = vpop.f32.mrf.mxu2 }
 0x31d   :  { %v4422_v37 = vadd.f32 %v6710_v6, %v4393_v19 }
 0x31f   :  { %v4447_v8 = vmax.f32 %v4422_v37, 0.0  ;;  %4940 = vmatmul.msk.bf16.gmra.mxu3 %vm1675_vm7, %v4255_v43  ;;  %v1984_v10 = vpop.f32.mrf.mxu1 }
 0x320   :  { %v4264_v39 = vld [vmem:[#allocation1] sm:$0xff]  ;;  %v1985_v33 = vadd.f32 %v1984_v10, %v1741_v58 }
 0x321   :  { %v4472_v52 = vpack.c.bf16 %v4447_v8, %v4447_v8  ;;  %v1743_v61 = vpop.f32.mrf.mxu0 }
 0x322   :  { %v4339_v57 = vpop.f32.mrf.mxu3  ;;  %v2763_v40 = vadd.f32 %v2717_v51, %v1985_v33 }
 0x323   :  { %4498 = vst.msk [vmem:[%s6986_s3 + $0x14] sm:$0xf] %vm4492_vm8, %v4472_v52  ;;  %v4394_v17 = vadd.f32 %v4339_v57, %v2757_v32  ;;  %v2719_v28 = vpop.f32.mrf.mxu2 }
 0x325   :  { %v4423_v63 = vadd.f32 %v6710_v6, %v4394_v17 }
 0x327   :  { %v4448_v2 = vmax.f32 %v4423_v63, 0.0  ;;  %v1986_v23 = vpop.f32.mrf.mxu1 }
 0x328   :  { %v1987_v57 = vadd.f32 %v1986_v23, %v1743_v61 }
 0x329   :  { %v4473_v7 = vpack.c.bf16 %v4448_v2, %v4448_v2  ;;  %v1746_v35 = vpop.f32.mrf.mxu0 }
 0x32a   :  { %v4341_v56 = vpop.f32.mrf.mxu3  ;;  %v2764_v2 = vadd.f32 %v2719_v28, %v1987_v57 }
 0x32b   :  { %4499 = vst.msk [vmem:[%s6986_s3 + $0x18] sm:$0xf] %vm4492_vm8, %v4473_v7  ;;  %v4395_v45 = vadd.f32 %v4341_v56, %v2758_v31  ;;  %v2722_v12 = vpop.f32.mrf.mxu2 }
 0x32d   :  { %v4424_v48 = vadd.f32 %v6710_v6, %v4395_v45 }
 0x32f   :  { %v4449_v22 = vmax.f32 %v4424_v48, 0.0  ;;  %4941 = vmatmul.msk.bf16.gmra.mxu3 %vm1675_vm7, %v4264_v39  ;;  %v1989_v59 = vpop.f32.mrf.mxu1 }
 0x330   :  { %v1990_v7 = vadd.f32 %v1989_v59, %v1746_v35 }
 0x331   :  { %v4474_v24 = vpack.c.bf16 %v4449_v22, %v4449_v22  ;;  %v1748_v11 = vpop.f32.mrf.mxu0 }
 0x332   :  { %v4344_v21 = vpop.f32.mrf.mxu3  ;;  %v2765_v48 = vadd.f32 %v2722_v12, %v1990_v7 }
 0x333   :  { %4500 = vst.msk [vmem:[%s6986_s3 + $0x1c] sm:$0xf] %vm4492_vm8, %v4474_v24  ;;  %v4396_v44 = vadd.f32 %v4344_v21, %v2759_v29  ;;  %v2724_v60 = vpop.f32.mrf.mxu2 }
 0x335   :  { %v4425_v47 = vadd.f32 %v6710_v6, %v4396_v44 }
 0x337   :  { %v4450_v54 = vmax.f32 %v4425_v47, 0.0  ;;  %v1991_v26 = vpop.f32.mrf.mxu1 }
 0x338   :  { %v1992_v24 = vadd.f32 %v1991_v26, %v1748_v11 }
 0x339   :  { %v4475_v5 = vpack.c.bf16 %v4450_v54, %v4450_v54  ;;  %v1751_v25 = vpop.f32.mrf.mxu0 }
 0x33a   :  { %v4346_v4 = vpop.f32.mrf.mxu3  ;;  %v2766_v59 = vadd.f32 %v2724_v60, %v1992_v24 }
 0x33b   :  { %4501 = vst.msk [vmem:[%s6986_s3 + $0x20] sm:$0xf] %vm4492_vm8, %v4475_v5  ;;  %v4397_v9 = vadd.f32 %v4346_v4, %v2760_v30  ;;  %v2727_v0 = vpop.f32.mrf.mxu2 }
 0x33d   :  { %v4426_v55 = vadd.f32 %v6710_v6, %v4397_v9 }
 0x33f   :  { %v4451_v27 = vmax.f32 %v4426_v55, 0.0  ;;  %v1994_v62 = vpop.f32.mrf.mxu1 }
 0x340   :  { %v1995_v30 = vadd.f32 %v1994_v62, %v1751_v25 }
 0x341   :  { %v4476_v18 = vpack.c.bf16 %v4451_v27, %v4451_v27  ;;  %v1753_v19 = vpop.f32.mrf.mxu0 }
 0x342   :  { %v4349_v3 = vpop.f32.mrf.mxu3  ;;  %v2767_v55 = vadd.f32 %v2727_v0, %v1995_v30 }
 0x343   :  { %4502 = vst.msk [vmem:[%s6986_s3 + $0x24] sm:$0xf] %vm4492_vm8, %v4476_v18  ;;  %v4398_v15 = vadd.f32 %v4349_v3, %v2761_v13  ;;  %v2729_v32 = vpop.f32.mrf.mxu2 }
 0x345   :  { %v4427_v43 = vadd.f32 %v6710_v6, %v4398_v15 }
 0x347   :  { %v4452_v41 = vmax.f32 %v4427_v43, 0.0  ;;  %v1996_v37 = vpop.f32.mrf.mxu1 }
 0x348   :  { %v1997_v18 = vadd.f32 %v1996_v37, %v1753_v19 }
 0x349   :  { %v4477_v36 = vpack.c.bf16 %v4452_v41, %v4452_v41  ;;  %v1756_v34 = vpop.f32.mrf.mxu0 }
 0x34a   :  { %v4351_v50 = vpop.f32.mrf.mxu3  ;;  %v2768_v62 = vadd.f32 %v2729_v32, %v1997_v18 }
 0x34b   :  { %4503 = vst.msk [vmem:[%s6986_s3 + $0x28] sm:$0xf] %vm4492_vm8, %v4477_v36  ;;  %v4399_v42 = vadd.f32 %v4351_v50, %v2762_v16  ;;  %v2732_v10 = vpop.f32.mrf.mxu2 }
 0x34d   :  { %v4428_v49 = vadd.f32 %v6710_v6, %v4399_v42 }
 0x34f   :  { %v4453_v1 = vmax.f32 %v4428_v49, 0.0  ;;  %v1999_v63 = vpop.f32.mrf.mxu1 }
 0x350   :  { %v2000_v16 = vadd.f32 %v1999_v63, %v1756_v34 }
 0x351   :  { %v4478_v8 = vpack.c.bf16 %v4453_v1, %v4453_v1  ;;  %v1758_v45 = vpop.f32.mrf.mxu0 }
 0x352   :  { %v4354_v52 = vpop.f32.mrf.mxu3  ;;  %v2769_v49 = vadd.f32 %v2732_v10, %v2000_v16 }
 0x353   :  { %4504 = vst.msk [vmem:[%s6986_s3 + $0x2c] sm:$0xf] %vm4492_vm8, %v4478_v8  ;;  %v4400_v20 = vadd.f32 %v4354_v52, %v2763_v40  ;;  %v2734_v23 = vpop.f32.mrf.mxu2 }
 0x355   :  { %v4429_v17 = vadd.f32 %v6710_v6, %v4400_v20 }
 0x357   :  { %v4454_v58 = vmax.f32 %v4429_v17, 0.0  ;;  %v2001_v39 = vpop.f32.mrf.mxu1 }
 0x358   :  { %v2002_v8 = vadd.f32 %v2001_v39, %v1758_v45 }
 0x359   :  { %v4479_v31 = vpack.c.bf16 %v4454_v58, %v4454_v58  ;;  %v1761_v44 = vpop.f32.mrf.mxu0 }
 0x35a   :  { %v4356_v51 = vpop.f32.mrf.mxu3  ;;  %v2770_v63 = vadd.f32 %v2734_v23, %v2002_v8 }
 0x35b   :  { %4505 = vst.msk [vmem:[%s6986_s3 + $0x30] sm:$0xf] %vm4492_vm8, %v4479_v31  ;;  %v4401_v56 = vadd.f32 %v4356_v51, %v2764_v2  ;;  %v2737_v35 = vpop.f32.mrf.mxu2 }
 0x35d   :  { %v4430_v53 = vadd.f32 %v6710_v6, %v4401_v56 }
 0x35f   :  { %v4455_v61 = vmax.f32 %v4430_v53, 0.0  ;;  %v2004_v38 = vpop.f32.mrf.mxu1 }
 0x360   :  { %v2005_v2 = vadd.f32 %v2004_v38, %v1761_v44 }
 0x361   :  { %v4480_v29 = vpack.c.bf16 %v4455_v61, %v4455_v61  ;;  %v1763_v46 = vpop.f32.mrf.mxu0 }
 0x362   :  { %v4359_v22 = vpop.f32.mrf.mxu3  ;;  %v2771_v53 = vadd.f32 %v2737_v35, %v2005_v2 }
 0x363   :  { %4506 = vst.msk [vmem:[%s6986_s3 + $0x34] sm:$0xf] %vm4492_vm8, %v4480_v29  ;;  %v4402_v28 = vadd.f32 %v4359_v22, %v2765_v48  ;;  %v2739_v26 = vpop.f32.mrf.mxu2 }
 0x365   :  { %v4431_v21 = vadd.f32 %v6710_v6, %v4402_v28 }
 0x367   :  { %v4456_v47 = vmax.f32 %v4431_v21, 0.0  ;;  %v2006_v9 = vpop.f32.mrf.mxu1 }
 0x368   :  { %v2007_v29 = vadd.f32 %v2006_v9, %v1763_v46 }
 0x369   :  { %v4481_v54 = vpack.c.bf16 %v4456_v47, %v4456_v47  ;;  %v1766_v15 = vpop.f32.mrf.mxu0 }
 0x36a   :  { %v4361_v12 = vpop.f32.mrf.mxu3  ;;  %v2772_v24 = vadd.f32 %v2739_v26, %v2007_v29 }
 0x36b   :  { %4507 = vst.msk [vmem:[%s6986_s3 + $0x38] sm:$0xf] %vm4492_vm8, %v4481_v54  ;;  %v4403_v5 = vadd.f32 %v4361_v12, %v2766_v59  ;;  %v2742_v25 = vpop.f32.mrf.mxu2 }
 0x36d   :  { %v4432_v4 = vadd.f32 %v6710_v6, %v4403_v5 }
 0x36f   :  { %v4457_v11 = vmax.f32 %v4432_v4, 0.0  ;;  %v2009_v14 = vpop.f32.mrf.mxu1 }
 0x370   :  { %v2010_v38 = vadd.f32 %v2009_v14, %v1766_v15 }
 0x371   :  { %v4482_v13 = vpack.c.bf16 %v4457_v11, %v4457_v11  ;;  %v1768_v33 = vpop.f32.mrf.mxu0 }
 0x372   :  { %v4364_v27 = vpop.f32.mrf.mxu3  ;;  %v2773_v59 = vadd.f32 %v2742_v25, %v2010_v38 }
 0x373   :  { %4508 = vst.msk [vmem:[%s6986_s3 + $0x3c] sm:$0xf] %vm4492_vm8, %v4482_v13  ;;  %v4404_v60 = vadd.f32 %v4364_v27, %v2767_v55  ;;  %v2744_v37 = vpop.f32.mrf.mxu2 }
 0x375   :  { %v4433_v3 = vadd.f32 %v6710_v6, %v4404_v60 }
 0x377   :  { %v4458_v43 = vmax.f32 %v4433_v3, 0.0  ;;  %v2011_v42 = vpop.f32.mrf.mxu1 }
 0x378   :  { %v2012_v4 = vadd.f32 %v2011_v42, %v1768_v33 }
 0x379   :  { %v4483_v41 = vpack.c.bf16 %v4458_v43, %v4458_v43  ;;  %v1771_v20 = vpop.f32.mrf.mxu0 }
 0x37a   :  { %v4366_v0 = vpop.f32.mrf.mxu3  ;;  %v2774_v55 = vadd.f32 %v2744_v37, %v2012_v4 }
 0x37b   :  { %4509 = vst.msk [vmem:[%s6986_s3 + $0x40] sm:$0xf] %vm4492_vm8, %v4483_v41  ;;  %v4405_v36 = vadd.f32 %v4366_v0, %v2768_v62  ;;  %v2747_v34 = vpop.f32.mrf.mxu2 }
 0x37d   :  { %v4434_v50 = vadd.f32 %v6710_v6, %v4405_v36 }
 0x37f   :  { %v4459_v19 = vmax.f32 %v4434_v50, 0.0  ;;  %v2014_v57 = vpop.f32.mrf.mxu1 }
 0x380   :  { %v2015_v13 = vadd.f32 %v2014_v57, %v1771_v20 }
 0x381   :  { %v4484_v40 = vpack.c.bf16 %v4459_v19, %v4459_v19  ;;  %v1773_v7 = vpop.f32.mrf.mxu0 }
 0x382   :  { %v4369_v1 = vpop.f32.mrf.mxu3  ;;  %v2775_v18 = vadd.f32 %v2747_v34, %v2015_v13 }
 0x383   :  { %4510 = vst.msk [vmem:[%s6986_s3 + $0x44] sm:$0xf] %vm4492_vm8, %v4484_v40  ;;  %v4406_v32 = vadd.f32 %v4369_v1, %v2769_v49  ;;  %v2749_v39 = vpop.f32.mrf.mxu2 }
 0x385   :  { %v4435_v52 = vadd.f32 %v6710_v6, %v4406_v32 }
 0x387   :  { %v4460_v17 = vmax.f32 %v4435_v52, 0.0  ;;  %v2016_v56 = vpop.f32.mrf.mxu1 }
 0x389   :  { %v4485_v58 = vpack.c.bf16 %v4460_v17, %v4460_v17 }
 0x38a   :  { %v4371_v10 = vpop.f32.mrf.mxu3 }
 0x38b   :  { %4511 = vst.msk [vmem:[%s6986_s3 + $0x48] sm:$0xf] %vm4492_vm8, %v4485_v58  ;;  %v4407_v31 = vadd.f32 %v4371_v10, %v2770_v63 }
 0x38d   :  { %v4436_v51 = vadd.f32 %v6710_v6, %v4407_v31 }
 0x38f   :  { %v4461_v45 = vmax.f32 %v4436_v51, 0.0 }
 0x391   :  { %v4486_v48 = vpack.c.bf16 %v4461_v45, %v4461_v45 }
 0x392   :  { %v4374_v61 = vpop.f32.mrf.mxu3 }
 0x393   :  { %4512 = vst.msk [vmem:[%s6986_s3 + $0x4c] sm:$0xf] %vm4492_vm8, %v4486_v48  ;;  %v4408_v23 = vadd.f32 %v4374_v61, %v2771_v53 }
 0x395   :  { %v4437_v22 = vadd.f32 %v6710_v6, %v4408_v23 }
 0x397   :  { %v4462_v28 = vmax.f32 %v4437_v22, 0.0 }
 0x399   :  { %v4487_v21 = vpack.c.bf16 %v4462_v28, %v4462_v28 }
 0x39a   :  { %v4376_v44 = vpop.f32.mrf.mxu3 }
 0x39b   :  { %4513 = vst.msk [vmem:[%s6986_s3 + $0x50] sm:$0xf] %vm4492_vm8, %v4487_v21  ;;  %v4409_v47 = vadd.f32 %v4376_v44, %v2772_v24 }
 0x39d   :  { %v4438_v35 = vadd.f32 %v6710_v6, %v4409_v47 }
 0x39f   :  { %v4463_v54 = vmax.f32 %v4438_v35, 0.0 }
 0x3a1   :  { %v4488_v12 = vpack.c.bf16 %v4463_v54, %v4463_v54 }
 0x3a2   :  { %v4379_v30 = vpop.f32.mrf.mxu3 }
 0x3a3   :  { %4514 = vst.msk [vmem:[%s6986_s3 + $0x54] sm:$0xf] %vm4492_vm8, %v4488_v12  ;;  %v4410_v5 = vadd.f32 %v4379_v30, %v2773_v59 }
 0x3a5   :  { %v4439_v46 = vadd.f32 %v6710_v6, %v4410_v5 }
 0x3a7   :  { %v4464_v9 = vmax.f32 %v4439_v46, 0.0 }
 0x3a9   :  { %v4489_v11 = vpack.c.bf16 %v4464_v9, %v4464_v9 }
 0x3aa   :  { %v4381_v26 = vpop.f32.mrf.mxu3 }
 0x3ab   :  { %4515 = vst.msk [vmem:[%s6986_s3 + $0x58] sm:$0xf] %vm4492_vm8, %v4489_v11  ;;  %v4411_v27 = vadd.f32 %v4381_v26, %v2774_v55 }
 0x3ad   :  { %v4440_v60 = vadd.f32 %v6710_v6, %v4411_v27 }
 0x3af   :  { %v4465_v3 = vmax.f32 %v4440_v60, 0.0 }
 0x3b1   :  { %v4490_v15 = vpack.c.bf16 %v4465_v3, %v4465_v3 }
 0x3b2   :  { %v4384_v14 = vpop.f32.mrf.mxu3 }
 0x3b3   :  { %4516 = vst.msk [vmem:[%s6986_s3 + $0x5c] sm:$0xf] %vm4492_vm8, %v4490_v15  ;;  %v4412_v43 = vadd.f32 %v4384_v14, %v2775_v18 }
 0x3b5   :  { %v4441_v25 = vadd.f32 %v6710_v6, %v4412_v43 }
 0x3b7   :  { %v4466_v62 = vmax.f32 %v4441_v25, 0.0 }
 0x3b9   :  { %v4491_v41 = vpack.c.bf16 %v4466_v62, %v4466_v62 }
 0x3ba   :  { %v4386_v0 = vpop.f32.mrf.mxu3 }
 0x3bb   :  { %4517 = vst.msk [vmem:[%s6986_s3 + $0x60] sm:$0xf] %vm4492_vm8, %v4491_v41 }

// kernel: dqn_forward.4
= control target key start
LH: loop header
LB: loop body
LE: loop exit
PB: predicated region body
PF: predicated region fallthrough
CT: control target
= control target key end

     0   :  { %vm494_vm0 = vcmask 257024   ;;  %s1092_s1 = inlined_call_operand.vmem [shape: bf16[256,32], index: 1, kind: input, shape index: {}]   ;;  %s1093_s2 = inlined_call_operand.vmem [shape: f32[1,32], index: 2, kind: input, shape index: {}]   ;;  %s1094_s0 = inlined_call_operand.vmem [shape: bf16[200,256], index: 0, kind: input, shape index: {}]   ;;  %s1095_s3 = inlined_call_operand.vmem [shape: bf16[200,32], index: 3, kind: output, shape index: {}]  }
   0x1   :  { %v715_v0 = vld [vmem:[%s1092_s1 + $0x38] sm:$0xff]  ;;  %v714_v2 = vld [vmem:[%s1092_s1 + $0x30] sm:$0xff]  ;;  %v713_v4 = vld [vmem:[%s1092_s1 + $0x28] sm:$0xff] }
   0x2   :  { %v723_v1 = vld [vmem:[%s1092_s1 + $0x78] sm:$0xff]  ;;  %298 = vmatpush.bf16.msra.mxu0 %v715_v0  ;;  %724 = vmatpush.bf16.msra.mxu2 %v715_v0  ;;  %v722_v3 = vld [vmem:[%s1092_s1 + $0x70] sm:$0xff]  ;;  %v721_v5 = vld [vmem:[%s1092_s1 + $0x68] sm:$0xff] }
   0x3   :  { %371 = vmatpush.bf16.msra.mxu1 %v723_v1  ;;  %732 = vmatpush.bf16.msra.mxu3 %v723_v1  ;;  %v712_v6 = vld [vmem:[%s1092_s1 + $0x20] sm:$0xff]  ;;  %v711_v8 = vld [vmem:[%s1092_s1 + $0x18] sm:$0xff]  ;;  %v710_v10 = vld [vmem:[%s1092_s1 + $0x10] sm:$0xff] }
   0x4   :  { %v720_v7 = vld [vmem:[%s1092_s1 + $0x60] sm:$0xff]  ;;  %v719_v9 = vld [vmem:[%s1092_s1 + $0x58] sm:$0xff]  ;;  %v718_v11 = vld [vmem:[%s1092_s1 + $0x50] sm:$0xff] }
   0x5   :  { %v709_v12 = vld [vmem:[%s1092_s1 + $0x8] sm:$0xff]  ;;  %v708_v14 = vld [vmem:[%s1092_s1] sm:$0xff]  ;;  %v698_v22 = vld [vmem:[%s1094_s0 + $0x74] sm:$0xf] }
   0x6   :  { %299 = vmatpush.bf16.msra.mxu0 %v714_v2  ;;  %725 = vmatpush.bf16.msra.mxu2 %v714_v2  ;;  %v717_v13 = vld [vmem:[%s1092_s1 + $0x48] sm:$0xff]  ;;  %v716_v15 = vld [vmem:[%s1092_s1 + $0x40] sm:$0xff]  ;;  %v584_v23 = vld [vmem:[%s1094_s0 + $0x78] sm:$0xf0] }
   0x7   :  { %372 = vmatpush.bf16.msra.mxu1 %v722_v3  ;;  %733 = vmatpush.bf16.msra.mxu3 %v722_v3  ;;  %v526_v16 = vld [vmem:[%s1094_s0] sm:$0xf]  ;;  %v685_v17 = vld [vmem:[%s1094_s0 + $0x4] sm:$0xf0]  ;;  %v684_v20 = vld [vmem:[%s1094_s0 + $0x4] sm:$0xf]  ;;  %v587_v27 = vor.u32 %v698_v22, %v584_v23 }
   0x8   :  { %v574_v18 = vld [vmem:[%s1094_s0 + $0x60] sm:$0xf]  ;;  %v697_v19 = vld [vmem:[%s1094_s0 + $0x64] sm:$0xf0]  ;;  %v528_v21 = vld [vmem:[%s1094_s0 + $0x8] sm:$0xf0]  ;;  %v527_v24 = vor.u32 %v685_v17, %v526_v16 }
   0x9   :  { %v575_v25 = vor.u32 %v697_v19, %v574_v18  ;;  %v531_v26 = vor.u32 %v684_v20, %v528_v21  ;;  %v534_v28 = vld [vmem:[%s1094_s0 + $0x10] sm:$0xf]  ;;  %v687_v29 = vld [vmem:[%s1094_s0 + $0x14] sm:$0xf0]  ;;  %v686_v32 = vld [vmem:[%s1094_s0 + $0x14] sm:$0xf] }
   0xa   :  { %300 = vmatpush.bf16.msra.mxu0 %v713_v4  ;;  %726 = vmatpush.bf16.msra.mxu2 %v713_v4  ;;  %v582_v30 = vld [vmem:[%s1094_s0 + $0x70] sm:$0xf]  ;;  %v699_v31 = vld [vmem:[%s1094_s0 + $0x74] sm:$0xf0]  ;;  %v536_v33 = vld [vmem:[%s1094_s0 + $0x18] sm:$0xf0]  ;;  %v535_v36 = vor.u32 %v687_v29, %v534_v28 }
   0xb   :  { %373 = vmatpush.bf16.msra.mxu1 %v721_v5  ;;  %734 = vmatpush.bf16.msra.mxu3 %v721_v5  ;;  %v700_v34 = vld [vmem:[%s1094_s0 + $0x84] sm:$0xf]  ;;  %v592_v35 = vld [vmem:[%s1094_s0 + $0x88] sm:$0xf0]  ;;  %v583_v37 = vor.u32 %v699_v31, %v582_v30  ;;  %v539_v38 = vor.u32 %v686_v32, %v536_v33  ;;  %v542_v40 = vld [vmem:[%s1094_s0 + $0x20] sm:$0xf] }
   0xc   :  { %v595_v39 = vor.u32 %v700_v34, %v592_v35  ;;  %v689_v41 = vld [vmem:[%s1094_s0 + $0x24] sm:$0xf0]  ;;  %v590_v42 = vld [vmem:[%s1094_s0 + $0x80] sm:$0xf]  ;;  %v688_v44 = vld [vmem:[%s1094_s0 + $0x24] sm:$0xf] }
   0xd   :  { %v701_v43 = vld [vmem:[%s1094_s0 + $0x84] sm:$0xf0]  ;;  %v544_v45 = vld [vmem:[%s1094_s0 + $0x28] sm:$0xf0]  ;;  %v702_v46 = vld [vmem:[%s1094_s0 + $0x94] sm:$0xf]  ;;  %v543_v48 = vor.u32 %v689_v41, %v542_v40 }
   0xe   :  { %301 = vmatpush.bf16.msra.mxu0 %v712_v6  ;;  %727 = vmatpush.bf16.msra.mxu2 %v712_v6  ;;  %v600_v47 = vld [vmem:[%s1094_s0 + $0x98] sm:$0xf0]  ;;  %v591_v49 = vor.u32 %v701_v43, %v590_v42  ;;  %v547_v50 = vor.u32 %v688_v44, %v544_v45  ;;  %v550_v52 = vld [vmem:[%s1094_s0 + $0x30] sm:$0xf]  ;;  %v691_v53 = vld [vmem:[%s1094_s0 + $0x34] sm:$0xf0] }
   0xf   :  { %374 = vmatpush.bf16.msra.mxu1 %v720_v7  ;;  %735 = vmatpush.bf16.msra.mxu3 %v720_v7  ;;  %v603_v51 = vor.u32 %v702_v46, %v600_v47  ;;  %v598_v54 = vld [vmem:[%s1094_s0 + $0x90] sm:$0xf]  ;;  %v703_v55 = vld [vmem:[%s1094_s0 + $0x94] sm:$0xf0]  ;;  %v690_v56 = vld [vmem:[%s1094_s0 + $0x34] sm:$0xf]  ;;  %v551_v60 = vor.u32 %v691_v53, %v550_v52 }
  0x10   :  { %v552_v57 = vld [vmem:[%s1094_s0 + $0x38] sm:$0xf0]  ;;  %v704_v58 = vld [vmem:[%s1094_s0 + $0xa4] sm:$0xf]  ;;  %v608_v59 = vld [vmem:[%s1094_s0 + $0xa8] sm:$0xf0]  ;;  %v599_v61 = vor.u32 %v703_v55, %v598_v54 }
  0x11   :  { %v555_v62 = vor.u32 %v690_v56, %v552_v57  ;;  %v611_v63 = vor.u32 %v704_v58, %v608_v59  ;;  %v558_v0 = vld [vmem:[%s1094_s0 + $0x40] sm:$0xf]  ;;  %v693_v1 = vld [vmem:[%s1094_s0 + $0x44] sm:$0xf0]  ;;  %v692_v4 = vld [vmem:[%s1094_s0 + $0x44] sm:$0xf] }
  0x12   :  { %302 = vmatpush.bf16.msra.mxu0 %v711_v8  ;;  %728 = vmatpush.bf16.msra.mxu2 %v711_v8  ;;  %v606_v2 = vld [vmem:[%s1094_s0 + $0xa0] sm:$0xf]  ;;  %v705_v3 = vld [vmem:[%s1094_s0 + $0xa4] sm:$0xf0]  ;;  %v560_v5 = vld [vmem:[%s1094_s0 + $0x48] sm:$0xf0]  ;;  %v559_v8 = vor.u32 %v693_v1, %v558_v0 }
  0x13   :  { %375 = vmatpush.bf16.msra.mxu1 %v719_v9  ;;  %736 = vmatpush.bf16.msra.mxu3 %v719_v9  ;;  %v706_v6 = vld [vmem:[%s1094_s0 + $0xb4] sm:$0xf]  ;;  %v616_v7 = vld [vmem:[%s1094_s0 + $0xb8] sm:$0xf0]  ;;  %v607_v9 = vor.u32 %v705_v3, %v606_v2  ;;  %v707_v16 = vld [vmem:[%s1094_s0 + $0xb4] sm:$0xf0] }
  0x14   :  { %v694_v18 = vld [vmem:[%s1094_s0 + $0x54] sm:$0xf]  ;;  %v568_v19 = vld [vmem:[%s1094_s0 + $0x58] sm:$0xf0]  ;;  %v959_v29 = vld [vmem:[%s1093_s2] ss:$0 sm:$0xff] }
  0x15   :  { %v571_v22 = vor.u32 %v694_v18, %v568_v19 }
  0x16   :  { %303 = vmatpush.bf16.msra.mxu0 %v710_v10  ;;  %729 = vmatpush.bf16.msra.mxu2 %v710_v10  ;;  %v563_v10 = vor.u32 %v692_v4, %v560_v5 }
  0x17   :  { %376 = vmatpush.bf16.msra.mxu1 %v718_v11  ;;  %737 = vmatpush.bf16.msra.mxu3 %v718_v11  ;;  %v619_v11 = vor.u32 %v706_v6, %v616_v7 }
  0x1a   :  { %304 = vmatpush.bf16.msra.mxu0 %v709_v12  ;;  %730 = vmatpush.bf16.msra.mxu2 %v709_v12  ;;  %v38_v12 = vld [vmem:[%s1094_s0 + $0xc0] sm:$0xff] }
  0x1b   :  { %377 = vmatpush.bf16.msra.mxu1 %v717_v13  ;;  %738 = vmatpush.bf16.msra.mxu3 %v717_v13  ;;  %v566_v13 = vld [vmem:[%s1094_s0 + $0x50] sm:$0xf]  ;;  %v149_v17 = vunpack.c.h.b16 %v38_v12 }
  0x1d   :  { %v175_v23 = vpack.c.b16 %v149_v17, %v149_v17 }
  0x1e   :  { %305 = vmatpush.bf16.msra.mxu0 %v708_v14  ;;  %731 = vmatpush.bf16.msra.mxu2 %v708_v14  ;;  %v695_v14 = vld [vmem:[%s1094_s0 + $0x54] sm:$0xf0] }
  0x1f   :  { %378 = vmatpush.bf16.msra.mxu1 %v716_v15  ;;  %739 = vmatpush.bf16.msra.mxu3 %v716_v15  ;;  %v614_v15 = vld [vmem:[%s1094_s0 + $0xb0] sm:$0xf]  ;;  %v567_v20 = vor.u32 %v695_v14, %v566_v13 }
  0x20   :  { %v615_v21 = vor.u32 %v707_v16, %v614_v15 }
  0x21   :  { %306 = vmatmul.bf16.vlgmr.msra.gmra.mxu0 %v527_v24  ;;  %336 = vmatmul.bf16.vlgmr.msra.gmra.mxu2 %v575_v25  ;;  %v148_v24 = vunpack.c.l.b16 %v38_v12  ;;  %v696_v25 = vld [vmem:[%s1094_s0 + $0x64] sm:$0xf] }
  0x22   :  { %379 = vmatmul.bf16.vlgmr.msra.gmra.mxu1 %v531_v26  ;;  %414 = vmatmul.bf16.vlgmr.msra.gmra.mxu3 %v587_v27  ;;  %v576_v26 = vld [vmem:[%s1094_s0 + $0x68] sm:$0xf0] }
  0x23   :  { %v174_v27 = vpack.c.b16 %v148_v24, %v148_v24  ;;  %v579_v28 = vor.u32 %v696_v25, %v576_v26 }
  0x31   :  { %311 = vmatmul.bf16.gmra.mxu0 %v535_v36  ;;  %341 = vmatmul.bf16.gmra.mxu2 %v583_v37 }
  0x32   :  { %384 = vmatmul.bf16.gmra.mxu1 %v539_v38  ;;  %419 = vmatmul.bf16.gmra.mxu3 %v595_v39 }
  0x41   :  { %316 = vmatmul.bf16.gmra.mxu0 %v543_v48  ;;  %346 = vmatmul.bf16.gmra.mxu2 %v591_v49 }
  0x42   :  { %389 = vmatmul.bf16.gmra.mxu1 %v547_v50  ;;  %424 = vmatmul.bf16.gmra.mxu3 %v603_v51 }
  0x51   :  { %321 = vmatmul.bf16.gmra.mxu0 %v551_v60  ;;  %351 = vmatmul.bf16.gmra.mxu2 %v599_v61 }
  0x52   :  { %394 = vmatmul.bf16.gmra.mxu1 %v555_v62  ;;  %429 = vmatmul.bf16.gmra.mxu3 %v611_v63 }
  0x61   :  { %326 = vmatmul.bf16.gmra.mxu0 %v559_v8  ;;  %356 = vmatmul.bf16.gmra.mxu2 %v607_v9 }
  0x62   :  { %399 = vmatmul.bf16.gmra.mxu1 %v563_v10  ;;  %434 = vmatmul.bf16.gmra.mxu3 %v619_v11 }
  0x71   :  { %331 = vmatmul.bf16.gmra.mxu0 %v567_v20  ;;  %361 = vmatmul.bf16.gmra.mxu2 %v615_v21 }
  0x72   :  { %404 = vmatmul.bf16.gmra.mxu1 %v571_v22  ;;  %439 = vmatmul.bf16.gmra.mxu3 %v175_v23 }
  0x81   :  { %366 = vmatmul.bf16.gmra.mxu2 %v174_v27 }
  0x82   :  { %409 = vmatmul.bf16.gmra.mxu1 %v579_v28 }
  0x9e   :  { %v307_v30 = vpop.f32.mrf.mxu0 }
  0x9f   :  { %v308_v31 = vadd.f32 %v959_v29, %v307_v30  ;;  %v380_v32 = vpop.f32.mrf.mxu1 }
  0xa1   :  { %v381_v33 = vadd.f32 %v380_v32, %v308_v31 }
  0xa3   :  { %v444_v34 = vmax.f32 %v381_v33, 0.0 }
  0xa4   :  { %v962_v35 = vpop.f32.mrf.mxu2 }
  0xa5   :  { %v469_v36 = vpack.c.bf16 %v444_v34, %v444_v34  ;;  %v415_v37 = vpop.f32.mrf.mxu3 }
  0xa6   :  { %v309_v38 = vpop.f32.mrf.mxu0 }
  0xa7   :  { %495 = vst.msk [vmem:[%s1095_s3] sm:$0xf] %vm494_vm0, %v469_v36  ;;  %v310_v39 = vadd.f32 %v959_v29, %v309_v38  ;;  %v382_v40 = vpop.f32.mrf.mxu1 }
  0xa9   :  { %v383_v41 = vadd.f32 %v382_v40, %v310_v39 }
  0xab   :  { %v445_v42 = vmax.f32 %v383_v41, 0.0 }
  0xac   :  { %v969_v43 = vpop.f32.mrf.mxu2 }
  0xad   :  { %v470_v44 = vpack.c.bf16 %v445_v42, %v445_v42  ;;  %v417_v45 = vpop.f32.mrf.mxu3 }
  0xae   :  { %v312_v46 = vpop.f32.mrf.mxu0 }
  0xaf   :  { %496 = vst.msk [vmem:[%s1095_s3 + $0x4] sm:$0xf] %vm494_vm0, %v470_v44  ;;  %v313_v47 = vadd.f32 %v959_v29, %v312_v46  ;;  %v385_v48 = vpop.f32.mrf.mxu1 }
  0xb1   :  { %v386_v49 = vadd.f32 %v385_v48, %v313_v47 }
  0xb3   :  { %v446_v50 = vmax.f32 %v386_v49, 0.0 }
  0xb4   :  { %v342_v51 = vpop.f32.mrf.mxu2 }
  0xb5   :  { %v471_v52 = vpack.c.bf16 %v446_v50, %v446_v50  ;;  %v343_v53 = vadd.f32 %v959_v29, %v342_v51  ;;  %v420_v54 = vpop.f32.mrf.mxu3 }
  0xb6   :  { %v314_v55 = vpop.f32.mrf.mxu0 }
  0xb7   :  { %497 = vst.msk [vmem:[%s1095_s3 + $0x8] sm:$0xf] %vm494_vm0, %v471_v52  ;;  %v416_v56 = vadd.f32 %v415_v37, %v343_v53  ;;  %v315_v57 = vadd.f32 %v959_v29, %v314_v55  ;;  %v387_v58 = vpop.f32.mrf.mxu1 }
  0xb9   :  { %v458_v59 = vmax.f32 %v416_v56, 0.0  ;;  %v388_v60 = vadd.f32 %v387_v58, %v315_v57 }
  0xbb   :  { %v483_v61 = vpack.c.bf16 %v458_v59, %v458_v59  ;;  %v447_v62 = vmax.f32 %v388_v60, 0.0 }
  0xbc   :  { %v344_v63 = vpop.f32.mrf.mxu2 }
  0xbd   :  { %509 = vst.msk [vmem:[%s1095_s3 + $0x38] sm:$0xf] %vm494_vm0, %v483_v61  ;;  %v472_v0 = vpack.c.bf16 %v447_v62, %v447_v62  ;;  %v345_v1 = vadd.f32 %v959_v29, %v344_v63  ;;  %v422_v2 = vpop.f32.mrf.mxu3 }
  0xbe   :  { %v317_v3 = vpop.f32.mrf.mxu0 }
  0xbf   :  { %498 = vst.msk [vmem:[%s1095_s3 + $0xc] sm:$0xf] %vm494_vm0, %v472_v0  ;;  %v418_v4 = vadd.f32 %v417_v45, %v345_v1  ;;  %v318_v5 = vadd.f32 %v959_v29, %v317_v3  ;;  %v390_v6 = vpop.f32.mrf.mxu1 }
  0xc1   :  { %v459_v7 = vmax.f32 %v418_v4, 0.0  ;;  %v391_v8 = vadd.f32 %v390_v6, %v318_v5 }
  0xc3   :  { %v484_v9 = vpack.c.bf16 %v459_v7, %v459_v7  ;;  %v448_v10 = vmax.f32 %v391_v8, 0.0 }
  0xc4   :  { %v347_v11 = vpop.f32.mrf.mxu2 }
  0xc5   :  { %510 = vst.msk [vmem:[%s1095_s3 + $0x3c] sm:$0xf] %vm494_vm0, %v484_v9  ;;  %v473_v12 = vpack.c.bf16 %v448_v10, %v448_v10  ;;  %v348_v13 = vadd.f32 %v959_v29, %v347_v11  ;;  %v425_v14 = vpop.f32.mrf.mxu3 }
  0xc6   :  { %v319_v15 = vpop.f32.mrf.mxu0 }
  0xc7   :  { %499 = vst.msk [vmem:[%s1095_s3 + $0x10] sm:$0xf] %vm494_vm0, %v473_v12  ;;  %v421_v16 = vadd.f32 %v420_v54, %v348_v13  ;;  %v320_v17 = vadd.f32 %v959_v29, %v319_v15  ;;  %v392_v18 = vpop.f32.mrf.mxu1 }
  0xc9   :  { %v460_v19 = vmax.f32 %v421_v16, 0.0  ;;  %v393_v20 = vadd.f32 %v392_v18, %v320_v17 }
  0xcb   :  { %v485_v21 = vpack.c.bf16 %v460_v19, %v460_v19  ;;  %v449_v22 = vmax.f32 %v393_v20, 0.0 }
  0xcc   :  { %v349_v23 = vpop.f32.mrf.mxu2 }
  0xcd   :  { %511 = vst.msk [vmem:[%s1095_s3 + $0x40] sm:$0xf] %vm494_vm0, %v485_v21  ;;  %v474_v24 = vpack.c.bf16 %v449_v22, %v449_v22  ;;  %v350_v25 = vadd.f32 %v959_v29, %v349_v23  ;;  %v427_v26 = vpop.f32.mrf.mxu3 }
  0xce   :  { %v322_v27 = vpop.f32.mrf.mxu0 }
  0xcf   :  { %500 = vst.msk [vmem:[%s1095_s3 + $0x14] sm:$0xf] %vm494_vm0, %v474_v24  ;;  %v423_v28 = vadd.f32 %v422_v2, %v350_v25  ;;  %v323_v30 = vadd.f32 %v959_v29, %v322_v27  ;;  %v395_v31 = vpop.f32.mrf.mxu1 }
  0xd1   :  { %v461_v32 = vmax.f32 %v423_v28, 0.0  ;;  %v396_v33 = vadd.f32 %v395_v31, %v323_v30 }
  0xd3   :  { %v486_v34 = vpack.c.bf16 %v461_v32, %v461_v32  ;;  %v450_v36 = vmax.f32 %v396_v33, 0.0 }
  0xd4   :  { %v352_v37 = vpop.f32.mrf.mxu2 }
  0xd5   :  { %512 = vst.msk [vmem:[%s1095_s3 + $0x44] sm:$0xf] %vm494_vm0, %v486_v34  ;;  %v475_v38 = vpack.c.bf16 %v450_v36, %v450_v36  ;;  %v353_v39 = vadd.f32 %v959_v29, %v352_v37  ;;  %v430_v40 = vpop.f32.mrf.mxu3 }
  0xd6   :  { %v324_v41 = vpop.f32.mrf.mxu0 }
  0xd7   :  { %501 = vst.msk [vmem:[%s1095_s3 + $0x18] sm:$0xf] %vm494_vm0, %v475_v38  ;;  %v426_v42 = vadd.f32 %v425_v14, %v353_v39  ;;  %v325_v44 = vadd.f32 %v959_v29, %v324_v41  ;;  %v397_v45 = vpop.f32.mrf.mxu1 }
  0xd9   :  { %v462_v46 = vmax.f32 %v426_v42, 0.0  ;;  %v398_v47 = vadd.f32 %v397_v45, %v325_v44 }
  0xdb   :  { %v487_v48 = vpack.c.bf16 %v462_v46, %v462_v46  ;;  %v451_v49 = vmax.f32 %v398_v47, 0.0 }
  0xdc   :  { %v354_v50 = vpop.f32.mrf.mxu2 }
  0xdd   :  { %513 = vst.msk [vmem:[%s1095_s3 + $0x48] sm:$0xf] %vm494_vm0, %v487_v48  ;;  %v476_v51 = vpack.c.bf16 %v451_v49, %v451_v49  ;;  %v355_v52 = vadd.f32 %v959_v29, %v354_v50  ;;  %v432_v53 = vpop.f32.mrf.mxu3  ;;  %v340_v50 = vadd.f32 %v959_v29, %v969_v43 }
  0xde   :  { %v327_v54 = vpop.f32.mrf.mxu0 }
  0xdf   :  { %502 = vst.msk [vmem:[%s1095_s3 + $0x1c] sm:$0xf] %vm494_vm0, %v476_v51  ;;  %v428_v55 = vadd.f32 %v427_v26, %v355_v52  ;;  %v328_v56 = vadd.f32 %v959_v29, %v327_v54  ;;  %v400_v57 = vpop.f32.mrf.mxu1 }
  0xe1   :  { %v463_v58 = vmax.f32 %v428_v55, 0.0  ;;  %v401_v59 = vadd.f32 %v400_v57, %v328_v56 }
  0xe3   :  { %v488_v60 = vpack.c.bf16 %v463_v58, %v463_v58  ;;  %v452_v61 = vmax.f32 %v401_v59, 0.0 }
  0xe4   :  { %v357_v62 = vpop.f32.mrf.mxu2 }
  0xe5   :  { %514 = vst.msk [vmem:[%s1095_s3 + $0x4c] sm:$0xf] %vm494_vm0, %v488_v60  ;;  %v477_v63 = vpack.c.bf16 %v452_v61, %v452_v61  ;;  %v358_v0 = vadd.f32 %v959_v29, %v357_v62  ;;  %v435_v1 = vpop.f32.mrf.mxu3 }
  0xe6   :  { %v329_v2 = vpop.f32.mrf.mxu0 }
  0xe7   :  { %503 = vst.msk [vmem:[%s1095_s3 + $0x20] sm:$0xf] %vm494_vm0, %v477_v63  ;;  %v431_v3 = vadd.f32 %v430_v40, %v358_v0  ;;  %v330_v4 = vadd.f32 %v959_v29, %v329_v2  ;;  %v402_v5 = vpop.f32.mrf.mxu1  ;;  %v338_v40 = vadd.f32 %v959_v29, %v962_v35 }
  0xe9   :  { %v464_v6 = vmax.f32 %v431_v3, 0.0  ;;  %v403_v7 = vadd.f32 %v402_v5, %v330_v4 }
  0xeb   :  { %v489_v8 = vpack.c.bf16 %v464_v6, %v464_v6  ;;  %v453_v9 = vmax.f32 %v403_v7, 0.0 }
  0xec   :  { %v359_v10 = vpop.f32.mrf.mxu2 }
  0xed   :  { %515 = vst.msk [vmem:[%s1095_s3 + $0x50] sm:$0xf] %vm494_vm0, %v489_v8  ;;  %v478_v11 = vpack.c.bf16 %v453_v9, %v453_v9  ;;  %v360_v12 = vadd.f32 %v959_v29, %v359_v10  ;;  %v437_v13 = vpop.f32.mrf.mxu3 }
  0xee   :  { %v332_v14 = vpop.f32.mrf.mxu0 }
  0xef   :  { %504 = vst.msk [vmem:[%s1095_s3 + $0x24] sm:$0xf] %vm494_vm0, %v478_v11  ;;  %v433_v15 = vadd.f32 %v432_v53, %v360_v12  ;;  %v333_v16 = vadd.f32 %v959_v29, %v332_v14  ;;  %v405_v17 = vpop.f32.mrf.mxu1 }
  0xf1   :  { %v465_v18 = vmax.f32 %v433_v15, 0.0  ;;  %v406_v19 = vadd.f32 %v405_v17, %v333_v16 }
  0xf3   :  { %v490_v20 = vpack.c.bf16 %v465_v18, %v465_v18  ;;  %v454_v21 = vmax.f32 %v406_v19, 0.0 }
  0xf4   :  { %v362_v22 = vpop.f32.mrf.mxu2 }
  0xf5   :  { %516 = vst.msk [vmem:[%s1095_s3 + $0x54] sm:$0xf] %vm494_vm0, %v490_v20  ;;  %v479_v23 = vpack.c.bf16 %v454_v21, %v454_v21  ;;  %v363_v24 = vadd.f32 %v959_v29, %v362_v22  ;;  %v440_v25 = vpop.f32.mrf.mxu3 }
  0xf6   :  { %v334_v26 = vpop.f32.mrf.mxu0 }
  0xf7   :  { %505 = vst.msk [vmem:[%s1095_s3 + $0x28] sm:$0xf] %vm494_vm0, %v479_v23  ;;  %v436_v27 = vadd.f32 %v435_v1, %v363_v24  ;;  %v335_v28 = vadd.f32 %v959_v29, %v334_v26  ;;  %v407_v30 = vpop.f32.mrf.mxu1 }
  0xf9   :  { %v466_v31 = vmax.f32 %v436_v27, 0.0  ;;  %v408_v32 = vadd.f32 %v407_v30, %v335_v28 }
  0xfb   :  { %v491_v33 = vpack.c.bf16 %v466_v31, %v466_v31  ;;  %v455_v34 = vmax.f32 %v408_v32, 0.0 }
  0xfc   :  { %v364_v36 = vpop.f32.mrf.mxu2 }
  0xfd   :  { %517 = vst.msk [vmem:[%s1095_s3 + $0x58] sm:$0xf] %vm494_vm0, %v491_v33  ;;  %v480_v37 = vpack.c.bf16 %v455_v34, %v455_v34  ;;  %v365_v38 = vadd.f32 %v959_v29, %v364_v36  ;;  %v442_v39 = vpop.f32.mrf.mxu3 }
  0xff   :  { %506 = vst.msk [vmem:[%s1095_s3 + $0x2c] sm:$0xf] %vm494_vm0, %v480_v37  ;;  %v438_v41 = vadd.f32 %v437_v13, %v365_v38  ;;  %v410_v42 = vpop.f32.mrf.mxu1 }
 0x100   :  { %v411_v44 = vadd.f32 %v410_v42, %v338_v40 }
 0x101   :  { %v467_v45 = vmax.f32 %v438_v41, 0.0 }
 0x102   :  { %v456_v46 = vmax.f32 %v411_v44, 0.0 }
 0x103   :  { %v492_v47 = vpack.c.bf16 %v467_v45, %v467_v45 }
 0x104   :  { %v481_v48 = vpack.c.bf16 %v456_v46, %v456_v46  ;;  %v367_v49 = vpop.f32.mrf.mxu2 }
 0x105   :  { %518 = vst.msk [vmem:[%s1095_s3 + $0x5c] sm:$0xf] %vm494_vm0, %v492_v47  ;;  %v368_v35 = vadd.f32 %v959_v29, %v367_v49 }
 0x106   :  { %507 = vst.msk [vmem:[%s1095_s3 + $0x30] sm:$0xf] %vm494_vm0, %v481_v48 }
 0x107   :  { %v441_v51 = vadd.f32 %v440_v25, %v368_v35  ;;  %v412_v52 = vpop.f32.mrf.mxu1 }
 0x108   :  { %v413_v53 = vadd.f32 %v412_v52, %v340_v50 }
 0x109   :  { %v468_v54 = vmax.f32 %v441_v51, 0.0 }
 0x10a   :  { %v457_v55 = vmax.f32 %v413_v53, 0.0 }
 0x10b   :  { %v493_v56 = vpack.c.bf16 %v468_v54, %v468_v54 }
 0x10c   :  { %v482_v57 = vpack.c.bf16 %v457_v55, %v457_v55  ;;  %v369_v58 = vpop.f32.mrf.mxu2 }
 0x10d   :  { %519 = vst.msk [vmem:[%s1095_s3 + $0x60] sm:$0xf] %vm494_vm0, %v493_v56 }
 0x10e   :  { %508 = vst.msk [vmem:[%s1095_s3 + $0x34] sm:$0xf] %vm494_vm0, %v482_v57 }

// kernel: dqn_forward.5
= control target key start
LH: loop header
LB: loop body
LE: loop exit
PB: predicated region body
PF: predicated region fallthrough
CT: control target
= control target key end

     0   :  { %vm406_vm0 = vcmask 519168   ;;  %s799_s1 = inlined_call_operand.vmem [shape: bf16[512,64], index: 1, kind: input, shape index: {}]   ;;  %s800_s2 = inlined_call_operand.vmem [shape: f32[1,64], index: 2, kind: input, shape index: {}]   ;;  %s801_s0 = inlined_call_operand.vmem [shape: bf16[32,512], index: 0, kind: input, shape index: {}]   ;;  %s802_s3 = inlined_call_operand.vmem [shape: bf16[32,64], index: 3, kind: output, shape index: {}]  }
   0x1   :  { %v590_v0 = vld [vmem:[%s799_s1 + $0x38] sm:$0xff]  ;;  %v589_v4 = vld [vmem:[%s799_s1 + $0x30] sm:$0xff]  ;;  %v588_v8 = vld [vmem:[%s799_s1 + $0x28] sm:$0xff] }
   0x2   :  { %v598_v1 = vld [vmem:[%s799_s1 + $0x78] sm:$0xff]  ;;  %322 = vmatpush.bf16.msra.mxu0 %v590_v0  ;;  %v597_v5 = vld [vmem:[%s799_s1 + $0x70] sm:$0xff]  ;;  %v596_v9 = vld [vmem:[%s799_s1 + $0x68] sm:$0xff] }
   0x3   :  { %v606_v2 = vld [vmem:[%s799_s1 + $0xb8] sm:$0xff]  ;;  %341 = vmatpush.bf16.msra.mxu1 %v598_v1  ;;  %v605_v6 = vld [vmem:[%s799_s1 + $0xb0] sm:$0xff]  ;;  %v604_v10 = vld [vmem:[%s799_s1 + $0xa8] sm:$0xff] }
   0x4   :  { %v614_v3 = vld [vmem:[%s799_s1 + $0xf8] sm:$0xff]  ;;  %360 = vmatpush.bf16.msra.mxu2 %v606_v2  ;;  %v613_v7 = vld [vmem:[%s799_s1 + $0xf0] sm:$0xff]  ;;  %v612_v11 = vld [vmem:[%s799_s1 + $0xe8] sm:$0xff] }
   0x5   :  { %379 = vmatpush.bf16.msra.mxu3 %v614_v3  ;;  %v587_v12 = vld [vmem:[%s799_s1 + $0x20] sm:$0xff]  ;;  %v586_v16 = vld [vmem:[%s799_s1 + $0x18] sm:$0xff]  ;;  %v585_v20 = vld [vmem:[%s799_s1 + $0x10] sm:$0xff] }
   0x6   :  { %323 = vmatpush.bf16.msra.mxu0 %v589_v4  ;;  %v595_v13 = vld [vmem:[%s799_s1 + $0x60] sm:$0xff]  ;;  %v594_v17 = vld [vmem:[%s799_s1 + $0x58] sm:$0xff]  ;;  %v593_v21 = vld [vmem:[%s799_s1 + $0x50] sm:$0xff] }
   0x7   :  { %342 = vmatpush.bf16.msra.mxu1 %v597_v5  ;;  %v603_v14 = vld [vmem:[%s799_s1 + $0xa0] sm:$0xff]  ;;  %v602_v18 = vld [vmem:[%s799_s1 + $0x98] sm:$0xff]  ;;  %v601_v22 = vld [vmem:[%s799_s1 + $0x90] sm:$0xff] }
   0x8   :  { %361 = vmatpush.bf16.msra.mxu2 %v605_v6  ;;  %v611_v15 = vld [vmem:[%s799_s1 + $0xe0] sm:$0xff]  ;;  %v610_v19 = vld [vmem:[%s799_s1 + $0xd8] sm:$0xff]  ;;  %v609_v23 = vld [vmem:[%s799_s1 + $0xd0] sm:$0xff] }
   0x9   :  { %380 = vmatpush.bf16.msra.mxu3 %v613_v7  ;;  %v584_v24 = vld [vmem:[%s799_s1 + $0x8] sm:$0xff]  ;;  %v583_v28 = vld [vmem:[%s799_s1] sm:$0xff]  ;;  %v577_v33 = vld [vmem:[%s801_s0 + $0xc] sm:$0xf0] }
   0xa   :  { %324 = vmatpush.bf16.msra.mxu0 %v588_v8  ;;  %v592_v25 = vld [vmem:[%s799_s1 + $0x48] sm:$0xff]  ;;  %v591_v29 = vld [vmem:[%s799_s1 + $0x40] sm:$0xff]  ;;  %v419_v35 = vld [vmem:[%s801_s0 + $0x10] sm:$0xf0] }
   0xb   :  { %343 = vmatpush.bf16.msra.mxu1 %v596_v9  ;;  %v600_v26 = vld [vmem:[%s799_s1 + $0x88] sm:$0xff]  ;;  %v599_v30 = vld [vmem:[%s799_s1 + $0x80] sm:$0xff]  ;;  %v578_v37 = vld [vmem:[%s801_s0 + $0x14] sm:$0xf0] }
   0xc   :  { %362 = vmatpush.bf16.msra.mxu2 %v604_v10  ;;  %v608_v27 = vld [vmem:[%s799_s1 + $0xc8] sm:$0xff]  ;;  %v607_v31 = vld [vmem:[%s799_s1 + $0xc0] sm:$0xff]  ;;  %v427_v39 = vld [vmem:[%s801_s0 + $0x18] sm:$0xf0] }
   0xd   :  { %381 = vmatpush.bf16.msra.mxu3 %v612_v11  ;;  %v417_v32 = vld [vmem:[%s801_s0] sm:$0xf]  ;;  %v575_v34 = vld [vmem:[%s801_s0 + $0x4] sm:$0xf]  ;;  %v425_v36 = vld [vmem:[%s801_s0 + $0x8] sm:$0xf] }
   0xe   :  { %325 = vmatpush.bf16.msra.mxu0 %v587_v12  ;;  %v576_v38 = vld [vmem:[%s801_s0 + $0xc] sm:$0xf]  ;;  %v418_v40 = vor.u32 %v577_v33, %v417_v32  ;;  %v422_v41 = vor.u32 %v575_v34, %v419_v35  ;;  %v426_v42 = vor.u32 %v578_v37, %v425_v36  ;;  %v433_v44 = vld [vmem:[%s801_s0 + $0x20] sm:$0xf]  ;;  %v581_v45 = vld [vmem:[%s801_s0 + $0x2c] sm:$0xf0] }
   0xf   :  { %344 = vmatpush.bf16.msra.mxu1 %v595_v13  ;;  %v430_v43 = vor.u32 %v576_v38, %v427_v39  ;;  %v579_v46 = vld [vmem:[%s801_s0 + $0x24] sm:$0xf]  ;;  %v435_v47 = vld [vmem:[%s801_s0 + $0x30] sm:$0xf0]  ;;  %v441_v48 = vld [vmem:[%s801_s0 + $0x28] sm:$0xf]  ;;  %v434_v52 = vor.u32 %v581_v45, %v433_v44 }
  0x10   :  { %363 = vmatpush.bf16.msra.mxu2 %v603_v14  ;;  %v582_v49 = vld [vmem:[%s801_s0 + $0x34] sm:$0xf0]  ;;  %v580_v50 = vld [vmem:[%s801_s0 + $0x2c] sm:$0xf]  ;;  %v443_v51 = vld [vmem:[%s801_s0 + $0x38] sm:$0xf0]  ;;  %v438_v53 = vor.u32 %v579_v46, %v435_v47 }
  0x11   :  { %382 = vmatpush.bf16.msra.mxu3 %v611_v15  ;;  %v442_v54 = vor.u32 %v582_v49, %v441_v48  ;;  %v446_v55 = vor.u32 %v580_v50, %v443_v51  ;;  %v615_v56 = vld [vmem:[%s800_s2] ss:$0 sm:$0xff] }
  0x12   :  { %326 = vmatpush.bf16.msra.mxu0 %v586_v16 }
  0x13   :  { %345 = vmatpush.bf16.msra.mxu1 %v594_v17 }
  0x14   :  { %364 = vmatpush.bf16.msra.mxu2 %v602_v18 }
  0x15   :  { %383 = vmatpush.bf16.msra.mxu3 %v610_v19 }
  0x16   :  { %327 = vmatpush.bf16.msra.mxu0 %v585_v20 }
  0x17   :  { %346 = vmatpush.bf16.msra.mxu1 %v593_v21 }
  0x18   :  { %365 = vmatpush.bf16.msra.mxu2 %v601_v22 }
  0x19   :  { %384 = vmatpush.bf16.msra.mxu3 %v609_v23 }
  0x1a   :  { %328 = vmatpush.bf16.msra.mxu0 %v584_v24 }
  0x1b   :  { %347 = vmatpush.bf16.msra.mxu1 %v592_v25 }
  0x1c   :  { %366 = vmatpush.bf16.msra.mxu2 %v600_v26 }
  0x1d   :  { %385 = vmatpush.bf16.msra.mxu3 %v608_v27 }
  0x1e   :  { %329 = vmatpush.bf16.msra.mxu0 %v583_v28 }
  0x1f   :  { %348 = vmatpush.bf16.msra.mxu1 %v591_v29 }
  0x20   :  { %367 = vmatpush.bf16.msra.mxu2 %v599_v30 }
  0x21   :  { %386 = vmatpush.bf16.msra.mxu3 %v607_v31  ;;  %330 = vmatmul.bf16.vlgmr.msra.gmra.mxu0 %v418_v40 }
  0x22   :  { %349 = vmatmul.bf16.vlgmr.msra.gmra.mxu1 %v422_v41 }
  0x23   :  { %368 = vmatmul.bf16.vlgmr.msra.gmra.mxu2 %v426_v42 }
  0x24   :  { %387 = vmatmul.bf16.vlgmr.msra.gmra.mxu3 %v430_v43 }
  0x31   :  { %335 = vmatmul.bf16.gmra.mxu0 %v434_v52 }
  0x32   :  { %354 = vmatmul.bf16.gmra.mxu1 %v438_v53 }
  0x33   :  { %373 = vmatmul.bf16.gmra.mxu2 %v442_v54 }
  0x34   :  { %392 = vmatmul.bf16.gmra.mxu3 %v446_v55 }
  0x9e   :  { %v331_v57 = vpop.f32.mrf.mxu0 }
  0x9f   :  { %v350_v58 = vpop.f32.mrf.mxu1  ;;  %v332_v59 = vadd.f32 %v615_v56, %v331_v57 }
  0xa1   :  { %v351_v60 = vadd.f32 %v350_v58, %v332_v59 }
  0xa6   :  { %v369_v61 = vpop.f32.mrf.mxu2  ;;  %v333_v0 = vpop.f32.mrf.mxu0 }
  0xa7   :  { %v388_v62 = vpop.f32.mrf.mxu3  ;;  %v370_v63 = vadd.f32 %v369_v61, %v351_v60  ;;  %v352_v1 = vpop.f32.mrf.mxu1  ;;  %v334_v3 = vadd.f32 %v615_v56, %v333_v0 }
  0xa9   :  { %v389_v2 = vadd.f32 %v388_v62, %v370_v63  ;;  %v353_v6 = vadd.f32 %v352_v1, %v334_v3 }
  0xab   :  { %v398_v4 = vmax.f32 %v389_v2, 0.0 }
  0xad   :  { %v402_v5 = vpack.c.bf16 %v398_v4, %v398_v4 }
  0xae   :  { %v371_v7 = vpop.f32.mrf.mxu2  ;;  %v336_v10 = vpop.f32.mrf.mxu0 }
  0xaf   :  { %v390_v8 = vpop.f32.mrf.mxu3  ;;  %407 = vst.msk [vmem:[%s802_s3] sm:$0xf] %vm406_vm0, %v402_v5  ;;  %v372_v9 = vadd.f32 %v371_v7, %v353_v6  ;;  %v337_v11 = vadd.f32 %v615_v56, %v336_v10  ;;  %v355_v13 = vpop.f32.mrf.mxu1 }
  0xb1   :  { %v391_v12 = vadd.f32 %v390_v8, %v372_v9  ;;  %v356_v15 = vadd.f32 %v355_v13, %v337_v11 }
  0xb3   :  { %v399_v14 = vmax.f32 %v391_v12, 0.0 }
  0xb5   :  { %v403_v16 = vpack.c.bf16 %v399_v14, %v399_v14 }
  0xb6   :  { %v374_v17 = vpop.f32.mrf.mxu2  ;;  %v338_v20 = vpop.f32.mrf.mxu0 }
  0xb7   :  { %v393_v18 = vpop.f32.mrf.mxu3  ;;  %408 = vst.msk [vmem:[%s802_s3 + $0x4] sm:$0xf] %vm406_vm0, %v403_v16  ;;  %v375_v19 = vadd.f32 %v374_v17, %v356_v15  ;;  %v339_v22 = vadd.f32 %v615_v56, %v338_v20  ;;  %v357_v24 = vpop.f32.mrf.mxu1 }
  0xb9   :  { %v394_v21 = vadd.f32 %v393_v18, %v375_v19  ;;  %v358_v26 = vadd.f32 %v357_v24, %v339_v22 }
  0xbb   :  { %v400_v23 = vmax.f32 %v394_v21, 0.0 }
  0xbd   :  { %v404_v25 = vpack.c.bf16 %v400_v23, %v400_v23 }
  0xbe   :  { %v376_v27 = vpop.f32.mrf.mxu2 }
  0xbf   :  { %409 = vst.msk [vmem:[%s802_s3 + $0x8] sm:$0xf] %vm406_vm0, %v404_v25  ;;  %v377_v28 = vadd.f32 %v376_v27, %v358_v26  ;;  %v395_v29 = vpop.f32.mrf.mxu3 }
  0xc1   :  { %v396_v30 = vadd.f32 %v395_v29, %v377_v28 }
  0xc3   :  { %v401_v31 = vmax.f32 %v396_v30, 0.0 }
  0xc5   :  { %v405_v32 = vpack.c.bf16 %v401_v31, %v401_v31 }
  0xc7   :  { %410 = vst.msk [vmem:[%s802_s3 + $0xc] sm:$0xf] %vm406_vm0, %v405_v32 }

// kernel: dqn_forward.6
= control target key start
LH: loop header
LB: loop body
LE: loop exit
PB: predicated region body
PF: predicated region fallthrough
CT: control target
= control target key end

     0   :  { %vm327_vm0 = vcmask 523264   ;;  %vm398_vm1 = vcmask 519168   ;;  %s729_s1 = inlined_call_operand.vmem [shape: bf16[576,64], index: 1, kind: input, shape index: {}]   ;;  %s730_s2 = inlined_call_operand.vmem [shape: f32[1,64], index: 2, kind: input, shape index: {}]   ;;  %s731_s0 = inlined_call_operand.vmem [shape: bf16[8,576], index: 0, kind: input, shape index: {}]   ;;  %s732_s3 = inlined_call_operand.vmem [shape: bf16[8,64], index: 3, kind: output, shape index: {}]  }
   0x1   :  { %v556_v0 = vld [vmem:[%s729_s1 + $0x38] sm:$0xff]  ;;  %v555_v4 = vld [vmem:[%s729_s1 + $0x30] sm:$0xff]  ;;  %v554_v8 = vld [vmem:[%s729_s1 + $0x28] sm:$0xff] }
   0x2   :  { %v572_v1 = vld [vmem:[%s729_s1 + $0xb8] sm:$0xff]  ;;  %331 = vmatpush.bf16.msra.mxu0 %v556_v0  ;;  %v571_v5 = vld [vmem:[%s729_s1 + $0xb0] sm:$0xff]  ;;  %v570_v9 = vld [vmem:[%s729_s1 + $0xa8] sm:$0xff] }
   0x3   :  { %v580_v2 = vld [vmem:[%s729_s1 + $0xf8] sm:$0xff]  ;;  %357 = vmatpush.bf16.msra.mxu2 %v572_v1  ;;  %v579_v6 = vld [vmem:[%s729_s1 + $0xf0] sm:$0xff]  ;;  %v578_v10 = vld [vmem:[%s729_s1 + $0xe8] sm:$0xff] }
   0x4   :  { %v564_v3 = vld [vmem:[%s729_s1 + $0x78] sm:$0xff]  ;;  %370 = vmatpush.bf16.msra.mxu3 %v580_v2  ;;  %v563_v7 = vld [vmem:[%s729_s1 + $0x70] sm:$0xff]  ;;  %v562_v11 = vld [vmem:[%s729_s1 + $0x68] sm:$0xff] }
   0x5   :  { %344 = vmatpush.bf16.msra.mxu1 %v564_v3  ;;  %v553_v12 = vld [vmem:[%s729_s1 + $0x20] sm:$0xff]  ;;  %v552_v16 = vld [vmem:[%s729_s1 + $0x18] sm:$0xff]  ;;  %v551_v20 = vld [vmem:[%s729_s1 + $0x10] sm:$0xff] }
   0x6   :  { %332 = vmatpush.bf16.msra.mxu0 %v555_v4  ;;  %v569_v13 = vld [vmem:[%s729_s1 + $0xa0] sm:$0xff]  ;;  %v568_v17 = vld [vmem:[%s729_s1 + $0x98] sm:$0xff]  ;;  %v567_v21 = vld [vmem:[%s729_s1 + $0x90] sm:$0xff] }
   0x7   :  { %358 = vmatpush.bf16.msra.mxu2 %v571_v5  ;;  %v577_v14 = vld [vmem:[%s729_s1 + $0xe0] sm:$0xff]  ;;  %v576_v18 = vld [vmem:[%s729_s1 + $0xd8] sm:$0xff]  ;;  %v575_v22 = vld [vmem:[%s729_s1 + $0xd0] sm:$0xff] }
   0x8   :  { %371 = vmatpush.bf16.msra.mxu3 %v579_v6  ;;  %v561_v15 = vld [vmem:[%s729_s1 + $0x60] sm:$0xff]  ;;  %v560_v19 = vld [vmem:[%s729_s1 + $0x58] sm:$0xff]  ;;  %v559_v23 = vld [vmem:[%s729_s1 + $0x50] sm:$0xff] }
   0x9   :  { %345 = vmatpush.bf16.msra.mxu1 %v563_v7  ;;  %v550_v24 = vld [vmem:[%s729_s1 + $0x8] sm:$0xff]  ;;  %v15_v26 = vld [vmem:[%s731_s0] sm:$0xff]  ;;  %v584_v38 = vld [vmem:[%s729_s1 + $0x118] sm:$0xff] }
   0xa   :  { %333 = vmatpush.bf16.msra.mxu0 %v554_v8  ;;  %v566_v25 = vld [vmem:[%s729_s1 + $0x88] sm:$0xff]  ;;  %v97_v30 = vunpack.c.l.b16 %v15_v26  ;;  %v549_v32 = vld [vmem:[%s729_s1] sm:$0xff]  ;;  %v98_v35 = vunpack.c.h.b16 %v15_v26  ;;  %v583_v43 = vld [vmem:[%s729_s1 + $0x110] sm:$0xff] }
   0xb   :  { %359 = vmatpush.bf16.msra.mxu2 %v570_v9  ;;  %v16_v27 = vld [vmem:[%s731_s0 + $0x8] sm:$0xff]  ;;  %v565_v33 = vld [vmem:[%s729_s1 + $0x80] sm:$0xff]  ;;  %v17_v45 = vld [vmem:[%s731_s0 + $0x10] sm:$0xf] }
   0xc   :  { %372 = vmatpush.bf16.msra.mxu3 %v578_v10  ;;  %v574_v28 = vld [vmem:[%s729_s1 + $0xc8] sm:$0xff]  ;;  %v99_v31 = vunpack.c.l.b16 %v16_v27  ;;  %v100_v34 = vunpack.c.h.b16 %v16_v27  ;;  %v573_v36 = vld [vmem:[%s729_s1 + $0xc0] sm:$0xff]  ;;  %v102_v39 = vpack.c.b16 %v97_v30, %v97_v30  ;;  %v103_v42 = vpack.c.b16 %v98_v35, %v98_v35 }
   0xd   :  { %346 = vmatpush.bf16.msra.mxu1 %v562_v11  ;;  %v558_v29 = vld [vmem:[%s729_s1 + $0x48] sm:$0xff]  ;;  %v557_v37 = vld [vmem:[%s729_s1 + $0x40] sm:$0xff]  ;;  %v101_v47 = vunpack.c.l.b16 %v17_v45 }
   0xe   :  { %334 = vmatpush.bf16.msra.mxu0 %v553_v12  ;;  %v104_v40 = vpack.c.b16 %v99_v31, %v99_v31  ;;  %v105_v41 = vpack.c.b16 %v100_v34, %v100_v34  ;;  %v582_v44 = vld [vmem:[%s729_s1 + $0x108] sm:$0xff]  ;;  %v581_v46 = vld [vmem:[%s729_s1 + $0x100] sm:$0xff] }
   0xf   :  { %360 = vmatpush.bf16.msra.mxu2 %v569_v13  ;;  %v106_v48 = vpack.c.b16 %v101_v47, %v101_v47  ;;  %v585_v50 = vld [vmem:[%s730_s2] ss:$0 sm:$0xff] }
  0x10   :  { %373 = vmatpush.bf16.msra.mxu3 %v577_v14 }
  0x11   :  { %347 = vmatpush.bf16.msra.mxu1 %v561_v15 }
  0x12   :  { %335 = vmatpush.bf16.msra.mxu0 %v552_v16 }
  0x13   :  { %361 = vmatpush.bf16.msra.mxu2 %v568_v17 }
  0x14   :  { %374 = vmatpush.bf16.msra.mxu3 %v576_v18 }
  0x15   :  { %348 = vmatpush.bf16.msra.mxu1 %v560_v19 }
  0x16   :  { %336 = vmatpush.bf16.msra.mxu0 %v551_v20 }
  0x17   :  { %362 = vmatpush.bf16.msra.mxu2 %v567_v21 }
  0x18   :  { %375 = vmatpush.bf16.msra.mxu3 %v575_v22 }
  0x19   :  { %349 = vmatpush.bf16.msra.mxu1 %v559_v23 }
  0x1a   :  { %337 = vmatpush.bf16.msra.mxu0 %v550_v24 }
  0x1b   :  { %363 = vmatpush.bf16.msra.mxu2 %v566_v25 }
  0x1c   :  { %376 = vmatpush.bf16.msra.mxu3 %v574_v28 }
  0x1d   :  { %350 = vmatpush.bf16.msra.mxu1 %v558_v29 }
  0x1e   :  { %338 = vmatpush.bf16.msra.mxu0 %v549_v32 }
  0x1f   :  { %364 = vmatpush.bf16.msra.mxu2 %v565_v33 }
  0x20   :  { %377 = vmatpush.bf16.msra.mxu3 %v573_v36 }
  0x21   :  { %351 = vmatpush.bf16.msra.mxu1 %v557_v37  ;;  %339 = vmatmul.bf16.vlgmr.msra.gmra.mxu0 %v102_v39 }
  0x22   :  { %387 = vmatpush.bf16.msrb.mxu0 %v584_v38  ;;  %365 = vmatmul.bf16.vlgmr.msra.gmra.mxu2 %v104_v40 }
  0x23   :  { %378 = vmatmul.bf16.vlgmr.msra.gmra.mxu3 %v105_v41 }
  0x24   :  { %352 = vmatmul.bf16.vlgmr.msra.gmra.mxu1 %v103_v42 }
  0x26   :  { %388 = vmatpush.bf16.msrb.mxu0 %v583_v43 }
  0x2a   :  { %389 = vmatpush.bf16.msrb.mxu0 %v582_v44 }
  0x2e   :  { %390 = vmatpush.bf16.msrb.mxu0 %v581_v46 }
  0x31   :  { %548 = vmatmul.msk.bf16.vlgmr.msrb.gmra.mxu0 %vm327_vm0, %v106_v48 }
  0x9e   :  { %v340_v49 = vpop.f32.mrf.mxu0 }
  0x9f   :  { %v341_v52 = vadd.f32 %v585_v50, %v340_v49 }
  0xa1   :  { %v353_v51 = vpop.f32.mrf.mxu1 }
  0xa2   :  { %v354_v56 = vadd.f32 %v353_v51, %v341_v52 }
  0xa5   :  { %v366_v53 = vpop.f32.mrf.mxu2 }
  0xa6   :  { %v379_v54 = vpop.f32.mrf.mxu3  ;;  %v342_v55 = vpop.f32.mrf.mxu0  ;;  %v367_v58 = vadd.f32 %v366_v53, %v354_v56 }
  0xa8   :  { %v380_v60 = vadd.f32 %v379_v54, %v367_v58 }
  0xa9   :  { %v355_v57 = vpop.f32.mrf.mxu1 }
  0xad   :  { %v368_v59 = vpop.f32.mrf.mxu2 }
  0xae   :  { %v381_v61 = vpop.f32.mrf.mxu3  ;;  %v392_v62 = vpop.f32.mrf.mxu0 }
  0xaf   :  { %v393_v63 = vadd.f32 %v392_v62, %v380_v60 }
  0xb1   :  { %v396_v0 = vmax.f32 %v393_v63, 0.0 }
  0xb3   :  { %v397_v1 = vpack.c.bf16 %v396_v0, %v396_v0 }
  0xb5   :  { %399 = vst.msk [vmem:[%s732_s3] sm:$0xf] %vm398_vm1, %v397_v1 }
  0xb6   :  { %v394_v2 = vpop.f32.mrf.mxu0 }

// kernel: dqn_forward.7
= control target key start
LH: loop header
LB: loop body
LE: loop exit
PB: predicated region body
PF: predicated region fallthrough
CT: control target
= control target key end

     0   :  { %s1906_s0 = inlined_call_operand.vmem [shape: bf16[2,256], index: 0, kind: input, shape index: {}]   ;;  %s1907_s1 = inlined_call_operand.vmem [shape: bf16[256,512], index: 1, kind: input, shape index: {}]   ;;  %s1908_s2 = inlined_call_operand.vmem [shape: f32[1,512], index: 2, kind: input, shape index: {}]   ;;  %s1909_s3 = inlined_call_operand.vmem [shape: bf16[512,128], index: 3, kind: input, shape index: {}]   ;;  %s1910_s4 = inlined_call_operand.vmem [shape: f32[1,128], index: 4, kind: input, shape index: {}]   ;;  %s1911_s5 = inlined_call_operand.hbm [shape: f32[2,128], index: 5, kind: output, shape index: {}]  }
   0x1   :  { %v977_v0 = vld [vmem:[%s1907_s1 + $0xe0] sm:$0xf]  ;;  %v1277_v1 = vld [vmem:[%s1907_s1 + $0xec] sm:$0xf0]  ;;  %v1275_v5 = vld [vmem:[%s1907_s1 + $0xe4] sm:$0xf] }
   0x2   :  { %v1105_v2 = vld [vmem:[%s1907_s1 + $0x1e0] sm:$0xf]  ;;  %v978_v3 = vor.u32 %v1277_v1, %v977_v0  ;;  %v1309_v4 = vld [vmem:[%s1907_s1 + $0x1ec] sm:$0xf0]  ;;  %v979_v6 = vld [vmem:[%s1907_s1 + $0xf0] sm:$0xf0] }
   0x3   :  { %v1106_v7 = vor.u32 %v1309_v4, %v1105_v2  ;;  %v982_v8 = vor.u32 %v1275_v5, %v979_v6  ;;  %v1307_v9 = vld [vmem:[%s1907_s1 + $0x1e4] sm:$0xf]  ;;  %v1107_v10 = vld [vmem:[%s1907_s1 + $0x1f0] sm:$0xf0]  ;;  %v961_v11 = vld [vmem:[%s1907_s1 + $0xc0] sm:$0xf] }
   0x4   :  { %422 = vmatpush.bf16.msra.mxu0 %v978_v3  ;;  %v1110_v12 = vor.u32 %v1307_v9, %v1107_v10  ;;  %v1273_v13 = vld [vmem:[%s1907_s1 + $0xcc] sm:$0xf0]  ;;  %v1089_v14 = vld [vmem:[%s1907_s1 + $0x1c0] sm:$0xf]  ;;  %v1271_v18 = vld [vmem:[%s1907_s1 + $0xc4] sm:$0xf] }
   0x5   :  { %v1305_v15 = vld [vmem:[%s1907_s1 + $0x1cc] sm:$0xf0]  ;;  %435 = vmatpush.bf16.msra.mxu1 %v1106_v7  ;;  %448 = vmatpush.bf16.msra.mxu2 %v982_v8  ;;  %v962_v16 = vor.u32 %v1273_v13, %v961_v11  ;;  %v963_v19 = vld [vmem:[%s1907_s1 + $0xd0] sm:$0xf0]  ;;  %v1303_v20 = vld [vmem:[%s1907_s1 + $0x1c4] sm:$0xf] }
   0x6   :  { %v1090_v17 = vor.u32 %v1305_v15, %v1089_v14  ;;  %461 = vmatpush.bf16.msra.mxu3 %v1110_v12  ;;  %v966_v21 = vor.u32 %v1271_v18, %v963_v19  ;;  %v1091_v22 = vld [vmem:[%s1907_s1 + $0x1d0] sm:$0xf0]  ;;  %v945_v23 = vld [vmem:[%s1907_s1 + $0xa0] sm:$0xf]  ;;  %v1269_v24 = vld [vmem:[%s1907_s1 + $0xac] sm:$0xf0] }
   0x7   :  { %v1094_v25 = vor.u32 %v1303_v20, %v1091_v22  ;;  %v1073_v26 = vld [vmem:[%s1907_s1 + $0x1a0] sm:$0xf]  ;;  %v1301_v27 = vld [vmem:[%s1907_s1 + $0x1ac] sm:$0xf0]  ;;  %v1267_v28 = vld [vmem:[%s1907_s1 + $0xa4] sm:$0xf]  ;;  %v946_v29 = vor.u32 %v1269_v24, %v945_v23 }
   0x8   :  { %423 = vmatpush.bf16.msra.mxu0 %v962_v16  ;;  %v947_v30 = vld [vmem:[%s1907_s1 + $0xb0] sm:$0xf0]  ;;  %v1299_v31 = vld [vmem:[%s1907_s1 + $0x1a4] sm:$0xf]  ;;  %v1074_v33 = vor.u32 %v1301_v27, %v1073_v26  ;;  %v929_v35 = vld [vmem:[%s1907_s1 + $0x80] sm:$0xf] }
   0x9   :  { %v1075_v32 = vld [vmem:[%s1907_s1 + $0x1b0] sm:$0xf0]  ;;  %436 = vmatpush.bf16.msra.mxu1 %v1090_v17  ;;  %449 = vmatpush.bf16.msra.mxu2 %v966_v21  ;;  %v950_v34 = vor.u32 %v1267_v28, %v947_v30  ;;  %v1265_v36 = vld [vmem:[%s1907_s1 + $0x8c] sm:$0xf0]  ;;  %v1057_v37 = vld [vmem:[%s1907_s1 + $0x180] sm:$0xf] }
   0xa   :  { %462 = vmatpush.bf16.msra.mxu3 %v1094_v25  ;;  %v1078_v38 = vor.u32 %v1299_v31, %v1075_v32  ;;  %v1297_v39 = vld [vmem:[%s1907_s1 + $0x18c] sm:$0xf0]  ;;  %v1263_v40 = vld [vmem:[%s1907_s1 + $0x84] sm:$0xf]  ;;  %v931_v41 = vld [vmem:[%s1907_s1 + $0x90] sm:$0xf0]  ;;  %v930_v44 = vor.u32 %v1265_v36, %v929_v35 }
   0xb   :  { %v1295_v42 = vld [vmem:[%s1907_s1 + $0x184] sm:$0xf]  ;;  %v1059_v43 = vld [vmem:[%s1907_s1 + $0x190] sm:$0xf0]  ;;  %v1058_v45 = vor.u32 %v1297_v39, %v1057_v37  ;;  %v934_v46 = vor.u32 %v1263_v40, %v931_v41  ;;  %v913_v47 = vld [vmem:[%s1907_s1 + $0x60] sm:$0xf] }
   0xc   :  { %424 = vmatpush.bf16.msra.mxu0 %v946_v29  ;;  %v1261_v48 = vld [vmem:[%s1907_s1 + $0x6c] sm:$0xf0]  ;;  %v1041_v49 = vld [vmem:[%s1907_s1 + $0x160] sm:$0xf]  ;;  %v1062_v50 = vor.u32 %v1295_v42, %v1059_v43  ;;  %v1259_v52 = vld [vmem:[%s1907_s1 + $0x64] sm:$0xf] }
   0xd   :  { %437 = vmatpush.bf16.msra.mxu1 %v1074_v33  ;;  %450 = vmatpush.bf16.msra.mxu2 %v950_v34  ;;  %v1293_v51 = vld [vmem:[%s1907_s1 + $0x16c] sm:$0xf0]  ;;  %v915_v53 = vld [vmem:[%s1907_s1 + $0x70] sm:$0xf0]  ;;  %v1291_v54 = vld [vmem:[%s1907_s1 + $0x164] sm:$0xf]  ;;  %v914_v56 = vor.u32 %v1261_v48, %v913_v47 }
   0xe   :  { %463 = vmatpush.bf16.msra.mxu3 %v1078_v38  ;;  %v1043_v55 = vld [vmem:[%s1907_s1 + $0x170] sm:$0xf0]  ;;  %v1042_v57 = vor.u32 %v1293_v51, %v1041_v49  ;;  %v918_v58 = vor.u32 %v1259_v52, %v915_v53  ;;  %v897_v59 = vld [vmem:[%s1907_s1 + $0x40] sm:$0xf]  ;;  %v1257_v60 = vld [vmem:[%s1907_s1 + $0x4c] sm:$0xf0] }
   0xf   :  { %v1025_v61 = vld [vmem:[%s1907_s1 + $0x140] sm:$0xf]  ;;  %v1046_v62 = vor.u32 %v1291_v54, %v1043_v55  ;;  %v1289_v63 = vld [vmem:[%s1907_s1 + $0x14c] sm:$0xf0]  ;;  %v1255_v0 = vld [vmem:[%s1907_s1 + $0x44] sm:$0xf]  ;;  %v898_v4 = vor.u32 %v1257_v60, %v897_v59 }
  0x10   :  { %425 = vmatpush.bf16.msra.mxu0 %v930_v44  ;;  %v899_v1 = vld [vmem:[%s1907_s1 + $0x50] sm:$0xf0]  ;;  %v1287_v2 = vld [vmem:[%s1907_s1 + $0x144] sm:$0xf]  ;;  %v1026_v5 = vor.u32 %v1289_v63, %v1025_v61  ;;  %v881_v7 = vld [vmem:[%s1907_s1 + $0x20] sm:$0xf] }
  0x11   :  { %438 = vmatpush.bf16.msra.mxu1 %v1058_v45  ;;  %451 = vmatpush.bf16.msra.mxu2 %v934_v46  ;;  %v1027_v3 = vld [vmem:[%s1907_s1 + $0x150] sm:$0xf0]  ;;  %v902_v6 = vor.u32 %v1255_v0, %v899_v1  ;;  %v1253_v8 = vld [vmem:[%s1907_s1 + $0x2c] sm:$0xf0]  ;;  %v1009_v9 = vld [vmem:[%s1907_s1 + $0x120] sm:$0xf] }
  0x12   :  { %464 = vmatpush.bf16.msra.mxu3 %v1062_v50  ;;  %v1030_v10 = vor.u32 %v1287_v2, %v1027_v3  ;;  %v1285_v11 = vld [vmem:[%s1907_s1 + $0x12c] sm:$0xf0]  ;;  %v1251_v12 = vld [vmem:[%s1907_s1 + $0x24] sm:$0xf]  ;;  %v883_v13 = vld [vmem:[%s1907_s1 + $0x30] sm:$0xf0]  ;;  %v882_v17 = vor.u32 %v1253_v8, %v881_v7 }
  0x13   :  { %v1283_v14 = vld [vmem:[%s1907_s1 + $0x124] sm:$0xf]  ;;  %v1011_v15 = vld [vmem:[%s1907_s1 + $0x130] sm:$0xf0]  ;;  %v865_v16 = vld [vmem:[%s1907_s1] sm:$0xf]  ;;  %v1010_v21 = vor.u32 %v1285_v11, %v1009_v9  ;;  %v886_v22 = vor.u32 %v1251_v12, %v883_v13 }
  0x14   :  { %426 = vmatpush.bf16.msra.mxu0 %v914_v56  ;;  %v1249_v18 = vld [vmem:[%s1907_s1 + $0xc] sm:$0xf0]  ;;  %v993_v19 = vld [vmem:[%s1907_s1 + $0x100] sm:$0xf]  ;;  %v1247_v23 = vld [vmem:[%s1907_s1 + $0x4] sm:$0xf]  ;;  %v1014_v26 = vor.u32 %v1283_v14, %v1011_v15 }
  0x15   :  { %439 = vmatpush.bf16.msra.mxu1 %v1042_v57  ;;  %452 = vmatpush.bf16.msra.mxu2 %v918_v58  ;;  %v1281_v20 = vld [vmem:[%s1907_s1 + $0x10c] sm:$0xf0]  ;;  %v867_v24 = vld [vmem:[%s1907_s1 + $0x10] sm:$0xf0]  ;;  %v1279_v25 = vld [vmem:[%s1907_s1 + $0x104] sm:$0xf]  ;;  %v866_v33 = vor.u32 %v1249_v18, %v865_v16 }
  0x16   :  { %465 = vmatpush.bf16.msra.mxu3 %v1046_v62  ;;  %v995_v27 = vld [vmem:[%s1907_s1 + $0x110] sm:$0xf0]  ;;  %v985_v28 = vld [vmem:[%s1907_s1 + $0xe8] sm:$0xf]  ;;  %v1278_v29 = vld [vmem:[%s1907_s1 + $0xf4] sm:$0xf0]  ;;  %v994_v36 = vor.u32 %v1281_v20, %v993_v19  ;;  %v870_v37 = vor.u32 %v1247_v23, %v867_v24 }
  0x17   :  { %v1113_v30 = vld [vmem:[%s1907_s1 + $0x1e8] sm:$0xf]  ;;  %v1310_v31 = vld [vmem:[%s1907_s1 + $0x1f4] sm:$0xf0]  ;;  %v21_v32 = vld [vmem:[%s1906_s0] sm:$0x3]  ;;  %v998_v40 = vor.u32 %v1279_v25, %v995_v27  ;;  %v986_v41 = vor.u32 %v1278_v29, %v985_v28 }
  0x18   :  { %427 = vmatpush.bf16.msra.mxu0 %v898_v4  ;;  %v1276_v34 = vld [vmem:[%s1907_s1 + $0xec] sm:$0xf]  ;;  %v987_v35 = vld [vmem:[%s1907_s1 + $0xf8] sm:$0xf0]  ;;  %97 = vst [vmem:[#allocation1] ss:$9 sm:$0xff] %v21_v32  ;;  %v1114_v42 = vor.u32 %v1310_v31, %v1113_v30 }
  0x19   :  { %440 = vmatpush.bf16.msra.mxu1 %v1026_v5  ;;  %453 = vmatpush.bf16.msra.mxu2 %v902_v6  ;;  %v1308_v38 = vld [vmem:[%s1907_s1 + $0x1ec] sm:$0xf]  ;;  %v1115_v39 = vld [vmem:[%s1907_s1 + $0x1f8] sm:$0xf0]  ;;  %v990_v43 = vor.u32 %v1276_v34, %v987_v35  ;;  %v969_v44 = vld [vmem:[%s1907_s1 + $0xc8] sm:$0xf] }
  0x1a   :  { %466 = vmatpush.bf16.msra.mxu3 %v1030_v10  ;;  %v1274_v45 = vld [vmem:[%s1907_s1 + $0xd4] sm:$0xf0]  ;;  %v1097_v46 = vld [vmem:[%s1907_s1 + $0x1c8] sm:$0xf]  ;;  %v1118_v47 = vor.u32 %v1308_v38, %v1115_v39  ;;  %v1272_v49 = vld [vmem:[%s1907_s1 + $0xcc] sm:$0xf] }
  0x1b   :  { %v1306_v48 = vld [vmem:[%s1907_s1 + $0x1d4] sm:$0xf0]  ;;  %v971_v50 = vld [vmem:[%s1907_s1 + $0xd8] sm:$0xf0]  ;;  %v1304_v51 = vld [vmem:[%s1907_s1 + $0x1cc] sm:$0xf]  ;;  %v970_v53 = vor.u32 %v1274_v45, %v969_v44 }
  0x1c   :  { %428 = vmatpush.bf16.msra.mxu0 %v882_v17  ;;  %v1099_v52 = vld [vmem:[%s1907_s1 + $0x1d8] sm:$0xf0]  ;;  %v953_v54 = vld [vmem:[%s1907_s1 + $0xa8] sm:$0xf]  ;;  %v1270_v55 = vld [vmem:[%s1907_s1 + $0xb4] sm:$0xf0]  ;;  %v1098_v56 = vor.u32 %v1306_v48, %v1097_v46  ;;  %v974_v57 = vor.u32 %v1272_v49, %v971_v50 }
  0x1d   :  { %441 = vmatpush.bf16.msra.mxu1 %v1010_v21  ;;  %454 = vmatpush.bf16.msra.mxu2 %v886_v22  ;;  %v1081_v59 = vld [vmem:[%s1907_s1 + $0x1a8] sm:$0xf]  ;;  %v1102_v61 = vor.u32 %v1304_v51, %v1099_v52  ;;  %v1302_v62 = vld [vmem:[%s1907_s1 + $0x1b4] sm:$0xf0]  ;;  %v1268_v63 = vld [vmem:[%s1907_s1 + $0xac] sm:$0xf]  ;;  %v954_v3 = vor.u32 %v1270_v55, %v953_v54 }
  0x1e   :  { %467 = vmatpush.bf16.msra.mxu3 %v1014_v26  ;;  %v955_v0 = vld [vmem:[%s1907_s1 + $0xb8] sm:$0xf0]  ;;  %v1300_v1 = vld [vmem:[%s1907_s1 + $0x1ac] sm:$0xf]  ;;  %v1082_v4 = vor.u32 %v1302_v62, %v1081_v59  ;;  %v937_v6 = vld [vmem:[%s1907_s1 + $0x88] sm:$0xf] }
  0x1f   :  { %v1651_v58 = vld [vmem:[#allocation1] sm:$0xff]  ;;  %v1656_v60 = vld [vmem:[#allocation1 + $0x9] sm:$0xff]  ;;  %v1083_v2 = vld [vmem:[%s1907_s1 + $0x1b8] sm:$0xf0]  ;;  %v958_v5 = vor.u32 %v1268_v63, %v955_v0 }
  0x20   :  { %429 = vmatpush.bf16.msra.mxu0 %v866_v33  ;;  %v1266_v7 = vld [vmem:[%s1907_s1 + $0x94] sm:$0xf0]  ;;  %v1065_v8 = vld [vmem:[%s1907_s1 + $0x188] sm:$0xf]  ;;  %v1086_v9 = vor.u32 %v1300_v1, %v1083_v2  ;;  %v1264_v11 = vld [vmem:[%s1907_s1 + $0x8c] sm:$0xf] }
  0x21   :  { %442 = vmatpush.bf16.msra.mxu1 %v994_v36  ;;  %455 = vmatpush.bf16.msra.mxu2 %v870_v37  ;;  %v1298_v10 = vld [vmem:[%s1907_s1 + $0x194] sm:$0xf0]  ;;  %v939_v12 = vld [vmem:[%s1907_s1 + $0x98] sm:$0xf0]  ;;  %v1296_v13 = vld [vmem:[%s1907_s1 + $0x18c] sm:$0xf]  ;;  %v938_v15 = vor.u32 %v1266_v7, %v937_v6 }
  0x22   :  { %468 = vmatpush.bf16.msra.mxu3 %v998_v40  ;;  %v1067_v14 = vld [vmem:[%s1907_s1 + $0x198] sm:$0xf0]  ;;  %v1066_v16 = vor.u32 %v1298_v10, %v1065_v8  ;;  %v942_v17 = vor.u32 %v1264_v11, %v939_v12  ;;  %v921_v18 = vld [vmem:[%s1907_s1 + $0x68] sm:$0xf]  ;;  %v1262_v19 = vld [vmem:[%s1907_s1 + $0x74] sm:$0xf0] }
  0x23   :  { %430 = vmatmul.bf16.vlgmr.msra.gmra.mxu0 %v1651_v58  ;;  %v1049_v20 = vld [vmem:[%s1907_s1 + $0x168] sm:$0xf]  ;;  %v1070_v21 = vor.u32 %v1296_v13, %v1067_v14  ;;  %v1294_v22 = vld [vmem:[%s1907_s1 + $0x174] sm:$0xf0]  ;;  %v1260_v23 = vld [vmem:[%s1907_s1 + $0x6c] sm:$0xf]  ;;  %v922_v27 = vor.u32 %v1262_v19, %v921_v18 }
  0x24   :  { %474 = vmatpush.bf16.msrb.mxu0 %v986_v41  ;;  %456 = vmatmul.bf16.vlgmr.msra.gmra.mxu2 %v1651_v58  ;;  %v923_v24 = vld [vmem:[%s1907_s1 + $0x78] sm:$0xf0]  ;;  %v1292_v25 = vld [vmem:[%s1907_s1 + $0x16c] sm:$0xf]  ;;  %v905_v28 = vld [vmem:[%s1907_s1 + $0x48] sm:$0xf]  ;;  %v1050_v30 = vor.u32 %v1294_v22, %v1049_v20 }
  0x25   :  { %487 = vmatpush.bf16.msrb.mxu1 %v1114_v42  ;;  %500 = vmatpush.bf16.msrb.mxu2 %v990_v43  ;;  %v1051_v26 = vld [vmem:[%s1907_s1 + $0x178] sm:$0xf0]  ;;  %v1258_v29 = vld [vmem:[%s1907_s1 + $0x54] sm:$0xf0]  ;;  %v926_v31 = vor.u32 %v1260_v23, %v923_v24  ;;  %v1033_v32 = vld [vmem:[%s1907_s1 + $0x148] sm:$0xf] }
  0x26   :  { %513 = vmatpush.bf16.msrb.mxu3 %v1118_v47  ;;  %443 = vmatmul.bf16.vlgmr.msra.gmra.mxu1 %v1656_v60  ;;  %v1290_v33 = vld [vmem:[%s1907_s1 + $0x154] sm:$0xf0]  ;;  %v1256_v34 = vld [vmem:[%s1907_s1 + $0x4c] sm:$0xf]  ;;  %v1054_v35 = vor.u32 %v1292_v25, %v1051_v26  ;;  %v907_v36 = vld [vmem:[%s1907_s1 + $0x58] sm:$0xf0] }
  0x27   :  { %469 = vmatmul.bf16.vlgmr.msra.gmra.mxu3 %v1656_v60 }
  0x28   :  { %475 = vmatpush.bf16.msrb.mxu0 %v970_v53 }
  0x29   :  { %488 = vmatpush.bf16.msrb.mxu1 %v1098_v56  ;;  %501 = vmatpush.bf16.msrb.mxu2 %v974_v57 }
  0x2a   :  { %514 = vmatpush.bf16.msrb.mxu3 %v1102_v61 }
  0x2c   :  { %476 = vmatpush.bf16.msrb.mxu0 %v954_v3 }
  0x2d   :  { %489 = vmatpush.bf16.msrb.mxu1 %v1082_v4  ;;  %502 = vmatpush.bf16.msrb.mxu2 %v958_v5 }
  0x2e   :  { %515 = vmatpush.bf16.msrb.mxu3 %v1086_v9 }
  0x30   :  { %477 = vmatpush.bf16.msrb.mxu0 %v938_v15 }
  0x31   :  { %490 = vmatpush.bf16.msrb.mxu1 %v1066_v16  ;;  %503 = vmatpush.bf16.msrb.mxu2 %v942_v17 }
  0x32   :  { %516 = vmatpush.bf16.msrb.mxu3 %v1070_v21 }
  0x33   :  { %10 = vsyncpa [#allocation3], 0  ;;  %v1288_v37 = vld [vmem:[%s1907_s1 + $0x14c] sm:$0xf]  ;;  %v1035_v38 = vld [vmem:[%s1907_s1 + $0x158] sm:$0xf0]  ;;  %v906_v39 = vor.u32 %v1258_v29, %v905_v28  ;;  %v1034_v40 = vor.u32 %v1290_v33, %v1033_v32  ;;  %v910_v41 = vor.u32 %v1256_v34, %v907_v36 }
  0x34   :  { %478 = vmatpush.bf16.msrb.mxu0 %v922_v27  ;;  %v889_v42 = vld [vmem:[%s1907_s1 + $0x28] sm:$0xf]  ;;  %v1254_v43 = vld [vmem:[%s1907_s1 + $0x34] sm:$0xf0]  ;;  %v1038_v45 = vor.u32 %v1288_v37, %v1035_v38  ;;  %v1252_v47 = vld [vmem:[%s1907_s1 + $0x2c] sm:$0xf] }
  0x35   :  { %491 = vmatpush.bf16.msrb.mxu1 %v1050_v30  ;;  %504 = vmatpush.bf16.msrb.mxu2 %v926_v31  ;;  %v1017_v44 = vld [vmem:[%s1907_s1 + $0x128] sm:$0xf]  ;;  %v1286_v46 = vld [vmem:[%s1907_s1 + $0x134] sm:$0xf0]  ;;  %v891_v48 = vld [vmem:[%s1907_s1 + $0x38] sm:$0xf0]  ;;  %v890_v51 = vor.u32 %v1254_v43, %v889_v42 }
  0x36   :  { %517 = vmatpush.bf16.msrb.mxu3 %v1054_v35  ;;  %v1284_v49 = vld [vmem:[%s1907_s1 + $0x12c] sm:$0xf]  ;;  %v1019_v50 = vld [vmem:[%s1907_s1 + $0x138] sm:$0xf0]  ;;  %v1018_v52 = vor.u32 %v1286_v46, %v1017_v44  ;;  %v894_v53 = vor.u32 %v1252_v47, %v891_v48  ;;  %v873_v54 = vld [vmem:[%s1907_s1 + $0x8] sm:$0xf] }
  0x37   :  { %v1250_v55 = vld [vmem:[%s1907_s1 + $0x14] sm:$0xf0]  ;;  %v1001_v56 = vld [vmem:[%s1907_s1 + $0x108] sm:$0xf]  ;;  %v1022_v57 = vor.u32 %v1284_v49, %v1019_v50  ;;  %v1248_v61 = vld [vmem:[%s1907_s1 + $0xc] sm:$0xf] }
  0x38   :  { %479 = vmatpush.bf16.msrb.mxu0 %v906_v39  ;;  %v1282_v59 = vld [vmem:[%s1907_s1 + $0x114] sm:$0xf0]  ;;  %v875_v62 = vld [vmem:[%s1907_s1 + $0x18] sm:$0xf0]  ;;  %v1280_v63 = vld [vmem:[%s1907_s1 + $0x10c] sm:$0xf]  ;;  %v874_v1 = vor.u32 %v1250_v55, %v873_v54 }
  0x39   :  { %492 = vmatpush.bf16.msrb.mxu1 %v1034_v40  ;;  %505 = vmatpush.bf16.msrb.mxu2 %v910_v41  ;;  %v1003_v0 = vld [vmem:[%s1907_s1 + $0x118] sm:$0xf0]  ;;  %v1002_v2 = vor.u32 %v1282_v59, %v1001_v56  ;;  %v878_v3 = vor.u32 %v1248_v61, %v875_v62  ;;  %v1317_v8 = vld [vmem:[%s1909_s3 + $0x30] sm:$0xff]  ;;  %v1316_v10 = vld [vmem:[%s1909_s3 + $0x28] sm:$0xff]  ;;  %s1371_s7 = smov [#allocation2]   ;;  %s854_s11 = sshll.u32 %s1911_s5, 4  ;;  %s855_s11 = int_to_ptr.hbm [resolvable:$true] %s854_s11 }
  0x3a   :  { %518 = vmatpush.bf16.msrb.mxu3 %v1038_v45  ;;  %v1006_v4 = vor.u32 %v1280_v63, %v1003_v0  ;;  %v1318_v5 = vld [vmem:[%s1909_s3 + $0x38] sm:$0xff]  ;;  %v1325_v9 = vld [vmem:[%s1909_s3 + $0x70] sm:$0xff]  ;;  %v1324_v11 = vld [vmem:[%s1909_s3 + $0x68] sm:$0xff]  ;;  %s852_s8 = sshll.u32 %s1371_s7, 4  ;;  %s853_s8 = int_to_ptr.vmem [resolvable:$true] %s852_s8 }
  0x3b   :  { %v1326_v6 = vld [vmem:[%s1909_s3 + $0x78] sm:$0xff]  ;;  %v1315_v12 = vld [vmem:[%s1909_s3 + $0x20] sm:$0xff]  ;;  %v1313_v14 = vld [vmem:[%s1909_s3 + $0x10] sm:$0xff] }
  0x3c   :  { %480 = vmatpush.bf16.msrb.mxu0 %v890_v51  ;;  %v1334_v7 = vld [vmem:[%s1909_s3 + $0xb8] sm:$0xff]  ;;  %v1321_v15 = vld [vmem:[%s1909_s3 + $0x50] sm:$0xff]  ;;  %v1312_v17 = vld [vmem:[%s1909_s3 + $0x8] sm:$0xff] }
  0x3d   :  { %493 = vmatpush.bf16.msrb.mxu1 %v1018_v52  ;;  %506 = vmatpush.bf16.msrb.mxu2 %v894_v53  ;;  %v1322_v13 = vld [vmem:[%s1909_s3 + $0x58] sm:$0xff]  ;;  %v1333_v16 = vld [vmem:[%s1909_s3 + $0xb0] sm:$0xff]  ;;  %v1320_v18 = vld [vmem:[%s1909_s3 + $0x48] sm:$0xff] }
  0x3e   :  { %519 = vmatpush.bf16.msrb.mxu3 %v1022_v57  ;;  %v1342_v19 = vld [vmem:[%s1909_s3 + $0xf8] sm:$0xff]  ;;  %v1332_v20 = vld [vmem:[%s1909_s3 + $0xa8] sm:$0xff]  ;;  %v1311_v21 = vld [vmem:[%s1909_s3] sm:$0xff] }
  0x3f   :  { %v1319_v22 = vld [vmem:[%s1909_s3 + $0x40] sm:$0xff]  ;;  %v1341_v23 = vld [vmem:[%s1909_s3 + $0xf0] sm:$0xff]  ;;  %v1340_v25 = vld [vmem:[%s1909_s3 + $0xe8] sm:$0xff] }
  0x40   :  { %481 = vmatpush.bf16.msrb.mxu0 %v874_v1  ;;  %v1331_v24 = vld [vmem:[%s1909_s3 + $0xa0] sm:$0xff]  ;;  %v1330_v26 = vld [vmem:[%s1909_s3 + $0x98] sm:$0xff]  ;;  %v1329_v28 = vld [vmem:[%s1909_s3 + $0x90] sm:$0xff] }
  0x41   :  { %494 = vmatpush.bf16.msrb.mxu1 %v1002_v2  ;;  %507 = vmatpush.bf16.msrb.mxu2 %v878_v3  ;;  %v1339_v27 = vld [vmem:[%s1909_s3 + $0xe0] sm:$0xff]  ;;  %v1338_v30 = vld [vmem:[%s1909_s3 + $0xd8] sm:$0xff]  ;;  %v1328_v32 = vld [vmem:[%s1909_s3 + $0x88] sm:$0xff] }
  0x42   :  { %520 = vmatpush.bf16.msrb.mxu3 %v1006_v4  ;;  %v86_v29 = vld [vmem:[%s1908_s2] sm:$0xf]  ;;  %v1337_v34 = vld [vmem:[%s1909_s3 + $0xd0] sm:$0xff]  ;;  %v1336_v40 = vld [vmem:[%s1909_s3 + $0xc8] sm:$0xff] }
  0x43   :  { %482 = vmatmul.bf16.vlgmr.msrb.gmra.mxu0 %v1651_v58  ;;  %v88_v31 = vperm.slane %v86_v29, 0  ;;  %v89_v37 = vperm.slane %v86_v29, 1  ;;  %v1327_v38 = vld [vmem:[%s1909_s3 + $0x80] sm:$0xff]  ;;  %v90_v54 = vperm.slane %v86_v29, 2  ;;  %v91_v61 = vperm.slane %v86_v29, 3 }
  0x44   :  { %794 = vmatpush.bf16.msra.mxu0 %v1318_v5  ;;  %495 = vmatmul.bf16.vlgmr.msrb.gmra.mxu1 %v1656_v60  ;;  %v1335_v48 = vld [vmem:[%s1909_s3 + $0xc0] sm:$0xff] }
  0x45   :  { %807 = vmatpush.bf16.msra.mxu1 %v1326_v6  ;;  %508 = vmatmul.bf16.vlgmr.msrb.gmra.mxu2 %v1651_v58  ;;  %v1323_v58 = vld [vmem:[%s1909_s3 + $0x60] sm:$0xff] }
  0x46   :  { %521 = vmatmul.bf16.vlgmr.msrb.gmra.mxu3 %v1656_v60  ;;  %820 = vmatpush.bf16.msra.mxu2 %v1334_v7  ;;  %v1314_v60 = vld [vmem:[%s1909_s3 + $0x18] sm:$0xff] }
  0x47   :  { %833 = vmatpush.bf16.msra.mxu3 %v1342_v19 }
  0x48   :  { %795 = vmatpush.bf16.msra.mxu0 %v1317_v8 }
  0x49   :  { %808 = vmatpush.bf16.msra.mxu1 %v1325_v9 }
  0x4a   :  { %821 = vmatpush.bf16.msra.mxu2 %v1333_v16 }
  0x4b   :  { %834 = vmatpush.bf16.msra.mxu3 %v1341_v23 }
  0x4c   :  { %796 = vmatpush.bf16.msra.mxu0 %v1316_v10 }
  0x4d   :  { %809 = vmatpush.bf16.msra.mxu1 %v1324_v11 }
  0x4e   :  { %822 = vmatpush.bf16.msra.mxu2 %v1332_v20 }
  0x4f   :  { %835 = vmatpush.bf16.msra.mxu3 %v1340_v25 }
  0x50   :  { %797 = vmatpush.bf16.msra.mxu0 %v1315_v12 }
  0x51   :  { %810 = vmatpush.bf16.msra.mxu1 %v1323_v58 }
  0x52   :  { %823 = vmatpush.bf16.msra.mxu2 %v1331_v24 }
  0x53   :  { %836 = vmatpush.bf16.msra.mxu3 %v1339_v27 }
  0x54   :  { %798 = vmatpush.bf16.msra.mxu0 %v1314_v60  ;;  %v1344_v60 = vld [vmem:[%s1910_s4] ss:$0 sm:$0xff] }
  0x55   :  { %811 = vmatpush.bf16.msra.mxu1 %v1322_v13 }
  0x56   :  { %824 = vmatpush.bf16.msra.mxu2 %v1330_v26 }
  0x57   :  { %837 = vmatpush.bf16.msra.mxu3 %v1338_v30 }
  0x58   :  { %799 = vmatpush.bf16.msra.mxu0 %v1313_v14 }
  0x59   :  { %812 = vmatpush.bf16.msra.mxu1 %v1321_v15 }
  0x5a   :  { %825 = vmatpush.bf16.msra.mxu2 %v1329_v28 }
  0x5b   :  { %838 = vmatpush.bf16.msra.mxu3 %v1337_v34 }
  0x5c   :  { %800 = vmatpush.bf16.msra.mxu0 %v1312_v17 }
  0x5d   :  { %813 = vmatpush.bf16.msra.mxu1 %v1320_v18 }
  0x5e   :  { %826 = vmatpush.bf16.msra.mxu2 %v1328_v32 }
  0x5f   :  { %839 = vmatpush.bf16.msra.mxu3 %v1336_v40 }
  0x60   :  { %801 = vmatpush.bf16.msra.mxu0 %v1311_v21 }
  0x61   :  { %814 = vmatpush.bf16.msra.mxu1 %v1319_v22 }
  0x62   :  { %827 = vmatpush.bf16.msra.mxu2 %v1327_v38 }
  0x63   :  { %840 = vmatpush.bf16.msra.mxu3 %v1335_v48 }
  0xa0   :  { %v431_v33 = vpop.f32.mrf.mxu0 }
  0xa1   :  { %v432_v35 = vadd.f32 %v431_v33, %v88_v31 }
  0xa3   :  { %v444_v36 = vpop.f32.mrf.mxu1 }
  0xa4   :  { %v445_v39 = vadd.f32 %v444_v36, %v432_v35 }
  0xa6   :  { %v526_v42 = vmax.f32 %v445_v39, 0.0 }
  0xa7   :  { %v457_v41 = vpop.f32.mrf.mxu2 }
  0xa8   :  { %v458_v43 = vadd.f32 %v457_v41, %v89_v37  ;;  %v530_v45 = vpack.c.bf16 %v526_v42, %v526_v42  ;;  %v433_v47 = vpop.f32.mrf.mxu0 }
  0xaa   :  { %v470_v44 = vpop.f32.mrf.mxu3  ;;  %802 = vmatmul.bf16.vlgmr.msra.gmra.mxu0 %v530_v45 }
  0xab   :  { %v471_v46 = vadd.f32 %v470_v44, %v458_v43  ;;  %v446_v49 = vpop.f32.mrf.mxu1 }
  0xad   :  { %v527_v50 = vmax.f32 %v471_v46, 0.0 }
  0xaf   :  { %v531_v51 = vpack.c.bf16 %v527_v50, %v527_v50  ;;  %v459_v52 = vpop.f32.mrf.mxu2 }
  0xb1   :  { %815 = vmatmul.bf16.vlgmr.msra.gmra.mxu1 %v531_v51 }
  0xb2   :  { %v472_v53 = vpop.f32.mrf.mxu3 }
  0xc0   :  { %v483_v55 = vpop.f32.mrf.mxu0 }
  0xc1   :  { %v484_v56 = vadd.f32 %v483_v55, %v90_v54  ;;  %v496_v57 = vpop.f32.mrf.mxu1 }
  0xc3   :  { %v497_v59 = vadd.f32 %v496_v57, %v484_v56 }
  0xc5   :  { %v528_v62 = vmax.f32 %v497_v59, 0.0 }
  0xc7   :  { %v532_v63 = vpack.c.bf16 %v528_v62, %v528_v62 }
  0xc8   :  { %v509_v0 = vpop.f32.mrf.mxu2  ;;  %v485_v3 = vpop.f32.mrf.mxu0 }
  0xc9   :  { %v510_v1 = vadd.f32 %v509_v0, %v91_v61  ;;  %v522_v2 = vpop.f32.mrf.mxu3  ;;  %v498_v4 = vpop.f32.mrf.mxu1  ;;  %828 = vmatmul.bf16.vlgmr.msra.gmra.mxu2 %v532_v63 }
  0xcb   :  { %v523_v5 = vadd.f32 %v522_v2, %v510_v1 }
  0xcd   :  { %v529_v6 = vmax.f32 %v523_v5, 0.0 }
  0xcf   :  { %v533_v7 = vpack.c.bf16 %v529_v6, %v529_v6 }
  0xd0   :  { %v511_v8 = vpop.f32.mrf.mxu2 }
  0xd1   :  { %v524_v9 = vpop.f32.mrf.mxu3  ;;  %841 = vmatmul.bf16.vlgmr.msra.gmra.mxu3 %v533_v7 }
 0x127   :  { %v803_v10 = vpop.f32.mrf.mxu0 }
 0x128   :  { %v804_v13 = vadd.f32 %v1344_v60, %v803_v10 }
 0x12e   :  { %v816_v11 = vpop.f32.mrf.mxu1 }
 0x12f   :  { %v805_v12 = vpop.f32.mrf.mxu0  ;;  %v817_v15 = vadd.f32 %v816_v11, %v804_v13 }
 0x136   :  { %v818_v58 = vpop.f32.mrf.mxu1 }
 0x14c   :  { %v829_v14 = vpop.f32.mrf.mxu2 }
 0x14d   :  { %v830_v16 = vadd.f32 %v829_v14, %v817_v15 }
 0x154   :  { %v842_v17 = vpop.f32.mrf.mxu3  ;;  %v831_v19 = vpop.f32.mrf.mxu2 }
 0x155   :  { %v843_v18 = vadd.f32 %v842_v17, %v830_v16 }
 0x157   :  { %846 = vst [vmem:[#allocation2] sm:$0x3] %v843_v18 }
 0x158   :  { %857 = dma.vmem_to_hbm [thread:$0]  %s853_s8, 32, %s855_s11, [#allocation3]  }
 0x15c   :  { %v844_v20 = vpop.f32.mrf.mxu3 }
 0x15d   :  { %1369 = dma.done.wait [#allocation3], 32  }
 0x15e   :  { %1370 = vsyncadd [#allocation3], 4294967264 }
 0x15f   :  { %862 = vsyncpa [#allocation3], 1 }

</bundles_post_ra>
